<compile_context>
chip_gen: v6e
topology: v6e:2x2x1
jax: 0.10.0
libtpu: 0.0.40
codegen_flags: <defaults>
</compile_context>

<pallas_src>
import functools

import numpy as np

import jax
import jax.numpy as jnp
from jax.experimental import pallas as pl
from jax.experimental.pallas import tpu as pltpu


def _interleave(x0, x1, axis):
    """Interleave two equal-shaped arrays along `axis` (x0 supplies even indices)."""
    y = jnp.concatenate([jnp.expand_dims(x0, axis + 1),
                         jnp.expand_dims(x1, axis + 1)], axis=axis + 1)
    new_shape = list(x0.shape)
    new_shape[axis] *= 2
    return y.reshape(tuple(new_shape))


def _fold_weights(weight):
    """(Cout, Cin, 3, 3) f32 -> (4, 4*Cin, Cout) f32 sub-pixel folded weights.

    Parity index = 2*a + b (a = output-row parity, b = output-col parity); K index =
    (2*rho + sigma)*Cin + ci where (rho, sigma) is the 2x2 window slot on the original image.
    """
    cout, cin = weight.shape[0], weight.shape[1]
    # mask[a, rho, kh] = 1 iff original kernel row kh folds into window slot rho for parity a.
    m = jnp.array([[[1.0, 0.0, 0.0], [0.0, 1.0, 1.0]],
                   [[1.0, 1.0, 0.0], [0.0, 0.0, 1.0]]], dtype=weight.dtype)
    wf = jnp.einsum("arh,bsw,oihw->abrsio", m, m, weight)
    return wf.reshape(4, 4 * cin, cout)


def _up_conv_kernel(x_ref, w_ref, b_ref, o_ref, *, th, w_orig, cin, cout):
    # x_ref: (1, H+2, W+2, Cin) bf16  zero-padded ORIGINAL-resolution image (full per batch)
    # w_ref: (4, 4*Cin, Cout)   bf16  folded sub-pixel weights (one slab per output parity)
    # b_ref: (1, Cout)          f32
    # o_ref: (1, 2*th, 2*W, Cout)     output row block, NHWC, parities interleaved
    r = pl.program_id(1)
    m = th * w_orig

    # Halo slab of original rows [r*th, r*th + th + 2) (1-row halo on each side via the pad).
    t = x_ref[0, pl.ds(r * th, th + 2), :, :]                      # (th+2, W+2, Cin)

    def window(dy, dx):
        return t[dy:dy + th, dx:dx + w_orig, :].reshape(m, cin)

    bvec = b_ref[...]                                              # (1, Cout) f32
    planes = []
    for a in (0, 1):
        row_planes = []
        for b in (0, 1):
            # K-concatenated 2x2 im2col for this output parity: single MXU dot, K = 4*Cin.
            lhs = jnp.concatenate([window(a + dr, b + dc)
                                   for dr in (0, 1) for dc in (0, 1)], axis=1)
            p = jnp.dot(lhs, w_ref[2 * a + b],
                        preferred_element_type=jnp.float32)        # (M, Cout) f32
            p = jnp.maximum(p + bvec, 0.0).astype(o_ref.dtype)     # bias + ReLU in f32
            row_planes.append(p.reshape(th, w_orig, cout))
        # Column-parity interleave: (th, W, Cout) x2 -> (th, 2W, Cout)
        planes.append(_interleave(row_planes[0], row_planes[1], axis=1))
    # Row-parity interleave: (th, 2W, Cout) x2 -> (2*th, 2W, Cout)
    out = _interleave(planes[0], planes[1], axis=0)
    o_ref[...] = out[None]


def _vmem_estimate(h, w, cin, cout, th, out_bytes):
    """Conservative per-step VMEM estimate (bytes) for row-block size `th`."""
    img = (h + 2) * (w + 2) * cin * 2                  # padded bf16 image (resident)
    out_blk = 4 * th * w * cout * out_bytes            # (2*th, 2W, Cout) output block
    lhs = th * w * 4 * cin * 2                         # one parity LHS (bf16)
    plane = th * w * cout * 4                          # one parity plane (f32)
    wts = 4 * 4 * cin * cout * 2 + cout * 4
    # double-buffered I/O + live LHS/planes + interleave temps + slack
    return 2 * img + 2 * out_blk + 5 * lhs + 24 * plane + 2 * wts + (2 << 20)


def _pick_th(h, w, cin, cout, out_bytes, row_target, vmem_budget):
    """Largest divisor of H whose row block fits the row target and the VMEM budget."""
    best = 1
    for d in range(1, h + 1):
        if h % d != 0:
            continue
        if 2 * d * 2 * w > max(row_target, 4 * w):
            continue
        if _vmem_estimate(h, w, cin, cout, d, out_bytes) > vmem_budget:
            continue
        best = d
    return best


@functools.partial(
    jax.jit,
    static_argnames=("scale_factor", "stride", "padding", "row_block_target",
                     "channels_last", "out_dtype"))
def up_conv_forward(x, weight, bias, *, scale_factor=2, stride=1, padding=1,
                    row_block_target=2048, channels_last=False, out_dtype=jnp.float32):
    """Matches torch up_conv.forward: UpsamplingNearest2d(2) -> Conv2d(3,1,1) -> ReLU.

    x: (N, Cin, H, W) f32, weight: (Cout, Cin, 3, 3) f32, bias: (Cout,) f32
    returns (N, Cout, 2H, 2W) in `out_dtype` (NCHW; pass channels_last=True for NHWC and no
    epilogue transpose).

    Precision policy: operands are cast to bf16 for the MXU, accumulation / bias / ReLU in f32.
    """
    # TODO(synk): kernel is specialized to the module defaults (k=3, s=1, p=1, scale=2);
    # other hyperparameter combinations would need a different sub-pixel folding.
    assert scale_factor == 2 and stride == 1 and padding == 1
    n, cin, h, w = x.shape
    cout, cin_w, kh, kw = weight.shape
    assert cin == cin_w and kh == 3 and kw == 3
    hu, wu = 2 * h, 2 * w

    out_bytes = int(np.dtype(out_dtype).itemsize)
    try:
        vmem_cap = int(getattr(pltpu.get_tpu_info(), "vmem_capacity_bytes",
                               64 * 1024 * 1024))
    except Exception:  # pragma: no cover - hardware query is best-effort
        vmem_cap = 64 * 1024 * 1024
    vmem_budget = max(16 * 1024 * 1024, min(int(vmem_cap * 0.7), 100 * 1024 * 1024))

    th = _pick_th(h, w, cin, cout, out_bytes, row_block_target, vmem_budget)
    r_blocks = h // th

    # Host glue only touches the SMALL original-resolution input: NCHW->NHWC, 1-px pad, bf16.
    # (No upsampled or im2col tensor is ever materialized in HBM.)
    xp = jnp.pad(jnp.transpose(x, (0, 2, 3, 1)),
                 ((0, 0), (1, 1), (1, 1), (0, 0))).astype(jnp.bfloat16)
    wf = _fold_weights(weight).astype(jnp.bfloat16)                # (4, 4*Cin, Cout)
    bt = bias.reshape(1, cout).astype(jnp.float32)

    kernel = functools.partial(_up_conv_kernel, th=th, w_orig=w, cin=cin, cout=cout)

    out = pl.pallas_call(
        kernel,
        out_shape=jax.ShapeDtypeStruct((n, hu, wu, cout), out_dtype),
        grid_spec=pltpu.PrefetchScalarGridSpec(
            num_scalar_prefetch=0,
            grid=(n, r_blocks),
            in_specs=[
                # Padded original image per batch element (block index constant across r).
                pl.BlockSpec((1, h + 2, w + 2, cin), lambda i, r: (i, 0, 0, 0)),
                pl.BlockSpec((4, 4 * cin, cout), lambda i, r: (0, 0, 0)),
                pl.BlockSpec((1, cout), lambda i, r: (0, 0)),
            ],
            out_specs=pl.BlockSpec((1, 2 * th, wu, cout), lambda i, r: (i, r, 0, 0)),
        ),
        compiler_params=pltpu.CompilerParams(
            dimension_semantics=("parallel", "parallel"),
            vmem_limit_bytes=vmem_budget,
        ),
    )(xp, wf, bt)

    if channels_last:
        return out
    # TODO(synk): this NHWC->NCHW transpose is the only remaining epilogue pass; callers that
    # accept channels-last activations should pass channels_last=True to skip it entirely.
    return jnp.transpose(out, (0, 3, 1, 2))


def _reference_up_conv(x, weight, bias, scale_factor=2, padding=1):
    """Pure-JAX f32 reference of the torch module (loose check)."""
    xu = jnp.repeat(jnp.repeat(x, scale_factor, axis=2), scale_factor, axis=3)
    y = jax.lax.conv_general_dilated(
        xu, weight, window_strides=(1, 1),
        padding=((padding, padding), (padding, padding)),
        dimension_numbers=("NCHW", "OIHW", "NCHW"),
        precision=jax.lax.Precision.HIGHEST)
    return jnp.maximum(y + bias.reshape(1, -1, 1, 1), 0.0)


def _folded_reference(x, wf, bias):
    """Pure-JAX mirror of the kernel's folded math (tight check of indexing/interleave).

    x: (N, Cin, H, W) f32 (already bf16-rounded), wf: (4, 4*Cin, Cout) f32, bias: (Cout,) f32.
    """
    n, cin, h, w = x.shape
    cout = wf.shape[-1]
    xp = jnp.pad(jnp.transpose(x, (0, 2, 3, 1)), ((0, 0), (1, 1), (1, 1), (0, 0)))
    y = jnp.zeros((n, 2 * h, 2 * w, cout), jnp.float32)
    for a in (0, 1):
        for b in (0, 1):
            lhs = jnp.concatenate(
                [xp[:, a + dr:a + dr + h, b + dc:b + dc + w, :]
                 for dr in (0, 1) for dc in (0, 1)], axis=-1)      # (N, H, W, 4*Cin)
            p = jnp.einsum("nhwk,ko->nhwo", lhs, wf[2 * a + b],
                           precision=jax.lax.Precision.HIGHEST)
            y = y.at[:, a::2, b::2, :].set(p)
    y = jnp.maximum(y + bias.reshape(1, 1, 1, cout), 0.0)
    return jnp.transpose(y, (0, 3, 1, 2))


if __name__ == "__main__":
    def _run_case(key, n, cin, h, w, cout, row_block_target):
        kx, kw_, kb = jax.random.split(key, 3)
        x = jax.random.normal(kx, (n, cin, h, w), dtype=jnp.float32)
        fan_in = cin * 3 * 3
        bound = 1.0 / (fan_in ** 0.5)
        weight = jax.random.uniform(kw_, (cout, cin, 3, 3), jnp.float32, -bound, bound)
        bias = jax.random.uniform(kb, (cout,), jnp.float32, -bound, bound)

        out = jax.block_until_ready(
            up_conv_forward(x, weight, bias, row_block_target=row_block_target))
        assert out.shape == (n, cout, 2 * h, 2 * w), out.shape

        # Tight check: pure-JAX reference that mirrors the kernel's folded bf16 math exactly.
        xb = x.astype(jnp.bfloat16).astype(jnp.float32)
        wfb = _fold_weights(weight).astype(jnp.bfloat16).astype(jnp.float32)
        ref_fold = jax.block_until_ready(_folded_reference(xb, wfb, bias))
        err_f = float(jnp.max(jnp.abs(out - ref_fold)))
        assert jnp.allclose(out, ref_fold, atol=2e-3, rtol=2e-3), err_f

        # Loose check vs. the true f32 module semantics (bf16 operand rounding only).
        ref = jax.block_until_ready(_reference_up_conv(x, weight, bias))
        err = float(jnp.max(jnp.abs(out - ref)))
        assert jnp.allclose(out, ref, atol=5e-2, rtol=5e-2), err

    key = jax.random.PRNGKey(0)
    k1, k2 = jax.random.split(key)
    # Main config: grid=(2, 2) -> exercises the halo row-block path.
    _run_case(k1, n=2, cin=4, h=16, w=16, cout=8, row_block_target=512)
    # Secondary config: odd channel counts, non-multiple-of-8 widths, single row block.
    _run_case(k2, n=1, cin=3, h=8, w=12, cout=5, row_block_target=2048)
    print("KERNEL_OK")
</pallas_src>

<mosaic_0001>
module attributes {stable_mosaic.version = 11 : i64} {
  func.func @_up_conv_kernel(%arg0: i32, %arg1: i32, %arg2: memref<1x18x18x4xbf16, #tpu.memory_space<vmem>>, %arg3: memref<4x16x8xbf16, #tpu.memory_space<vmem>>, %arg4: memref<1x8xf32, #tpu.memory_space<vmem>>, %arg5: memref<1x16x32x8xf32, #tpu.memory_space<vmem>>) attributes {dimension_semantics = [#tpu.dimension_semantics<parallel>, #tpu.dimension_semantics<parallel>], iteration_bounds = array<i64: 2, 2>, scalar_prefetch = 0 : i64, scratch_operands = 0 : i64, tpu.core_type = #tpu.core_type<tc>, window_params = [{transform_indices = @transform_0, window_bounds = array<i64: 1, 18, 18, 4>}, {pipeline_mode = #tpu.pipeline_mode<synchronous>, transform_indices = @transform_1, window_bounds = array<i64: 4, 16, 8>}, {pipeline_mode = #tpu.pipeline_mode<synchronous>, transform_indices = @transform_2, window_bounds = array<i64: 1, 8>}, {transform_indices = @transform_3, window_bounds = array<i64: 1, 16, 32, 8>}]} {
    %c8_i32 = arith.constant 8 : i32
    %0 = arith.muli %arg1, %c8_i32 : i32
    %c0 = arith.constant 0 : index
    %1 = arith.index_cast %0 : i32 to index
    %c0_0 = arith.constant 0 : index
    %c0_1 = arith.constant 0 : index
    %2 = vector.load %arg2[%c0, %1, %c0_0, %c0_1] : memref<1x18x18x4xbf16, #tpu.memory_space<vmem>>, vector<1x10x18x4xbf16>
    %3 = vector.shape_cast %2 : vector<1x10x18x4xbf16> to vector<10x18x4xbf16>
    %c0_2 = arith.constant 0 : index
    %c0_3 = arith.constant 0 : index
    %4 = vector.load %arg4[%c0_2, %c0_3] : memref<1x8xf32, #tpu.memory_space<vmem>>, vector<1x8xf32>
    %5 = vector.extract_strided_slice %3 {offsets = [0, 0, 0], sizes = [8, 16, 4], strides = [1, 1, 1]} : vector<10x18x4xbf16> to vector<8x16x4xbf16>
    %6 = vector.shape_cast %5 : vector<8x16x4xbf16> to vector<128x4xbf16>
    %7 = vector.extract_strided_slice %3 {offsets = [0, 1, 0], sizes = [8, 16, 4], strides = [1, 1, 1]} : vector<10x18x4xbf16> to vector<8x16x4xbf16>
    %8 = vector.shape_cast %7 : vector<8x16x4xbf16> to vector<128x4xbf16>
    %9 = vector.extract_strided_slice %3 {offsets = [1, 0, 0], sizes = [8, 16, 4], strides = [1, 1, 1]} : vector<10x18x4xbf16> to vector<8x16x4xbf16>
    %10 = vector.shape_cast %9 : vector<8x16x4xbf16> to vector<128x4xbf16>
    %11 = vector.extract_strided_slice %3 {offsets = [1, 1, 0], sizes = [8, 16, 4], strides = [1, 1, 1]} : vector<10x18x4xbf16> to vector<8x16x4xbf16>
    %12 = vector.shape_cast %11 : vector<8x16x4xbf16> to vector<128x4xbf16>
    %13 = tpu.concatenate %6, %8, %10, %12 in 1 : vector<128x4xbf16>, vector<128x4xbf16>, vector<128x4xbf16>, vector<128x4xbf16> -> vector<128x16xbf16>
    %c0_4 = arith.constant 0 : index
    %c0_5 = arith.constant 0 : index
    %c0_6 = arith.constant 0 : index
    %14 = vector.load %arg3[%c0_4, %c0_5, %c0_6] : memref<4x16x8xbf16, #tpu.memory_space<vmem>>, vector<1x16x8xbf16>
    %15 = vector.shape_cast %14 : vector<1x16x8xbf16> to vector<16x8xbf16>
    %cst = arith.constant dense<0.000000e+00> : vector<128x8xf32>
    %16 = tpu.matmul %13, %15, %cst {dimension_numbers = #tpu.dot_dimension_numbers<[1], [0], [0], [1], [0, 0, 1, 1], [], []>} : vector<128x16xbf16>, vector<16x8xbf16>, vector<128x8xf32> -> vector<128x8xf32>
    %17 = vector.broadcast %4 : vector<1x8xf32> to vector<128x8xf32>
    %18 = arith.addf %16, %17 : vector<128x8xf32>
    %cst_7 = arith.constant 0.000000e+00 : f32
    %19 = vector.broadcast %cst_7 : f32 to vector<128x8xf32>
    %20 = arith.maximumf %18, %19 : vector<128x8xf32>
    %21 = vector.shape_cast %20 : vector<128x8xf32> to vector<8x16x8xf32>
    %22 = vector.extract_strided_slice %3 {offsets = [0, 1, 0], sizes = [8, 16, 4], strides = [1, 1, 1]} : vector<10x18x4xbf16> to vector<8x16x4xbf16>
    %23 = vector.shape_cast %22 : vector<8x16x4xbf16> to vector<128x4xbf16>
    %24 = vector.extract_strided_slice %3 {offsets = [0, 2, 0], sizes = [8, 16, 4], strides = [1, 1, 1]} : vector<10x18x4xbf16> to vector<8x16x4xbf16>
    %25 = vector.shape_cast %24 : vector<8x16x4xbf16> to vector<128x4xbf16>
    %26 = vector.extract_strided_slice %3 {offsets = [1, 1, 0], sizes = [8, 16, 4], strides = [1, 1, 1]} : vector<10x18x4xbf16> to vector<8x16x4xbf16>
    %27 = vector.shape_cast %26 : vector<8x16x4xbf16> to vector<128x4xbf16>
    %28 = vector.extract_strided_slice %3 {offsets = [1, 2, 0], sizes = [8, 16, 4], strides = [1, 1, 1]} : vector<10x18x4xbf16> to vector<8x16x4xbf16>
    %29 = vector.shape_cast %28 : vector<8x16x4xbf16> to vector<128x4xbf16>
    %30 = tpu.concatenate %23, %25, %27, %29 in 1 : vector<128x4xbf16>, vector<128x4xbf16>, vector<128x4xbf16>, vector<128x4xbf16> -> vector<128x16xbf16>
    %c1 = arith.constant 1 : index
    %c0_8 = arith.constant 0 : index
    %c0_9 = arith.constant 0 : index
    %31 = vector.load %arg3[%c1, %c0_8, %c0_9] : memref<4x16x8xbf16, #tpu.memory_space<vmem>>, vector<1x16x8xbf16>
    %32 = vector.shape_cast %31 : vector<1x16x8xbf16> to vector<16x8xbf16>
    %cst_10 = arith.constant dense<0.000000e+00> : vector<128x8xf32>
    %33 = tpu.matmul %30, %32, %cst_10 {dimension_numbers = #tpu.dot_dimension_numbers<[1], [0], [0], [1], [0, 0, 1, 1], [], []>} : vector<128x16xbf16>, vector<16x8xbf16>, vector<128x8xf32> -> vector<128x8xf32>
    %34 = vector.broadcast %4 : vector<1x8xf32> to vector<128x8xf32>
    %35 = arith.addf %33, %34 : vector<128x8xf32>
    %cst_11 = arith.constant 0.000000e+00 : f32
    %36 = vector.broadcast %cst_11 : f32 to vector<128x8xf32>
    %37 = arith.maximumf %35, %36 : vector<128x8xf32>
    %38 = vector.shape_cast %37 : vector<128x8xf32> to vector<8x16x8xf32>
    %39 = vector.shape_cast %21 : vector<8x16x8xf32> to vector<8x16x1x8xf32>
    %40 = vector.shape_cast %38 : vector<8x16x8xf32> to vector<8x16x1x8xf32>
    %41 = tpu.concatenate %39, %40 in 2 : vector<8x16x1x8xf32>, vector<8x16x1x8xf32> -> vector<8x16x2x8xf32>
    %42 = vector.shape_cast %41 : vector<8x16x2x8xf32> to vector<8x32x8xf32>
    %43 = vector.extract_strided_slice %3 {offsets = [1, 0, 0], sizes = [8, 16, 4], strides = [1, 1, 1]} : vector<10x18x4xbf16> to vector<8x16x4xbf16>
    %44 = vector.shape_cast %43 : vector<8x16x4xbf16> to vector<128x4xbf16>
    %45 = vector.extract_strided_slice %3 {offsets = [1, 1, 0], sizes = [8, 16, 4], strides = [1, 1, 1]} : vector<10x18x4xbf16> to vector<8x16x4xbf16>
    %46 = vector.shape_cast %45 : vector<8x16x4xbf16> to vector<128x4xbf16>
    %47 = vector.extract_strided_slice %3 {offsets = [2, 0, 0], sizes = [8, 16, 4], strides = [1, 1, 1]} : vector<10x18x4xbf16> to vector<8x16x4xbf16>
    %48 = vector.shape_cast %47 : vector<8x16x4xbf16> to vector<128x4xbf16>
    %49 = vector.extract_strided_slice %3 {offsets = [2, 1, 0], sizes = [8, 16, 4], strides = [1, 1, 1]} : vector<10x18x4xbf16> to vector<8x16x4xbf16>
    %50 = vector.shape_cast %49 : vector<8x16x4xbf16> to vector<128x4xbf16>
    %51 = tpu.concatenate %44, %46, %48, %50 in 1 : vector<128x4xbf16>, vector<128x4xbf16>, vector<128x4xbf16>, vector<128x4xbf16> -> vector<128x16xbf16>
    %c2 = arith.constant 2 : index
    %c0_12 = arith.constant 0 : index
    %c0_13 = arith.constant 0 : index
    %52 = vector.load %arg3[%c2, %c0_12, %c0_13] : memref<4x16x8xbf16, #tpu.memory_space<vmem>>, vector<1x16x8xbf16>
    %53 = vector.shape_cast %52 : vector<1x16x8xbf16> to vector<16x8xbf16>
    %cst_14 = arith.constant dense<0.000000e+00> : vector<128x8xf32>
    %54 = tpu.matmul %51, %53, %cst_14 {dimension_numbers = #tpu.dot_dimension_numbers<[1], [0], [0], [1], [0, 0, 1, 1], [], []>} : vector<128x16xbf16>, vector<16x8xbf16>, vector<128x8xf32> -> vector<128x8xf32>
    %55 = vector.broadcast %4 : vector<1x8xf32> to vector<128x8xf32>
    %56 = arith.addf %54, %55 : vector<128x8xf32>
    %cst_15 = arith.constant 0.000000e+00 : f32
    %57 = vector.broadcast %cst_15 : f32 to vector<128x8xf32>
    %58 = arith.maximumf %56, %57 : vector<128x8xf32>
    %59 = vector.shape_cast %58 : vector<128x8xf32> to vector<8x16x8xf32>
    %60 = vector.extract_strided_slice %3 {offsets = [1, 1, 0], sizes = [8, 16, 4], strides = [1, 1, 1]} : vector<10x18x4xbf16> to vector<8x16x4xbf16>
    %61 = vector.shape_cast %60 : vector<8x16x4xbf16> to vector<128x4xbf16>
    %62 = vector.extract_strided_slice %3 {offsets = [1, 2, 0], sizes = [8, 16, 4], strides = [1, 1, 1]} : vector<10x18x4xbf16> to vector<8x16x4xbf16>
    %63 = vector.shape_cast %62 : vector<8x16x4xbf16> to vector<128x4xbf16>
    %64 = vector.extract_strided_slice %3 {offsets = [2, 1, 0], sizes = [8, 16, 4], strides = [1, 1, 1]} : vector<10x18x4xbf16> to vector<8x16x4xbf16>
    %65 = vector.shape_cast %64 : vector<8x16x4xbf16> to vector<128x4xbf16>
    %66 = vector.extract_strided_slice %3 {offsets = [2, 2, 0], sizes = [8, 16, 4], strides = [1, 1, 1]} : vector<10x18x4xbf16> to vector<8x16x4xbf16>
    %67 = vector.shape_cast %66 : vector<8x16x4xbf16> to vector<128x4xbf16>
    %68 = tpu.concatenate %61, %63, %65, %67 in 1 : vector<128x4xbf16>, vector<128x4xbf16>, vector<128x4xbf16>, vector<128x4xbf16> -> vector<128x16xbf16>
    %c3 = arith.constant 3 : index
    %c0_16 = arith.constant 0 : index
    %c0_17 = arith.constant 0 : index
    %69 = vector.load %arg3[%c3, %c0_16, %c0_17] : memref<4x16x8xbf16, #tpu.memory_space<vmem>>, vector<1x16x8xbf16>
    %70 = vector.shape_cast %69 : vector<1x16x8xbf16> to vector<16x8xbf16>
    %cst_18 = arith.constant dense<0.000000e+00> : vector<128x8xf32>
    %71 = tpu.matmul %68, %70, %cst_18 {dimension_numbers = #tpu.dot_dimension_numbers<[1], [0], [0], [1], [0, 0, 1, 1], [], []>} : vector<128x16xbf16>, vector<16x8xbf16>, vector<128x8xf32> -> vector<128x8xf32>
    %72 = vector.broadcast %4 : vector<1x8xf32> to vector<128x8xf32>
    %73 = arith.addf %71, %72 : vector<128x8xf32>
    %cst_19 = arith.constant 0.000000e+00 : f32
    %74 = vector.broadcast %cst_19 : f32 to vector<128x8xf32>
    %75 = arith.maximumf %73, %74 : vector<128x8xf32>
    %76 = vector.shape_cast %75 : vector<128x8xf32> to vector<8x16x8xf32>
    %77 = vector.shape_cast %59 : vector<8x16x8xf32> to vector<8x16x1x8xf32>
    %78 = vector.shape_cast %76 : vector<8x16x8xf32> to vector<8x16x1x8xf32>
    %79 = tpu.concatenate %77, %78 in 2 : vector<8x16x1x8xf32>, vector<8x16x1x8xf32> -> vector<8x16x2x8xf32>
    %80 = vector.shape_cast %79 : vector<8x16x2x8xf32> to vector<8x32x8xf32>
    %81 = vector.shape_cast %42 : vector<8x32x8xf32> to vector<8x1x32x8xf32>
    %82 = vector.shape_cast %80 : vector<8x32x8xf32> to vector<8x1x32x8xf32>
    %83 = tpu.concatenate %81, %82 in 1 : vector<8x1x32x8xf32>, vector<8x1x32x8xf32> -> vector<8x2x32x8xf32>
    %84 = vector.shape_cast %83 : vector<8x2x32x8xf32> to vector<16x32x8xf32>
    %85 = vector.shape_cast %84 : vector<16x32x8xf32> to vector<1x16x32x8xf32>
    %c0_20 = arith.constant 0 : index
    %c0_21 = arith.constant 0 : index
    %c0_22 = arith.constant 0 : index
    %c0_23 = arith.constant 0 : index
    %86 = vector.load %arg5[%c0_20, %c0_21, %c0_22, %c0_23] : memref<1x16x32x8xf32, #tpu.memory_space<vmem>>, vector<1x16x32x8xf32>
    tpu.vector_store %arg5[%c0_20, %c0_21, %c0_22, %c0_23], %85 {strides = array<i32>} : memref<1x16x32x8xf32, #tpu.memory_space<vmem>>, vector<1x16x32x8xf32>,
    return
  }
  func.func @transform_0(%arg0: i32, %arg1: i32) -> (i32, i32, i32, i32) {
    %c0_i32 = arith.constant 0 : i32
    %c0_i32_0 = arith.constant 0 : i32
    %c0_i32_1 = arith.constant 0 : i32
    %c0_i32_2 = arith.constant 0 : i32
    return %arg0, %c0_i32, %c0_i32_0, %c0_i32_1 : i32, i32, i32, i32
  }
  func.func @transform_1(%arg0: i32, %arg1: i32) -> (i32, i32, i32) {
    %c0_i32 = arith.constant 0 : i32
    %c0_i32_0 = arith.constant 0 : i32
    %c0_i32_1 = arith.constant 0 : i32
    %c0_i32_2 = arith.constant 0 : i32
    return %c0_i32, %c0_i32_0, %c0_i32_1 : i32, i32, i32
  }
  func.func @transform_2(%arg0: i32, %arg1: i32) -> (i32, i32) {
    %c0_i32 = arith.constant 0 : i32
    %c0_i32_0 = arith.constant 0 : i32
    %c0_i32_1 = arith.constant 0 : i32
    return %c0_i32, %c0_i32_0 : i32, i32
  }
  func.func @transform_3(%arg0: i32, %arg1: i32) -> (i32, i32, i32, i32) {
    %c0_i32 = arith.constant 0 : i32
    %c0_i32_0 = arith.constant 0 : i32
    %c0_i32_1 = arith.constant 0 : i32
    return %arg0, %arg1, %c0_i32, %c0_i32_0 : i32, i32, i32, i32
  }
}

</mosaic_0001>

<bundles_post_ra>
// kernel: up_conv_forward.1
= control target key start
LH: loop header
LB: loop body
LE: loop exit
PB: predicated region body
PF: predicated region fallthrough
CT: control target
= control target key end

     0   :  { %s8327_s12 = smov 0   ;;  %s8329_s13 = smov 0   ;;  %s11698_s0 = inlined_call_operand.vmem [shape: bf16[2,18,18,4], index: 0, kind: input, shape index: {}]   ;;  %s11699_s1 = inlined_call_operand.vmem [shape: bf16[4,16,8], index: 1, kind: input, shape index: {}]   ;;  %s11700_s2 = inlined_call_operand.vmem [shape: f32[1,8], index: 2, kind: input, shape index: {}]   ;;  %s11701_s3 = inlined_call_operand.vmem [shape: f32[2,32,32,8], index: 3, kind: output, shape index: {}]  }
   0x1   :  { %s8331_s14 = smov 0   ;;  %s8333_s15 = smov 0  }
   0x2   :  { %s8335_s16 = smov 0  }
   0x3 LB: > { %s22_s17 = sadd.s32 1, %s8292_s14  ;;  %s25_s18 = sadd.s32 1, %s8296_s15  ;;  %s8300_s16 = sphi %s8335_s16, %s13_s16   ;;  %s8296_s15 = sphi %s8333_s15, %s11714_s15   ;;  %s8292_s14 = sphi %s8331_s14, %s11713_s14   ;;  %s8288_s13 = sphi %s8329_s13, %s11712_s13   ;;  %s8284_s12 = sphi %s8327_s12, %s11711_s12  }
   0x4   : > { %p23_p0 = scmp.ge.s32.totalorder %s22_s17, 2  ;;  %p7996_p1 = scmp.ge.s32.totalorder %s8300_s16, 1 }
   0x5   : > { %p151_p2 = scmp.lt.s32.totalorder %s8300_s16, 5 }
   0x6   : > { %s11716_s17 = smov (%p23_p0, %s22_s17), 0  ;;  %s11718_s18 = smov (!%p23_p0, %s25_s18), %s8296_s15 }
   0x7   : > { %p152_p3 = pnand %p7996_p1, %p151_p2  ;;  %p27_p4 = scmp.ge.s32.totalorder %s11718_s18, 2 }
   0x8   : > { %p180_p5 = scmp.lt.s32.totalorder (!%p152_p3), %s8288_s13, 1  ;;  %s8090_s19 = smul.u32 (!%p152_p3), 96, %s8284_s12 }
   0x9   : > { %s11720_s18 = smov (%p27_p4, %s11718_s18), 0  ;;  %155 = sbr.rel (%p152_p3) target bundleno = 813 (0x32d), region = 32 }
   0xa   : > { %s8302_s25 = smov (!%p152_p3), 8   ;;  %s8303_s28 = smov (!%p152_p3), 4  }
   0xb   : > { %s8304_s29 = smov (!%p152_p3), 12   ;;  %s7998_s11 = sshll.u32 (!%p152_p3), %s8284_s12, 4 }
   0xc   : > { %p9069_p6 = scmp.lt.s32.totalorder (!%p152_p3), %s7998_s11, 31 }
   0xe   : > { %s11722_s13 = smov (!%p180_p5, %s8288_s13), 1  ;;  %vm782_vm0 = vcmask 1042432   ;;  %vm783_vm1 = vcmask 1046532   ;;  %vm232_vm2 = vsmask.f32 3328  ;;  %v8254_v42 = vld [vmem:[%s11699_s1 + $0x8] sm:$0xff]  }
   0xf   : > { %s8199_s20 = smul.u32 216, %s11722_s13  ;;  %vm233_vm3 = vsmask.f32 7440  ;;  %vm8401_vm4 = vmor %vm782_vm0, %vm783_vm1  ;;  %8145 = vmatprep.subr.bf16.mxu1 %v8254_v42  ;;  %vm571_vm6 = vcmask 31744   ;;  %vm596_vm7 = vcmask 64512   ;;  %vm613_vm8 = vcmask 97280  }
  0x10   : > { %vm8413_vm5 = vmor %vm232_vm2, %vm233_vm3  ;;  %8146 = vmatpush3.bf16.msra.mxu1 %v8254_v42  ;;  %vm644_vm9 = vcmask 130048   ;;  %vm3486_vm10 = vcmask 1040384   ;;  %s11724_s11 = smov (!%p9069_p6, %s7998_s11), 31 }
  0x11   : > { %s184_s23 = scalar_lea.vmem %s11698_s0, %s8199_s20  ;;  %s7999_s12 = sshll.u32 %s11724_s11, 2 }
  0x12   : > { %s8366_s24 = scalar_lea.vmem %s184_s23, %s8090_s19  ;;  %s8000_s20 = sshll.u32 %s11722_s13, 7 }
  0x13   : > { %v204_v0 = vld [vmem:[%s8366_s24 + $0xc] sm:$0xf]  ;;  %v205_v1 = vld [vmem:[%s8366_s24 + $0x10] sm:$0xf]  ;;  %v8371_v2 = vld [vmem:[%s8366_s24 + $0x18] sm:$0xf]  ;;  %s192_s13 = sadd.s32 %s8000_s20, %s7999_s12 }
  0x14   : > { %v269_v3 = vshll.u32 %v205_v1, 16  ;;  %v273_v4 = vshrl.u32 %v205_v1, 16  ;;  %v8373_v5 = vcombine.low %v204_v0, %v205_v1  ;;  %v260_v6 = vshrl.u32 %v204_v0, 16  ;;  %v8376_v7 = vld [vmem:[%s8366_s24 + $0x1c] sm:$0xf]  ;;  %s8001_s21 = sshll.u32 %s192_s13, 3 }
  0x15   : > { %v263_v8 = vshll.u32 %v204_v0, 16  ;;  %v284_v9 = vshrl.u32 %v8371_v2, 16  ;;  %v287_v10 = vshll.u32 %v8371_v2, 16  ;;  %v293_v11 = vshll.u32 %v8376_v7, 16  ;;  %v8382_v12 = vld [vmem:[%s8366_s24] sm:$0xf] }
  0x16   : > { %v271_v13 = vrot.slane %v269_v3, 5  ;;  %v275_v14 = vrot.slane %v273_v4, 4  ;;  %536 = vrot.lane.b32.xlu1 %v8373_v5, %s8302_s25  ;;  %v262_v15 = vrot.slane %v260_v6, 4  ;;  %v297_v16 = vshrl.u32 %v8376_v7, 16  ;;  %v8388_v17 = vld [vmem:[%s8366_s24 + $0x4] sm:$0xf] }
  0x17   : > { %v265_v18 = vrot.slane %v263_v8, 5  ;;  %v286_v19 = vrot.slane %v284_v9, 4  ;;  %v289_v20 = vrot.slane %v287_v10, 5  ;;  %v8391_v21 = vld [vmem:[%s8366_s24 + $0x8] sm:$0x1]  ;;  %v8393_v23 = vrot.slane %v293_v11, 5 }
  0x18   : > { %v276_v22 = vor.u32 %v275_v14, %v271_v13  ;;  %v299_v24 = vrot.slane %v297_v16, 4  ;;  %v8397_v25 = vcombine.low %v8371_v2, %v8376_v7  ;;  %v206_v27 = vld [vmem:[%s8366_s24 + $0x14] sm:$0x1]  ;;  %v8033_v29 = vrot.slane %v8382_v12, 9  ;;  %v209_v41 = vld [vmem:[%s8366_s24 + $0x20] sm:$0x1] }
  0x19   : > { %v266_v28 = vor.u32 %v265_v18, %v262_v15  ;;  %v787_v30 = vrot.slane %v8388_v17, 5  ;;  %v790_v31 = vrot.slane %v8391_v21, 5  ;;  %v279_v33 = vshll.u32 %v206_v27, 16  ;;  %v8448_v3 = vld [vmem:[%s8366_s24 + $0x28] sm:$0xf] }
  0x1a   : > { %v277_v32 = vrot.slane %v276_v22, 4  ;;  %538 = vrot.lane.b32.xlu1 %v8397_v25, %s8302_s25  ;;  %v8034_v34 = vrot.slane %v204_v0, 9  ;;  %v794_v35 = vrot.slane %v205_v1, 5  ;;  %v797_v40 = vrot.slane %v206_v27, 5  ;;  %v8453_v9 = vld [vmem:[%s8366_s24 + $0x24] sm:$0xf] }
  0x1b   : > { %v267_v37 = vrot.slane %v266_v28, 4  ;;  %v788_v38 = vsel %vm8401_vm4, %v8033_v29, %v787_v30  ;;  %v789_v39 = vrot.slane %v787_v30, 4  ;;  %v281_v43 = vrot.slane %v279_v33, 5  ;;  %v212_v14 = vld [vmem:[%s8366_s24 + $0x2c] sm:$0x1] }
  0x1c   : > { %v795_v44 = vsel %vm8401_vm4, %v8034_v34, %v794_v35  ;;  %v796_v45 = vrot.slane %v794_v35, 4  ;;  %v303_v46 = vshll.u32 %v209_v41, 16  ;;  %v8035_v49 = vrot.slane %v8371_v2, 9  ;;  %v8476_v35 = vld [vmem:[%s8366_s24 + $0x30] sm:$0xf] }
  0x1d   : > { %v791_v47 = vsel %vm8401_vm4, %v789_v39, %v790_v31  ;;  %v272_v48 = vsel %vm8413_vm5, %v267_v37, %v271_v13  ;;  %v801_v50 = vrot.slane %v8376_v7, 5  ;;  %v255_v51 = vshll.u32 %v8391_v21, 16 }
  0x1e   : > { %v8042_v52 = vcombine.low %v788_v38, %v791_v47  ;;  %v798_v53 = vsel %vm8401_vm4, %v796_v45, %v797_v40  ;;  %v282_v54 = vsel %vm8413_vm5, %v277_v32, %v281_v43  ;;  %v305_v57 = vrot.slane %v303_v46, 5  ;;  %v8485_v40 = vld [vmem:[%s8366_s24 + $0x34] sm:$0xf] }
  0x1f   : > { %v8043_v55 = vcombine.low %v795_v44, %v798_v53  ;;  %v8436_v56 = vcombine.low %v272_v48, %v282_v54  ;;  %v803_v58 = vrot.slane %v801_v50, 4  ;;  %v804_v59 = vrot.slane %v209_v41, 5 }
  0x20   : > { %873 = vrot.lane.b32.xlu0 %v8042_v52, %s8303_s28  ;;  %v236_v60 = vshrl.u32 %v8382_v12, 16  ;;  %v239_v61 = vshll.u32 %v8382_v12, 16  ;;  %v245_v62 = vshll.u32 %v8388_v17, 16  ;;  %v802_v63 = vsel %vm8401_vm4, %v8035_v49, %v801_v50  ;;  %v8492_v49 = vld [vmem:[%s8366_s24 + $0x38] sm:$0x1] }
  0x21   : > { %908 = vrot.lane.b32.xlu1 %v8043_v55, %s8304_s29  ;;  %v249_v0 = vshrl.u32 %v8388_v17, 16  ;;  %v290_v1 = vor.u32 %v289_v20, %v286_v19  ;;  %v300_v2 = vor.u32 %v299_v24, %v8393_v23  ;;  %v805_v4 = vsel %vm8401_vm4, %v803_v58, %v804_v59  ;;  %v8256_v19 = vld [vmem:[%s11699_s1] sm:$0xff]  }
  0x22   : > { %v238_v6 = vrot.slane %v236_v60, 4  ;;  %v241_v7 = vrot.slane %v239_v61, 5  ;;  %v247_v8 = vrot.slane %v245_v62, 5  ;;  %v8457_v15 = vcombine.low %v802_v63, %v805_v4  ;;  %8127 = vmatprep.subr.bf16.mxu0 %v8256_v19  ;;  %v8514_v4 = vld [vmem:[%s8366_s24 + $0x40] sm:$0xf] }
  0x23   : > { %v251_v10 = vrot.slane %v249_v0, 4  ;;  %v291_v11 = vrot.slane %v290_v1, 4  ;;  %v301_v13 = vrot.slane %v300_v2, 4  ;;  %v808_v18 = vrot.slane %v8448_v3, 5  ;;  %8128 = vmatpush3.bf16.msra.mxu0 %v8256_v19 }
  0x24   : > { %875 = vrot.lane.b32.xlu0 %v8043_v55, %s8303_s28  ;;  %v242_v16 = vor.u32 %v241_v7, %v238_v6  ;;  %v257_v21 = vrot.slane %v255_v51, 5  ;;  %v327_v28 = vshll.u32 %v212_v14, 16  ;;  %v8036_v29 = vrot.slane %v8453_v9, 9 }
  0x25   : > { %889 = vrot.lane.b32.xlu1 %v8436_v56, %s8302_s25  ;;  %v252_v20 = vor.u32 %v251_v10, %v247_v8  ;;  %v296_v22 = vsel %vm8413_vm5, %v291_v11, %v8393_v23  ;;  %v306_v24 = vsel %vm8413_vm5, %v301_v13, %v305_v57  ;;  %v811_v30 = vrot.slane %v212_v14, 5  ;;  %v8522_v10 = vld [vmem:[%s8366_s24 + $0x3c] sm:$0xf] }
  0x26   : > { %v243_v27 = vrot.slane %v242_v16, 4  ;;  %v8471_v32 = vcombine.low %v296_v22, %v306_v24  ;;  %v308_v33 = vshrl.u32 %v8453_v9, 16  ;;  %v311_v34 = vshll.u32 %v8453_v9, 16  ;;  %v218_v16 = vld [vmem:[%s8366_s24 + $0x44] sm:$0x1] }
  0x27   : > { %v253_v31 = vrot.slane %v252_v20, 4  ;;  %v810_v37 = vrot.slane %v808_v18, 4  ;;  %v317_v38 = vshll.u32 %v8448_v3, 16  ;;  %v321_v39 = vshrl.u32 %v8448_v3, 16  ;;  %v8535_v22 = vld [vmem:[%s8366_s24 + $0x48] sm:$0xf] }
  0x28   : > { %910 = vrot.lane.b32.xlu0 %v8457_v15, %s8304_s29  ;;  %v248_v23 = vsel %vm8413_vm5, %v243_v27, %v247_v8  ;;  %v310_v42 = vrot.slane %v308_v33, 4  ;;  %v313_v43 = vrot.slane %v311_v34, 5  ;;  %v329_v45 = vrot.slane %v327_v28, 5  ;;  %v8546_v33 = vld [vmem:[%s8366_s24 + $0x4c] sm:$0xf] }
  0x29   : > { %v258_v41 = vsel %vm8413_vm5, %v253_v31, %v257_v21  ;;  %v319_v46 = vrot.slane %v317_v38, 5  ;;  %v323_v47 = vrot.slane %v321_v39, 4  ;;  %v332_v50 = vshrl.u32 %v8476_v35, 16 }
  0x2a   : > { %v8489_v44 = vcombine.low %v248_v23, %v258_v41  ;;  %v314_v48 = vor.u32 %v313_v43, %v310_v42  ;;  %v335_v51 = vshll.u32 %v8476_v35, 16  ;;  %v341_v52 = vshll.u32 %v8485_v40, 16 }
  0x2b   : > { %v809_v53 = vsel %vm8401_vm4, %v8036_v29, %v808_v18  ;;  %v812_v54 = vsel %vm8401_vm4, %v810_v37, %v811_v30  ;;  %v324_v55 = vor.u32 %v323_v47, %v319_v46  ;;  %v345_v57 = vshrl.u32 %v8485_v40, 16 }
  0x2c   : > { %515 = vrot.lane.b32.xlu1 %v8489_v44, %s8303_s28  ;;  %891 = vrot.lane.b32.xlu0 %v8471_v32, %s8302_s25  ;;  %v315_v58 = vrot.slane %v314_v48, 4  ;;  %v334_v59 = vrot.slane %v332_v50, 4  ;;  %v337_v60 = vrot.slane %v335_v51, 5  ;;  %v8506_v61 = vrot.slane %v341_v52, 5 }
  0x2d   : > { %v325_v62 = vrot.slane %v324_v55, 4  ;;  %v347_v63 = vrot.slane %v345_v57, 4  ;;  %v351_v0 = vshll.u32 %v8492_v49, 16  ;;  %v8045_v1 = vcombine.low %v809_v53, %v812_v54 }
  0x2e   : > { %v338_v2 = vor.u32 %v337_v60, %v334_v59  ;;  %v320_v6 = vsel %vm8413_vm5, %v315_v58, %v319_v46  ;;  %v8526_v11 = vcombine.low %v8453_v9, %v8448_v3  ;;  %v815_v14 = vrot.slane %v8485_v40, 5  ;;  %v8558_v46 = vld [vmem:[%s8366_s24 + $0x50] sm:$0x1]  ;;  %v8573_v58 = vld [vmem:[%s8366_s24 + $0x54] sm:$0xf] }
  0x2f   : > { %v330_v7 = vsel %vm8413_vm5, %v325_v62, %v329_v45  ;;  %v348_v8 = vor.u32 %v347_v63, %v8506_v61  ;;  %v353_v13 = vrot.slane %v351_v0, 5  ;;  %v8037_v18 = vrot.slane %v8476_v35, 9  ;;  %v8583_v63 = vld [vmem:[%s8366_s24 + $0x58] sm:$0xf] }
  0x30   : > { %557 = vrot.lane.b32.xlu1 %v8471_v32, %s8304_s29  ;;  %517 = vrot.lane.b32.xlu0 %v8436_v56, %s8303_s28  ;;  %v822_v19 = vrot.slane %v8514_v4, 5  ;;  %v356_v20 = vshrl.u32 %v8522_v10, 16  ;;  %v359_v21 = vshll.u32 %v8522_v10, 16  ;;  %v8540_v3 = vcombine.low %v320_v6, %v330_v7  ;;  %v224_v7 = vld [vmem:[%s8366_s24 + $0x5c] sm:$0x1] }
  0x31   : > { %v339_v9 = vrot.slane %v338_v2, 4  ;;  %v818_v24 = vrot.slane %v8492_v49, 5  ;;  %v8038_v27 = vrot.slane %v8522_v10, 9  ;;  %v349_v28 = vrot.slane %v348_v8, 4 }
  0x32   : > { %v358_v29 = vrot.slane %v356_v20, 4  ;;  %v361_v30 = vrot.slane %v359_v21, 5  ;;  %v365_v31 = vshll.u32 %v8514_v4, 16  ;;  %v817_v34 = vrot.slane %v815_v14, 4 }
  0x33   : > { %v825_v23 = vrot.slane %v218_v16, 5  ;;  %v369_v37 = vshrl.u32 %v8514_v4, 16  ;;  %v380_v38 = vshrl.u32 %v8535_v22, 16  ;;  %v824_v39 = vrot.slane %v822_v19, 4 }
  0x34   : > { %879 = vrot.lane.b32.xlu1 %v8045_v1, %s8303_s28  ;;  %555 = vrot.lane.b32.xlu0 %v8436_v56, %s8304_s29  ;;  %v362_v41 = vor.u32 %v361_v30, %v358_v29  ;;  %v8550_v42 = vrot.slane %v365_v31, 5  ;;  %v383_v43 = vshll.u32 %v8535_v22, 16  ;;  %v389_v48 = vshll.u32 %v8546_v33, 16 }
  0x35   : > { %v371_v45 = vrot.slane %v369_v37, 4  ;;  %v382_v47 = vrot.slane %v380_v38, 4  ;;  %v393_v49 = vshrl.u32 %v8546_v33, 16  ;;  %v344_v50 = vsel %vm8413_vm5, %v339_v9, %v8506_v61  ;;  %v8633_v37 = vld [vmem:[%s8366_s24 + $0x64] sm:$0xf] }
  0x36   : > { %v354_v51 = vsel %vm8413_vm5, %v349_v28, %v353_v13  ;;  %v375_v52 = vshll.u32 %v218_v16, 16  ;;  %v385_v53 = vrot.slane %v383_v43, 5  ;;  %v8570_v55 = vrot.slane %v389_v48, 5  ;;  %v227_v43 = vld [vmem:[%s8366_s24 + $0x68] sm:$0x1] }
  0x37   : > { %v372_v54 = vor.u32 %v371_v45, %v8550_v42  ;;  %v395_v57 = vrot.slane %v393_v49, 4  ;;  %v819_v59 = vsel %vm8401_vm4, %v817_v34, %v818_v24  ;;  %v823_v60 = vsel %vm8401_vm4, %v8038_v27, %v822_v19 }
  0x38   : > { %519 = vrot.lane.b32.xlu1 %v8471_v32, %s8303_s28  ;;  %877 = vrot.lane.b32.xlu0 %v8457_v15, %s8303_s28  ;;  %v816_v15 = vsel %vm8401_vm4, %v8037_v18, %v815_v14  ;;  %v8579_v61 = vrot.slane %v362_v41, 4  ;;  %v399_v62 = vshll.u32 %v8558_v46, 16  ;;  %v8588_v0 = vcombine.low %v344_v50, %v354_v51 }
  0x39   : > { %v826_v2 = vsel %vm8401_vm4, %v824_v39, %v825_v23  ;;  %v386_v6 = vor.u32 %v385_v53, %v382_v47  ;;  %v8593_v8 = vrot.slane %v375_v52, 5  ;;  %v8595_v13 = vrot.slane %v372_v54, 4 }
  0x3a   : > { %v8040_v14 = vrot.slane %v8573_v58, 9  ;;  %v8602_v16 = vcombine.low %v816_v15, %v819_v59  ;;  %v396_v18 = vor.u32 %v395_v57, %v8570_v55  ;;  %v836_v19 = vrot.slane %v8583_v63, 5 }
  0x3b   : > { %v8606_v20 = vcombine.low %v823_v60, %v826_v2  ;;  %v368_v21 = vsel %vm8413_vm5, %v8579_v61, %v8550_v42  ;;  %v8612_v9 = vrot.slane %v399_v62, 5  ;;  %v839_v24 = vrot.slane %v224_v7, 5  ;;  %v8652_v62 = vld [vmem:[%s8366_s24 + $0x6c] sm:$0xf] }
  0x3c   : > { %912 = vrot.lane.b32.xlu1 %v8045_v1, %s8304_s29  ;;  %893 = vrot.lane.b32.xlu0 %v8540_v3, %s8302_s25  ;;  %v8600_v1 = vcombine.low %v8476_v35, %v8485_v40  ;;  %v8615_v35 = vld [vmem:[%s8366_s24 + $0x60] sm:$0xf]  ;;  %v8621_v40 = vrot.slane %v386_v6, 4  ;;  %v423_v27 = vshll.u32 %v224_v7, 16  ;;  %v837_v28 = vsel %vm8401_vm4, %v8040_v14, %v836_v19 }
  0x3d   : > { %v838_v29 = vrot.slane %v836_v19, 4  ;;  %v378_v30 = vsel %vm8413_vm5, %v8595_v13, %v8593_v8  ;;  %v404_v31 = vshrl.u32 %v8573_v58, 16  ;;  %v407_v34 = vshll.u32 %v8573_v58, 16 }
  0x3e   : > { %v413_v23 = vshll.u32 %v8583_v63, 16  ;;  %v8635_v38 = vrot.slane %v396_v18, 4  ;;  %v417_v41 = vshrl.u32 %v8583_v63, 16  ;;  %v428_v45 = vshrl.u32 %v8615_v35, 16 }
  0x3f   : > { %v840_v39 = vsel %vm8401_vm4, %v838_v29, %v839_v24  ;;  %v406_v48 = vrot.slane %v404_v31, 4  ;;  %v409_v49 = vrot.slane %v407_v34, 5  ;;  %v431_v53 = vshll.u32 %v8615_v35, 16  ;;  %v8661_v34 = vld [vmem:[%s8366_s24 + $0x70] sm:$0xf] }
  0x40   : > { %540 = vrot.lane.b32.xlu1 %v8526_v11, %s8302_s25  ;;  %895 = vrot.lane.b32.xlu0 %v8588_v0, %s8302_s25  ;;  %v8642_v47 = vcombine.low %v837_v28, %v840_v39  ;;  %v415_v50 = vrot.slane %v413_v23, 5  ;;  %v419_v51 = vrot.slane %v417_v41, 4  ;;  %v430_v52 = vrot.slane %v428_v45, 4 }
  0x41   : > { %v437_v15 = vshll.u32 %v8633_v37, 16  ;;  %v425_v54 = vrot.slane %v423_v27, 5  ;;  %v410_v57 = vor.u32 %v409_v49, %v406_v48  ;;  %v441_v59 = vshrl.u32 %v8633_v37, 16 }
  0x42   : > { %v447_v60 = vshll.u32 %v227_v43, 16  ;;  %v420_v2 = vor.u32 %v419_v51, %v415_v50  ;;  %v433_v6 = vrot.slane %v431_v53, 5  ;;  %v8041_v14 = vrot.slane %v8615_v35, 9  ;;  %v230_v53 = vld [vmem:[%s8366_s24 + $0x74] sm:$0x1]  ;;  %s9188_s24 = scalar_lea.vmem %s11701_s3, %s8001_s21 }
  0x43   : > { %v439_v7 = vrot.slane %v437_v15, 5  ;;  %v411_v18 = vrot.slane %v410_v57, 4  ;;  %v443_v19 = vrot.slane %v441_v59, 4  ;;  %v844_v28 = vrot.slane %v8633_v37, 5 }
  0x44   : > { %542 = vrot.lane.b32.xlu1 %v8600_v1, %s8302_s25  ;;  %521 = vrot.lane.b32.xlu0 %v8540_v3, %s8303_s28  ;;  %v449_v24 = vrot.slane %v447_v60, 5  ;;  %v421_v27 = vrot.slane %v420_v2, 4  ;;  %v434_v29 = vor.u32 %v433_v6, %v430_v52  ;;  %v847_v31 = vrot.slane %v227_v43, 5 }
  0x45   : > { %v3616_v23 = vshrl.u32 %v8652_v62, 16  ;;  %v416_v39 = vsel %vm8413_vm5, %v411_v18, %v415_v50  ;;  %v444_v41 = vor.u32 %v443_v19, %v439_v7  ;;  %v845_v45 = vsel %vm8401_vm4, %v8041_v14, %v844_v28 }
  0x46   : > { %v846_v48 = vrot.slane %v844_v28, 4  ;;  %v426_v49 = vsel %vm8413_vm5, %v421_v27, %v425_v54  ;;  %v435_v51 = vrot.slane %v434_v29, 4  ;;  %v3619_v43 = vshll.u32 %v8652_v62, 16 }
  0x47   : > { %v3618_v15 = vrot.slane %v3616_v23, 4  ;;  %v8672_v52 = vcombine.low %v416_v39, %v426_v49  ;;  %v445_v57 = vrot.slane %v444_v41, 4  ;;  %v3625_v50 = vshll.u32 %v8661_v34, 16 }
  0x48   : > { %561 = vrot.lane.b32.xlu1 %v8588_v0, %s8304_s29  ;;  %914 = vrot.lane.b32.xlu0 %v8602_v16, %s8304_s29  ;;  %v848_v59 = vsel %vm8401_vm4, %v846_v48, %v847_v31  ;;  %v440_v54 = vsel %vm8413_vm5, %v435_v51, %v439_v7  ;;  %v3621_v2 = vrot.slane %v3619_v43, 5  ;;  %v3629_v6 = vshrl.u32 %v8661_v34, 16 }
  0x49   : > { %v8683_v60 = vcombine.low %v845_v45, %v848_v59  ;;  %v450_v14 = vsel %vm8413_vm5, %v445_v57, %v449_v24  ;;  %v3627_v18 = vrot.slane %v3625_v50, 5  ;;  %v3635_v19 = vshll.u32 %v230_v53, 16 }
  0x4a   : > { %v8075_v28 = vrot.slane %v8652_v62, 9  ;;  %v8689_v27 = vcombine.low %v440_v54, %v450_v14  ;;  %v3622_v29 = vor.u32 %v3621_v2, %v3618_v15  ;;  %v3631_v31 = vrot.slane %v3629_v6, 4 }
  0x4b   : > { %v3787_v23 = vrot.slane %v8661_v34, 5  ;;  %v8702_v7 = vcombine.low %v368_v21, %v378_v30  ;;  %v3637_v24 = vrot.slane %v3635_v19, 5  ;;  %v3790_v39 = vrot.slane %v230_v53, 5 }
  0x4c   : > { %883 = vrot.lane.b32.xlu1 %v8606_v20, %s8303_s28  ;;  %559 = vrot.lane.b32.xlu0 %v8540_v3, %s8304_s29  ;;  %v3623_v41 = vrot.slane %v3622_v29, 4  ;;  %v3632_v45 = vor.u32 %v3631_v31, %v3627_v18  ;;  %v392_v42 = vsel %vm8413_vm5, %v8621_v40, %v8570_v55  ;;  %v402_v61 = vsel %vm8413_vm5, %v8635_v38, %v8612_v9 }
  0x4d   : > { %v3788_v8 = vsel %vm8401_vm4, %v8075_v28, %v3787_v23  ;;  %v3789_v13 = vrot.slane %v3787_v23, 4  ;;  %v829_v21 = vrot.slane %v8546_v33, 5  ;;  %v8731_v55 = vcombine.low %v8522_v10, %v8514_v4  ;;  %v8753_v4 = vld [vmem:[%s11699_s1 + $0x10] sm:$0xff]  }
  0x4e   : > { %v3628_v30 = vsel %vm8413_vm5, %v3623_v41, %v3627_v18  ;;  %v3633_v48 = vrot.slane %v3632_v45, 4  ;;  %v8733_v9 = vcombine.low %v392_v42, %v402_v61  ;;  %v8039_v38 = vrot.slane %v8535_v22, 9  ;;  %8163 = vmatprep.subr.bf16.mxu0 %v8753_v4 }
  0x4f   : > { %v3791_v49 = vsel %vm8401_vm4, %v3789_v13, %v3790_v39  ;;  %v831_v53 = vrot.slane %v829_v21, 4  ;;  %v832_v15 = vrot.slane %v8558_v46, 5  ;;  %v8748_v36 = vcombine.low %v8535_v22, %v8546_v33 }
  0x50   : > { %523 = vrot.lane.b32.xlu1 %v8588_v0, %s8303_s28  ;;  %881 = vrot.lane.b32.xlu0 %v8602_v16, %s8303_s28  ;;  %v8005_v16 = vcombine.low %v8382_v12, %v8388_v17  ;;  %v8076_v51 = vcombine.low %v3788_v8, %v3791_v49  ;;  %v3638_v40 = vsel %vm8413_vm5, %v3633_v48, %v3637_v24 }
  0x51   : > { %v8063_v43 = vcombine.low %v3628_v30, %v3638_v40  ;;  %v830_v10 = vsel %vm8401_vm4, %v8039_v38, %v829_v21  ;;  %v833_v46 = vsel %vm8401_vm4, %v831_v53, %v832_v15  ;;  %v8780_v26 = vcombine.low %v8573_v58, %v8583_v63 }
  0x52   : > { %v8048_v22 = vcombine.low %v830_v10, %v833_v46  ;;  %v8788_v33 = vcombine.low %v8615_v35, %v8633_v37  ;;  %v8062_v58 = vcombine.low %v8652_v62, %v8661_v34 }
  0x54   : > { %916 = vrot.lane.b32.xlu1 %v8606_v20, %s8304_s29  ;;  %897 = vrot.lane.b32.xlu0 %v8702_v7, %s8302_s25  ;;  %v8257_v20 = vld [vmem:[%s11699_s1 + $0x18] sm:$0xff]  }
  0x55   : > { %8181 = vmatprep.subr.bf16.mxu1 %v8257_v20 }
  0x58   : > { %544 = vrot.lane.b32.xlu1 %v8731_v55, %s8302_s25  ;;  %899 = vrot.lane.b32.xlu0 %v8733_v9, %s8302_s25 }
  0x5c   : > { %546 = vrot.lane.b32.xlu1 %v8748_v36, %s8302_s25  ;;  %525 = vrot.lane.b32.xlu0 %v8702_v7, %s8303_s28 }
  0x60   : > { %565 = vrot.lane.b32.xlu1 %v8733_v9, %s8304_s29  ;;  %918 = vrot.lane.b32.xlu0 %v8048_v22, %s8304_s29 }
  0x64   : > { %887 = vrot.lane.b32.xlu1 %v8642_v47, %s8303_s28  ;;  %563 = vrot.lane.b32.xlu0 %v8702_v7, %s8304_s29 }
  0x68   : > { %527 = vrot.lane.b32.xlu1 %v8733_v9, %s8303_s28  ;;  %885 = vrot.lane.b32.xlu0 %v8048_v22, %s8303_s28 }
  0x6c   : > { %920 = vrot.lane.b32.xlu1 %v8642_v47, %s8304_s29  ;;  %901 = vrot.lane.b32.xlu0 %v8672_v52, %s8302_s25 }
  0x70   : > { %548 = vrot.lane.b32.xlu1 %v8780_v26, %s8302_s25  ;;  %903 = vrot.lane.b32.xlu0 %v8689_v27, %s8302_s25 }
  0x74   : > { %550 = vrot.lane.b32.xlu1 %v8788_v33, %s8302_s25  ;;  %529 = vrot.lane.b32.xlu0 %v8672_v52, %s8303_s28 }
  0x78   : > { %569 = vrot.lane.b32.xlu1 %v8689_v27, %s8304_s29  ;;  %922 = vrot.lane.b32.xlu0 %v8683_v60, %s8304_s29 }
  0x7c   : > { %567 = vrot.lane.b32.xlu0 %v8672_v52, %s8304_s29  ;;  %3794 = vrot.lane.b32.xlu1 %v8063_v43, %s8302_s25 }
  0x80   : > { %3792 = vrot.lane.b32.xlu0 %v8683_v60, %s8303_s28  ;;  %3799 = vrot.lane.b32.xlu1 %v8076_v51, %s8304_s29 }
  0x84   : > { %3639 = vrot.lane.b32.xlu0 %v8689_v27, %s8303_s28  ;;  %3651 = vrot.lane.b32.xlu1 %v8063_v43, %s8304_s29 }
  0x88   : > { %v537_v63 = vpop.permute.xlu1 %536  ;;  %3646 = vrot.lane.b32.xlu0 %v8062_v58, %s8302_s25 }
  0x8c   : > { %v539_v35 = vpop.permute.xlu1 %538 }
  0x92   : > { %v874_v37 = vpop.permute.xlu0 %873 }
  0x93   : > { %v909_v47 = vpop.permute.xlu1 %908  ;;  %v926_v59 = vsel %vm571_vm6, %v8489_v44, %v874_v37 }
  0x96   : > { %v876_v57 = vpop.permute.xlu0 %875 }
  0x97   : > { %v890_v50 = vpop.permute.xlu1 %889  ;;  %v929_v60 = vsel %vm571_vm6, %v8436_v56, %v876_v57 }
  0x98   : > { %v949_v54 = vsel %vm596_vm7, %v926_v59, %v890_v50 }
  0x99   : > { %v965_v62 = vsel %vm613_vm8, %v949_v54, %v909_v47 }
  0x9a   : > { %v911_v34 = vpop.permute.xlu0 %910  ;;  %8147 = vmatprep.mubr.msk.bf16.mxu1 %vm644_vm9, %v965_v62 }
  0x9e   : > { %v516_v2 = vpop.permute.xlu1 %515  ;;  %v892_v6 = vpop.permute.xlu0 %891 }
  0x9f   : > { %v951_v14 = vsel %vm596_vm7, %v929_v60, %v892_v6  ;;  %v574_v28 = vsel %vm571_vm6, %v8005_v16, %v516_v2 }
  0xa0   : > { %v8819_v18 = vsel %vm613_vm8, %v951_v14, %v911_v34  ;;  %v598_v24 = vsel %vm596_vm7, %v574_v28, %v537_v63 }
  0xa1   : > { %8148 = vmatmul.mubr.msk.bf16.vlgmr.msra.gmra.mxu1 %vm644_vm9, %v8819_v18 }
  0xa2   : > { %v558_v44 = vpop.permute.xlu1 %557  ;;  %v518_v19 = vpop.permute.xlu0 %517  ;;  %8182 = vmatpush3.bf16.msra.mxu1 %v8257_v20 }
  0xa3   : > { %v577_v56 = vsel %vm571_vm6, %v8373_v5, %v518_v19 }
  0xa4   : > { %v600_v29 = vsel %vm596_vm7, %v577_v56, %v539_v35 }
  0xa5   : > { %v8834_v41 = vsel %vm613_vm8, %v600_v29, %v558_v44 }
  0xa6   : > { %v880_v31 = vpop.permute.xlu1 %879  ;;  %v556_v23 = vpop.permute.xlu0 %555 }
  0xa7   : > { %v615_v39 = vsel %vm613_vm8, %v598_v24, %v556_v23  ;;  %v935_v48 = vsel %vm571_vm6, %v8540_v3, %v880_v31 }
  0xa8   : > { %8129 = vmatprep.mubr.msk.bf16.mxu0 %vm644_vm9, %v615_v39 }
  0xa9   : > { %8130 = vmatmul.mubr.msk.bf16.vlgmr.msra.gmra.mxu0 %vm644_vm9, %v8834_v41 }
  0xaa   : > { %v520_v12 = vpop.permute.xlu1 %519  ;;  %v878_v17 = vpop.permute.xlu0 %877  ;;  %8164 = vmatpush3.bf16.msra.mxu0 %v8753_v4 }
  0xab   : > { %v932_v5 = vsel %vm571_vm6, %v8471_v32, %v878_v17  ;;  %v580_v38 = vsel %vm571_vm6, %v8397_v25, %v520_v12 }
  0xae   : > { %v913_v45 = vpop.permute.xlu1 %912  ;;  %v894_v8 = vpop.permute.xlu0 %893 }
  0xaf   : > { %v953_v13 = vsel %vm596_vm7, %v932_v5, %v894_v8 }
  0xb0   : > { %v8843_v42 = vsel %vm613_vm8, %v953_v13, %v913_v45 }
  0xb1   : > { %8151 = vmatprep.mubr.msk.bf16.mxu1 %vm644_vm9, %v8843_v42 }
  0xb2   : > { %v541_v61 = vpop.permute.xlu1 %540  ;;  %v896_v21 = vpop.permute.xlu0 %895 }
  0xb3   : > { %v955_v49 = vsel %vm596_vm7, %v935_v48, %v896_v21  ;;  %v602_v3 = vsel %vm596_vm7, %v580_v38, %v541_v61 }
  0xb6   : > { %v543_v16 = vpop.permute.xlu1 %542  ;;  %v522_v30 = vpop.permute.xlu0 %521 }
  0xb7   : > { %v583_v32 = vsel %vm571_vm6, %v8526_v11, %v522_v30 }
  0xb8   : > { %v604_v15 = vsel %vm596_vm7, %v583_v32, %v543_v16 }
  0xba   : > { %v562_v51 = vpop.permute.xlu1 %561  ;;  %v915_v40 = vpop.permute.xlu0 %914 }
  0xbb   : > { %v8855_v53 = vsel %vm613_vm8, %v955_v49, %v915_v40  ;;  %v8865_v11 = vsel %vm613_vm8, %v604_v15, %v562_v51 }
  0xbc   : > { %8152 = vmatmul.mubr.msk.bf16.gmra.mxu1 %vm644_vm9, %v8855_v53 }
  0xbe   : > { %v884_v43 = vpop.permute.xlu1 %883  ;;  %v560_v20 = vpop.permute.xlu0 %559 }
  0xbf   : > { %v8862_v4 = vsel %vm613_vm8, %v602_v3, %v560_v20  ;;  %v941_v50 = vsel %vm571_vm6, %v8702_v7, %v884_v43  ;;  %v8305_v43 = vmov 1966171168  }
  0xc0   : > { %8133 = vmatprep.mubr.msk.bf16.mxu0 %vm644_vm9, %v8862_v4  ;;  %v1136_v20 = vunpack.c.l.s4 %v8305_v43 }
  0xc1   : > { %8134 = vmatmul.mubr.msk.bf16.gmra.mxu0 %vm644_vm9, %v8865_v11 }
  0xc2   : > { %v524_v25 = vpop.permute.xlu1 %523  ;;  %v882_v10 = vpop.permute.xlu0 %881 }
  0xc3   : > { %v938_v46 = vsel %vm571_vm6, %v8588_v0, %v882_v10  ;;  %v586_v60 = vsel %vm571_vm6, %v8600_v1, %v524_v25 }
  0xc6   : > { %v917_v22 = vpop.permute.xlu1 %916  ;;  %v898_v58 = vpop.permute.xlu0 %897 }
  0xc7   : > { %v957_v63 = vsel %vm596_vm7, %v938_v46, %v898_v58  ;;  %v8306_v46 = vmov 1983009808  }
  0xc8   : > { %v973_v35 = vsel %vm613_vm8, %v957_v63, %v917_v22  ;;  %v6687_v22 = vunpack.c.l.s4 %v8306_v46 }
  0xc9   : > { %8155 = vmatprep.mubr.msk.bf16.mxu1 %vm644_vm9, %v973_v35 }
  0xca   : > { %v545_v37 = vpop.permute.xlu1 %544  ;;  %v900_v47 = vpop.permute.xlu0 %899 }
  0xcb   : > { %v959_v54 = vsel %vm596_vm7, %v941_v50, %v900_v47  ;;  %v606_v14 = vsel %vm596_vm7, %v586_v60, %v545_v37 }
  0xce   : > { %v547_v57 = vpop.permute.xlu1 %546  ;;  %v526_v59 = vpop.permute.xlu0 %525 }
  0xcf   : > { %v589_v0 = vsel %vm571_vm6, %v8731_v55, %v526_v59  ;;  %v6688_v59 = vunpack.c.0.s8 %v6687_v22 }
  0xd0   : > { %v608_v6 = vsel %vm596_vm7, %v589_v0, %v547_v57 }
  0xd2   : > { %v566_v62 = vpop.permute.xlu1 %565  ;;  %v919_v34 = vpop.permute.xlu0 %918 }
  0xd3   : > { %v975_v2 = vsel %vm613_vm8, %v959_v54, %v919_v34  ;;  %v625_v28 = vsel %vm613_vm8, %v608_v6, %v566_v62 }
  0xd4   : > { %8156 = vmatmul.mubr.msk.bf16.gmra.mxu1 %vm644_vm9, %v975_v2 }
  0xd6   : > { %v888_v44 = vpop.permute.xlu1 %887  ;;  %v564_v7 = vpop.permute.xlu0 %563 }
  0xd7   : > { %v623_v19 = vsel %vm613_vm8, %v606_v14, %v564_v7  ;;  %v947_v45 = vsel %vm571_vm6, %v8672_v52, %v888_v44 }
  0xd8   : > { %8137 = vmatprep.mubr.msk.bf16.mxu0 %vm644_vm9, %v623_v19 }
  0xd9   : > { %8138 = vmatmul.mubr.msk.bf16.gmra.mxu0 %vm644_vm9, %v625_v28 }
  0xda   : > { %v528_v55 = vpop.permute.xlu1 %527  ;;  %v886_v1 = vpop.permute.xlu0 %885 }
  0xdb   : > { %v944_v56 = vsel %vm571_vm6, %v8733_v9, %v886_v1  ;;  %v592_v61 = vsel %vm571_vm6, %v8748_v36, %v528_v55 }
  0xde   : > { %v921_v29 = vpop.permute.xlu1 %920  ;;  %v902_v31 = vpop.permute.xlu0 %901 }
  0xdf   : > { %v961_v23 = vsel %vm596_vm7, %v944_v56, %v902_v31 }
  0xe0   : > { %v977_v24 = vsel %vm613_vm8, %v961_v23, %v921_v29 }
  0xe1   : > { %8159 = vmatprep.mubr.msk.bf16.mxu1 %vm644_vm9, %v977_v24 }
  0xe2   : > { %v549_v39 = vpop.permute.xlu1 %548  ;;  %v904_v12 = vpop.permute.xlu0 %903 }
  0xe3   : > { %v963_v8 = vsel %vm596_vm7, %v947_v45, %v904_v12  ;;  %v610_v52 = vsel %vm596_vm7, %v592_v61, %v549_v39 }
  0xe6   : > { %v530_v17 = vpop.permute.xlu0 %529  ;;  %v551_v5 = vpop.permute.xlu1 %550 }
  0xe7   : > { %v595_v9 = vsel %vm571_vm6, %v8780_v26, %v530_v17 }
  0xe8   : > { %v612_v16 = vsel %vm596_vm7, %v595_v9, %v551_v5 }
  0xea   : > { %v923_v13 = vpop.permute.xlu0 %922  ;;  %v570_v30 = vpop.permute.xlu1 %569 }
  0xeb   : > { %v979_v21 = vsel %vm613_vm8, %v963_v8, %v923_v13  ;;  %v629_v26 = vsel %vm613_vm8, %v612_v16, %v570_v30 }
  0xec   : > { %8160 = vmatmul.mubr.msk.bf16.gmra.mxu1 %vm644_vm9, %v979_v21 }
  0xed   : > { %8183 = vmatprep.mubr.msk.bf16.mxu1 %vm644_vm9, %v8819_v18 }
  0xee   : > { %v568_v48 = vpop.permute.xlu0 %567  ;;  %v3795_v18 = vpop.permute.xlu1 %3794 }
  0xef   : > { %v627_v49 = vsel %vm613_vm8, %v610_v52, %v568_v48 }
  0xf0   : > { %8141 = vmatprep.mubr.msk.bf16.mxu0 %vm644_vm9, %v627_v49 }
  0xf1   : > { %8142 = vmatmul.mubr.msk.bf16.gmra.mxu0 %vm644_vm9, %v629_v26 }
  0xf2   : > { %8165 = vmatprep.mubr.msk.bf16.mxu0 %vm644_vm9, %v8834_v41  ;;  %v3793_v36 = vpop.permute.xlu0 %3792  ;;  %v3800_v32 = vpop.permute.xlu1 %3799 }
  0xf4   : > { %8184 = vmatmul.mubr.msk.bf16.vlgmr.msra.gmra.mxu1 %vm644_vm9, %v8843_v42  ;;  %v3803_v42 = vsel %vm571_vm6, %v8689_v27, %v3793_v36 }
  0xf5   : > { %8187 = vmatprep.mubr.msk.bf16.mxu1 %vm644_vm9, %v8855_v53  ;;  %v3805_v51 = vsel %vm596_vm7, %v3803_v42, %v3795_v18 }
  0xf6   : > { %v3640_v41 = vpop.permute.xlu0 %3639  ;;  %v3807_v53 = vsel %vm613_vm8, %v3805_v51, %v3800_v32  ;;  %v3652_v27 = vpop.permute.xlu1 %3651 }
  0xf7   : > { %v3655_v40 = vsel %vm571_vm6, %v8788_v33, %v3640_v41  ;;  %v8944_v33 = vld [vmem:[%s11700_s2] ss:$0 sm:$0xff] }
  0xf9   : > { %8166 = vmatmul.mubr.msk.bf16.vlgmr.msra.gmra.mxu0 %vm644_vm9, %v8862_v4  ;;  %v1138_v4 = vlaneseq }
  0xfa   : > { %8169 = vmatprep.mubr.msk.bf16.mxu0 %vm644_vm9, %v8865_v11  ;;  %v3647_v38 = vpop.permute.xlu0 %3646  ;;  %v1137_v11 = vunpack.c.0.s8 %v1136_v20 }
  0xfb   : > { %v3657_v15 = vsel %vm596_vm7, %v3655_v40, %v3647_v38  ;;  %v1139_v25 = vshrl.u32 %v1138_v4, 7 }
  0xfc   : > { %8188 = vmatmul.mubr.msk.bf16.gmra.mxu1 %vm644_vm9, %v973_v35  ;;  %v3659_v3 = vsel %vm613_vm8, %v3657_v15, %v3652_v27 }
  0xfd   : > { %8191 = vmatprep.mubr.msk.bf16.mxu1 %vm644_vm9, %v975_v2  ;;  %v8947_v63 = vsub.s32 %v1137_v11, %v1139_v25  ;;  %v8952_v34 = vsub.s32 0, %v1139_v25  ;;  %v8960_v55 = vsub.s32 %v6688_v59, %v1139_v25 }
 0x101   : > { %8170 = vmatmul.mubr.msk.bf16.gmra.mxu0 %vm644_vm9, %v623_v19 }
 0x102   : > { %8173 = vmatprep.mubr.msk.bf16.mxu0 %vm644_vm9, %v625_v28 }
 0x104   : > { %8192 = vmatmul.mubr.msk.bf16.gmra.mxu1 %vm644_vm9, %v977_v24 }
 0x105   : > { %8195 = vmatprep.mubr.msk.bf16.mxu1 %vm644_vm9, %v979_v21 }
 0x109   : > { %8174 = vmatmul.mubr.msk.bf16.gmra.mxu0 %vm644_vm9, %v627_v49 }
 0x10a   : > { %8177 = vmatprep.mubr.msk.bf16.mxu0 %vm644_vm9, %v629_v26 }
 0x10c   : > { %8196 = vmatmul.mubr.msk.bf16.gmra.mxu1 %vm644_vm9, %v3807_v53 }
 0x111   : > { %8178 = vmatmul.mubr.msk.bf16.gmra.mxu0 %vm644_vm9, %v3659_v3 }
 0x161   : > { %v8149_v10 = vpop.f32.mrf.mxu1 }
 0x162   : > { %v1048_v58 = vadd.f32 %v8149_v10, %v8944_v33 }
 0x163   : > { %v1039_v35 = vpop.f32.mrf.mxu1 }
 0x164   : > { %v1104_v37 = vmax.f32 %v1048_v58, 0.0  ;;  %v1040_v47 = vadd.f32 %v8944_v33, %v1039_v35 }
 0x165   : > { %v8150_v57 = vpop.f32.mrf.mxu1 }
 0x166   : > { %v2160_v50 = vcombine.high %v1104_v37, %v1104_v37  ;;  %v2167_v54 = vrot.slane %v1104_v37, %v8947_v63  ;;  %v1102_v0 = vmax.f32 %v1040_v47, 0.0  ;;  %v1051_v62 = vadd.f32 %v8150_v57, %v8944_v33 }
 0x167   : > { %v1042_v60 = vpop.f32.mrf.mxu1 }
 0x168   : > { %v2174_v2 = vrot.slane %v2160_v50, %v8947_v63  ;;  %v2175_v6 = vcombine.high %v2167_v54, %v2167_v54  ;;  %v8956_v14 = vrot.slane %v2167_v54, %v8947_v63  ;;  %v2062_v44 = vcombine.high %v1102_v0, %v1102_v0 }
 0x169   : > { %v2069_v7 = vrot.slane %v1102_v0, %v8947_v63  ;;  %v1105_v19 = vmax.f32 %v1051_v62, 0.0  ;;  %v1043_v28 = vadd.f32 %v8944_v33, %v1042_v60  ;;  %v8131_v49 = vpop.f32.mrf.mxu0 }
 0x16a   : > { %v2176_v1 = vcombine.high %v2174_v2, %v2174_v2  ;;  %v8963_v56 = vrot.slane %v2174_v2, %v8947_v63  ;;  %v8966_v29 = vrot.slane %v2175_v6, %v8947_v63  ;;  %v2205_v31 = vcombine.high %v8956_v14, %v8956_v14 }
 0x16b   : > { %v2913_v23 = vrot.slane %v8956_v14, %v8952_v34  ;;  %v2076_v24 = vrot.slane %v2062_v44, %v8947_v63  ;;  %v2077_v39 = vcombine.high %v2069_v7, %v2069_v7  ;;  %v8974_v12 = vrot.slane %v2069_v7, %v8947_v63  ;;  %v695_v11 = vpop.f32.mrf.mxu0 }
 0x16c   : > { %v8977_v17 = vrot.slane %v2176_v1, %v8947_v63  ;;  %v2206_v5 = vcombine.high %v8963_v56, %v8963_v56  ;;  %v2207_v45 = vcombine.high %v8966_v29, %v8966_v29  ;;  %v2917_v8 = vrot.slane %v8966_v29, %v8952_v34 }
 0x16d   : > { %v8986_v9 = vrot.slane %v2205_v31, %v8952_v34  ;;  %v2929_v13 = vrot.slane %v8963_v56, %v8952_v34  ;;  %v2078_v61 = vcombine.high %v2076_v24, %v2076_v24  ;;  %v8991_v21 = vrot.slane %v2076_v24, %v8947_v63 }
 0x16e   : > { %v2208_v16 = vcombine.high %v8977_v17, %v8977_v17  ;;  %v8996_v30 = vrot.slane %v2207_v45, %v8952_v34  ;;  %v2933_v52 = vrot.slane %v8977_v17, %v8952_v34  ;;  %v9001_v48 = vrot.slane %v2206_v5, %v8952_v34 }
 0x16f   : > { %v9004_v26 = vrot.slane %v2077_v39, %v8947_v63  ;;  %v9007_v36 = vrot.slane %v2078_v61, %v8947_v63  ;;  %v2107_v18 = vcombine.high %v8974_v12, %v8974_v12  ;;  %v2108_v41 = vcombine.high %v8991_v21, %v8991_v21 }
 0x170   : > { %v9014_v42 = vrot.slane %v2208_v16, %v8952_v34  ;;  %v2849_v32 = vrot.slane %v8974_v12, %v8952_v34  ;;  %v2865_v51 = vrot.slane %v8991_v21, %v8952_v34  ;;  %v2209_v40 = vcombine.high %v1105_v19, %v1105_v19 }
 0x171   : > { %v2109_v38 = vcombine.high %v9004_v26, %v9004_v26  ;;  %v2110_v53 = vcombine.high %v9007_v36, %v9007_v36  ;;  %v2853_v15 = vrot.slane %v9004_v26, %v8952_v34  ;;  %v9027_v27 = vrot.slane %v2107_v18, %v8952_v34 }
 0x172   : > { %v2869_v3 = vrot.slane %v9007_v36, %v8952_v34  ;;  %v9032_v43 = vrot.slane %v2108_v41, %v8952_v34  ;;  %v2216_v20 = vrot.slane %v1105_v19, %v8947_v63  ;;  %v2223_v4 = vrot.slane %v2209_v40, %v8947_v63 }
 0x173   : > { %v9037_v25 = vrot.slane %v2109_v38, %v8952_v34  ;;  %v9040_v10 = vrot.slane %v2110_v53, %v8952_v34  ;;  %v1103_v46 = vmax.f32 %v1043_v28, 0.0  ;;  %v704_v22 = vadd.f32 %v8131_v49, %v8944_v33 }
 0x174   : > { %v2224_v58 = vcombine.high %v2216_v20, %v2216_v20  ;;  %v2225_v35 = vcombine.high %v2223_v4, %v2223_v4  ;;  %v9044_v37 = vrot.slane %v2216_v20, %v8947_v63  ;;  %v9047_v47 = vrot.slane %v2223_v4, %v8947_v63 }
 0x175   : > { %v2111_v57 = vcombine.high %v1103_v46, %v1103_v46  ;;  %v2118_v59 = vrot.slane %v1103_v46, %v8947_v63  ;;  %v760_v50 = vmax.f32 %v704_v22, 0.0  ;;  %v696_v54 = vadd.f32 %v8944_v33, %v695_v11 }
 0x176   : > { %v9053_v0 = vrot.slane %v2224_v58, %v8947_v63  ;;  %v9056_v62 = vrot.slane %v2225_v35, %v8947_v63  ;;  %v2254_v60 = vcombine.high %v9044_v37, %v9044_v37  ;;  %v2255_v2 = vcombine.high %v9047_v47, %v9047_v47  ;;  %v8132_v58 = vpop.f32.mrf.mxu0 }
 0x177   : > { %v2945_v6 = vrot.slane %v9044_v37, %v8952_v34  ;;  %v2961_v44 = vrot.slane %v9047_v47, %v8952_v34  ;;  %v2125_v7 = vrot.slane %v2111_v57, %v8947_v63  ;;  %v2126_v19 = vcombine.high %v2118_v59, %v2118_v59 }
 0x178   : > { %v2256_v28 = vcombine.high %v9053_v0, %v9053_v0  ;;  %v2257_v1 = vcombine.high %v9056_v62, %v9056_v62  ;;  %v2949_v31 = vrot.slane %v9053_v0, %v8952_v34  ;;  %v9080_v24 = vrot.slane %v2254_v60, %v8952_v34 }
 0x179   : > { %v2965_v39 = vrot.slane %v9056_v62, %v8952_v34  ;;  %v9085_v5 = vrot.slane %v2255_v2, %v8952_v34  ;;  %v2127_v45 = vcombine.high %v2125_v7, %v2125_v7  ;;  %v9088_v61 = vrot.slane %v2118_v59, %v8947_v63 }
 0x17a   : > { %v9091_v16 = vrot.slane %v2256_v28, %v8952_v34  ;;  %v9094_v49 = vrot.slane %v2257_v1, %v8952_v34  ;;  %v9097_v18 = vrot.slane %v2125_v7, %v8947_v63  ;;  %v9100_v41 = vrot.slane %v2126_v19, %v8947_v63 }
 0x17b   : > { %v9103_v40 = vrot.slane %v2127_v45, %v8947_v63  ;;  %v2156_v38 = vcombine.high %v9088_v61, %v9088_v61  ;;  %v1232_v20 = vcombine.high %v760_v50, %v760_v50  ;;  %v1239_v60 = vrot.slane %v760_v50, %v8947_v63 }
 0x17c   : > { %v2157_v4 = vcombine.high %v9097_v18, %v9097_v18  ;;  %v2158_v11 = vcombine.high %v9100_v41, %v9100_v41  ;;  %v758_v28 = vmax.f32 %v696_v54, 0.0  ;;  %v707_v22 = vadd.f32 %v8132_v58, %v8944_v33 }
 0x17d   : > { %v2159_v35 = vcombine.high %v9103_v40, %v9103_v40  ;;  %v9126_v57 = vrot.slane %v2156_v38, %v8952_v34  ;;  %v1246_v19 = vrot.slane %v1232_v20, %v8947_v63  ;;  %v1247_v45 = vcombine.high %v1239_v60, %v1239_v60 }
 0x17e   : > { %v9132_v2 = vrot.slane %v2158_v11, %v8952_v34  ;;  %v9135_v7 = vrot.slane %v2157_v4, %v8952_v34  ;;  %v1255_v38 = vrot.slane %v1239_v60, %v8947_v63  ;;  %v1134_v59 = vcombine.high %v758_v28, %v758_v28 }
 0x17f   : > { %v9139_v1 = vrot.slane %v2159_v35, %v8952_v34  ;;  %v1248_v50 = vcombine.high %v1246_v19, %v1246_v19  ;;  %v1262_v11 = vrot.slane %v1246_v19, %v8947_v63  ;;  %v1141_v4 = vrot.slane %v758_v28, %v8947_v63 }
 0x180   : > { %v1269_v46 = vrot.slane %v1247_v45, %v8947_v63  ;;  %v1277_v20 = vcombine.high %v1255_v38, %v1255_v38  ;;  %v3503_v54 = vsel %vm3486_vm10, %v1255_v38, %v2913_v23  ;;  %v761_v35 = vmax.f32 %v707_v22, 0.0 }
 0x181   : > { %v1276_v60 = vrot.slane %v1248_v50, %v8947_v63  ;;  %v1278_v58 = vcombine.high %v1262_v11, %v1262_v11  ;;  %v3507_v19 = vsel %vm3486_vm10, %v1262_v11, %v2929_v13  ;;  %v1148_v53 = vrot.slane %v1134_v59, %v8947_v63 }
 0x182   : > { %v1279_v28 = vcombine.high %v1269_v46, %v1269_v46  ;;  %v3504_v14 = vsel %vm3486_vm10, %v1269_v46, %v2917_v8  ;;  %v3505_v23 = vsel %vm3486_vm10, %v1277_v20, %v8986_v9  ;;  %v1149_v22 = vcombine.high %v1141_v4, %v1141_v4 }
 0x183   : > { %v1280_v45 = vcombine.high %v1276_v60, %v1276_v60  ;;  %v3508_v56 = vsel %vm3486_vm10, %v1276_v60, %v2933_v52  ;;  %v3509_v13 = vsel %vm3486_vm10, %v1278_v58, %v9001_v48  ;;  %v6820_v59 = vcombine.low %v3503_v54, %v3504_v14  ;;  %v8153_v14 = vpop.f32.mrf.mxu1 }
 0x184   : > { %v3506_v38 = vsel %vm3486_vm10, %v1279_v28, %v8996_v30  ;;  %v6837_v29 = vcombine.low %v3507_v19, %v3508_v56  ;;  %v1150_v50 = vcombine.high %v1148_v53, %v1148_v53  ;;  %v1157_v8 = vrot.slane %v1141_v4, %v8947_v63 }
 0x185   : > { %v3510_v9 = vsel %vm3486_vm10, %v1280_v45, %v9014_v42  ;;  %v6821_v46 = vcombine.low %v3505_v23, %v3506_v38  ;;  %v6828_v17 = vrot.slane %v6820_v59, %v8960_v55  ;;  %v1164_v52 = vrot.slane %v1148_v53, %v8947_v63  ;;  %v698_v45 = vpop.f32.mrf.mxu0 }
 0x186   : > { %v6838_v11 = vcombine.low %v3509_v13, %v3510_v9  ;;  %v6845_v48 = vrot.slane %v6837_v29, %v8960_v55  ;;  %v1171_v20 = vrot.slane %v1149_v22, %v8947_v63  ;;  %v1178_v30 = vrot.slane %v1150_v50, %v8947_v63  ;;  %v1055_v29 = vpop.f32.mrf.mxu1 }
 0x187   : > { %v6835_v54 = vrot.slane %v6821_v46, %v8960_v55  ;;  %v1179_v60 = vcombine.high %v1157_v8, %v1157_v8  ;;  %v1180_v4 = vcombine.high %v1164_v52, %v1164_v52  ;;  %v3487_v42 = vsel %vm3486_vm10, %v1157_v8, %v2849_v32 }
 0x188   : > { %v6852_v53 = vrot.slane %v6838_v11, %v8960_v55  ;;  %v1181_v58 = vcombine.high %v1171_v20, %v1171_v20  ;;  %v1182_v19 = vcombine.high %v1178_v30, %v1178_v30  ;;  %v3488_v28 = vsel %vm3486_vm10, %v1171_v20, %v2853_v15 }
 0x189   : > { %v6836_v12 = vcombine.low %v6828_v17, %v6835_v54  ;;  %v3489_v32 = vsel %vm3486_vm10, %v1179_v60, %v9027_v27  ;;  %v3491_v23 = vsel %vm3486_vm10, %v1164_v52, %v2865_v51  ;;  %v3492_v22 = vsel %vm3486_vm10, %v1178_v30, %v2869_v3 }
 0x18a   : > { %v6853_v26 = vcombine.low %v6845_v48, %v6852_v53  ;;  %v3490_v15 = vsel %vm3486_vm10, %v1181_v58, %v9037_v25  ;;  %v3493_v56 = vsel %vm3486_vm10, %v1180_v4, %v9032_v43  ;;  %v3494_v27 = vsel %vm3486_vm10, %v1182_v19, %v9040_v10 }
 0x18b   : > { %7844 = vst.msk [vmem:[%s9188_s24 + $0x40] sm:$0xff] %vm596_vm7, %v6836_v12  ;;  %v6684_v21 = vcombine.low %v3487_v42, %v3488_v28  ;;  %v6685_v51 = vcombine.low %v3489_v32, %v3490_v15  ;;  %v6701_v13 = vcombine.low %v3491_v23, %v3492_v22  ;;  %v6702_v59 = vcombine.low %v3493_v56, %v3494_v27 }
 0x18c   : > { %7845 = vst.msk [vmem:[%s9188_s24 + $0x48] sm:$0xff] %vm596_vm7, %v6853_v26  ;;  %v1281_v36 = vcombine.high %v761_v35, %v761_v35  ;;  %v1288_v3 = vrot.slane %v761_v35, %v8947_v63  ;;  %v699_v38 = vadd.f32 %v8944_v33, %v698_v45  ;;  %v1064_v25 = vadd.f32 %v8153_v14, %v8944_v33 }
 0x18d   : > { %v6692_v43 = vrot.slane %v6684_v21, %v8960_v55  ;;  %v6699_v10 = vrot.slane %v6685_v51, %v8960_v55  ;;  %v6709_v50 = vrot.slane %v6701_v13, %v8960_v55  ;;  %v6716_v8 = vrot.slane %v6702_v59, %v8960_v55 }
 0x18e   : > { %v1295_v9 = vrot.slane %v1281_v36, %v8947_v63  ;;  %v1296_v46 = vcombine.high %v1288_v3, %v1288_v3  ;;  %v1304_v35 = vrot.slane %v1288_v3, %v8947_v63  ;;  %v759_v17 = vmax.f32 %v699_v38, 0.0 }
 0x18f   : > { %v6700_v52 = vcombine.low %v6692_v43, %v6699_v10  ;;  %v6717_v11 = vcombine.low %v6709_v50, %v6716_v8  ;;  %v1108_v48 = vmax.f32 %v1064_v25, 0.0  ;;  %v1056_v20 = vadd.f32 %v8944_v33, %v1055_v29 }
 0x190   : > { %v1297_v30 = vcombine.high %v1295_v9, %v1295_v9  ;;  %v1311_v54 = vrot.slane %v1295_v9, %v8947_v63  ;;  %v1318_v60 = vrot.slane %v1296_v46, %v8947_v63  ;;  %v1326_v4 = vcombine.high %v1304_v35, %v1304_v35 }
 0x191   : > { %7836 = vst.msk [vmem:[%s9188_s24] sm:$0xff] %vm596_vm7, %v6700_v52  ;;  %7837 = vst.msk [vmem:[%s9188_s24 + $0x8] sm:$0xff] %vm596_vm7, %v6717_v11  ;;  %v3511_v42 = vsel %vm3486_vm10, %v1304_v35, %v2945_v6  ;;  %v1183_v53 = vcombine.high %v759_v17, %v759_v17  ;;  %v1190_v58 = vrot.slane %v759_v17, %v8947_v63 }
 0x192   : > { %v2356_v19 = vcombine.high %v1108_v48, %v1108_v48  ;;  %v1325_v28 = vrot.slane %v1297_v30, %v8947_v63  ;;  %v1327_v14 = vcombine.high %v1311_v54, %v1311_v54  ;;  %v1328_v12 = vcombine.high %v1318_v60, %v1318_v60 }
 0x193   : > { %v3512_v32 = vsel %vm3486_vm10, %v1318_v60, %v2949_v31  ;;  %v3513_v23 = vsel %vm3486_vm10, %v1326_v4, %v9080_v24  ;;  %v3515_v37 = vsel %vm3486_vm10, %v1311_v54, %v2961_v44  ;;  %v1197_v22 = vrot.slane %v1183_v53, %v8947_v63 }
 0x194   : > { %v6854_v6 = vcombine.low %v3511_v42, %v3512_v32  ;;  %v1329_v45 = vcombine.high %v1325_v28, %v1325_v28  ;;  %v3514_v26 = vsel %vm3486_vm10, %v1328_v12, %v9091_v16  ;;  %v3516_v0 = vsel %vm3486_vm10, %v1325_v28, %v2965_v39 }
 0x195   : > { %v3517_v31 = vsel %vm3486_vm10, %v1327_v14, %v9085_v5  ;;  %v6855_v24 = vcombine.low %v3513_v23, %v3514_v26  ;;  %v6871_v15 = vcombine.low %v3515_v37, %v3516_v0  ;;  %v1198_v44 = vcombine.high %v1190_v58, %v1190_v58 }
 0x196   : > { %v6862_v47 = vrot.slane %v6854_v6, %v8960_v55  ;;  %v3518_v56 = vsel %vm3486_vm10, %v1329_v45, %v9094_v49  ;;  %v1199_v27 = vcombine.high %v1197_v22, %v1197_v22  ;;  %v1206_v21 = vrot.slane %v1190_v58, %v8947_v63 }
 0x197   : > { %v1213_v16 = vrot.slane %v1197_v22, %v8947_v63  ;;  %v6869_v62 = vrot.slane %v6855_v24, %v8960_v55  ;;  %v6872_v51 = vcombine.low %v3517_v31, %v3518_v56  ;;  %v6879_v39 = vrot.slane %v6871_v15, %v8960_v55  ;;  %v8154_v22 = vpop.f32.mrf.mxu1  ;;  %v8135_v24 = vpop.f32.mrf.mxu0 }
 0x198   : > { %v1220_v5 = vrot.slane %v1198_v44, %v8947_v63  ;;  %v1227_v13 = vrot.slane %v1199_v27, %v8947_v63  ;;  %v1228_v59 = vcombine.high %v1206_v21, %v1206_v21  ;;  %v11707_v49 = vrot.slane %v9088_v61, %v8952_v34 }
 0x199   : > { %v1229_v36 = vcombine.high %v1213_v16, %v1213_v16  ;;  %v6870_v38 = vcombine.low %v6862_v47, %v6869_v62  ;;  %v6886_v25 = vrot.slane %v6872_v51, %v8960_v55  ;;  %v11708_v43 = vrot.slane %v9100_v41, %v8952_v34 }
 0x19a   : > { %v3495_v3 = vsel %vm3486_vm10, %v1206_v21, %v11707_v49  ;;  %v1230_v29 = vcombine.high %v1220_v5, %v1220_v5  ;;  %v1231_v50 = vcombine.high %v1227_v13, %v1227_v13  ;;  %v3497_v8 = vsel %vm3486_vm10, %v1228_v59, %v9126_v57 }
 0x19b   : > { %v3496_v10 = vsel %vm3486_vm10, %v1220_v5, %v11708_v43  ;;  %v11709_v9 = vrot.slane %v9097_v18, %v8952_v34  ;;  %v11710_v46 = vrot.slane %v9103_v40, %v8952_v34  ;;  %v6887_v17 = vcombine.low %v6879_v39, %v6886_v25  ;;  %7846 = vst.msk [vmem:[%s9188_s24 + $0x50] sm:$0xff] %vm596_vm7, %v6870_v38 }
 0x19c   : > { %v3498_v41 = vsel %vm3486_vm10, %v1230_v29, %v9132_v2  ;;  %v3501_v52 = vsel %vm3486_vm10, %v1229_v36, %v9135_v7  ;;  %v6718_v57 = vcombine.low %v3495_v3, %v3496_v10  ;;  %v3502_v18 = vsel %vm3486_vm10, %v1231_v50, %v9139_v1 }
 0x19d   : > { %v3499_v61 = vsel %vm3486_vm10, %v1213_v16, %v11709_v9  ;;  %v3500_v35 = vsel %vm3486_vm10, %v1227_v13, %v11710_v46  ;;  %v6719_v11 = vcombine.low %v3497_v8, %v3498_v41  ;;  %v2363_v54 = vrot.slane %v1108_v48, %v8947_v63  ;;  %7847 = vst.msk [vmem:[%s9188_s24 + $0x58] sm:$0xff] %vm596_vm7, %v6887_v17 }
 0x19e   : > { %v6735_v30 = vcombine.low %v3499_v61, %v3500_v35  ;;  %v6726_v40 = vrot.slane %v6718_v57, %v8960_v55  ;;  %v6736_v60 = vcombine.low %v3501_v52, %v3502_v18  ;;  %v2370_v4 = vrot.slane %v2356_v19, %v8947_v63 }
 0x19f   : > { %v1106_v42 = vmax.f32 %v1056_v20, 0.0  ;;  %v6733_v2 = vrot.slane %v6719_v11, %v8960_v55  ;;  %v2371_v53 = vcombine.high %v2363_v54, %v2363_v54  ;;  %v9300_v1 = vrot.slane %v2363_v54, %v8947_v63  ;;  %v1058_v11 = vpop.f32.mrf.mxu1 }
 0x1a0   : > { %v6743_v7 = vrot.slane %v6735_v30, %v8960_v55  ;;  %v6750_v58 = vrot.slane %v6736_v60, %v8960_v55  ;;  %v2372_v48 = vcombine.high %v2370_v4, %v2370_v4  ;;  %v9304_v28 = vrot.slane %v2370_v4, %v8947_v63 }
 0x1a1   : > { %v2258_v14 = vcombine.high %v1106_v42, %v1106_v42  ;;  %v6734_v12 = vcombine.low %v6726_v40, %v6733_v2  ;;  %v9307_v20 = vrot.slane %v2371_v53, %v8947_v63  ;;  %v2401_v19 = vcombine.high %v9300_v1, %v9300_v1 }
 0x1a2   : > { %v6751_v32 = vcombine.low %v6743_v7, %v6750_v58  ;;  %v9312_v23 = vrot.slane %v2372_v48, %v8947_v63  ;;  %v2402_v37 = vcombine.high %v9304_v28, %v9304_v28  ;;  %v3041_v6 = vrot.slane %v9300_v1, %v8952_v34 }
 0x1a3   : > { %7838 = vst.msk [vmem:[%s9188_s24 + $0x10] sm:$0xff] %vm596_vm7, %v6734_v12  ;;  %v2403_v45 = vcombine.high %v9307_v20, %v9307_v20  ;;  %v3045_v26 = vrot.slane %v9307_v20, %v8952_v34  ;;  %v3057_v0 = vrot.slane %v9304_v28, %v8952_v34  ;;  %v2265_v31 = vrot.slane %v1106_v42, %v8947_v63  ;;  %v711_v12 = vpop.f32.mrf.mxu0 }
 0x1a4   : > { %7839 = vst.msk [vmem:[%s9188_s24 + $0x18] sm:$0xff] %vm596_vm7, %v6751_v32  ;;  %v2404_v47 = vcombine.high %v9312_v23, %v9312_v23  ;;  %v9332_v15 = vrot.slane %v2401_v19, %v8952_v34  ;;  %v3061_v44 = vrot.slane %v9312_v23, %v8952_v34  ;;  %v2272_v56 = vrot.slane %v2258_v14, %v8947_v63 }
 0x1a5   : > { %v9338_v27 = vrot.slane %v2402_v37, %v8952_v34  ;;  %v2273_v21 = vcombine.high %v2265_v31, %v2265_v31  ;;  %v9341_v16 = vrot.slane %v2265_v31, %v8947_v63  ;;  %v1067_v62 = vadd.f32 %v8154_v22, %v8944_v33 }
 0x1a6   : > { %v9345_v51 = vrot.slane %v2403_v45, %v8952_v34  ;;  %v2274_v39 = vcombine.high %v2272_v56, %v2272_v56  ;;  %v9348_v5 = vrot.slane %v2272_v56, %v8947_v63  ;;  %v720_v13 = vadd.f32 %v8135_v24, %v8944_v33 }
 0x1a7   : > { %v9352_v59 = vrot.slane %v2404_v47, %v8952_v34  ;;  %v9355_v36 = vrot.slane %v2273_v21, %v8947_v63  ;;  %v2303_v49 = vcombine.high %v9341_v16, %v9341_v16  ;;  %v1109_v3 = vmax.f32 %v1067_v62, 0.0 }
 0x1a8   : > { %v9360_v38 = vrot.slane %v2274_v39, %v8947_v63  ;;  %v2304_v25 = vcombine.high %v9348_v5, %v9348_v5  ;;  %v2977_v29 = vrot.slane %v9341_v16, %v8952_v34  ;;  %v764_v43 = vmax.f32 %v720_v13, 0.0 }
 0x1a9   : > { %v2305_v10 = vcombine.high %v9355_v36, %v9355_v36  ;;  %v2981_v50 = vrot.slane %v9355_v36, %v8952_v34  ;;  %v2993_v8 = vrot.slane %v9348_v5, %v8952_v34  ;;  %v2405_v9 = vcombine.high %v1109_v3, %v1109_v3 }
 0x1aa   : > { %v2306_v61 = vcombine.high %v9360_v38, %v9360_v38  ;;  %v9375_v46 = vrot.slane %v2303_v49, %v8952_v34  ;;  %v2997_v35 = vrot.slane %v9360_v38, %v8952_v34  ;;  %v2412_v17 = vrot.slane %v1109_v3, %v8947_v63 }
 0x1ab   : > { %v9381_v41 = vrot.slane %v2304_v25, %v8952_v34  ;;  %v2419_v52 = vrot.slane %v2405_v9, %v8947_v63  ;;  %v1428_v57 = vcombine.high %v764_v43, %v764_v43  ;;  %v1435_v18 = vrot.slane %v764_v43, %v8947_v63  ;;  %v8136_v43 = vpop.f32.mrf.mxu0 }
 0x1ac   : > { %v9386_v30 = vrot.slane %v2305_v10, %v8952_v34  ;;  %v9389_v54 = vrot.slane %v2306_v61, %v8952_v34  ;;  %v2420_v40 = vcombine.high %v2412_v17, %v2412_v17  ;;  %v9392_v60 = vrot.slane %v2412_v17, %v8947_v63 }
 0x1ad   : > { %v2421_v4 = vcombine.high %v2419_v52, %v2419_v52  ;;  %v9395_v42 = vrot.slane %v2419_v52, %v8947_v63  ;;  %v1442_v2 = vrot.slane %v1428_v57, %v8947_v63  ;;  %v1443_v7 = vcombine.high %v1435_v18, %v1435_v18 }
 0x1ae   : > { %v9399_v53 = vrot.slane %v2420_v40, %v8947_v63  ;;  %v2450_v58 = vcombine.high %v9392_v60, %v9392_v60  ;;  %v1451_v48 = vrot.slane %v1435_v18, %v8947_v63  ;;  %v1059_v14 = vadd.f32 %v8944_v33, %v1058_v11 }
 0x1af   : > { %v9406_v19 = vrot.slane %v2421_v4, %v8947_v63  ;;  %v2451_v32 = vcombine.high %v9395_v42, %v9395_v42  ;;  %v3073_v37 = vrot.slane %v9392_v60, %v8952_v34  ;;  %v1444_v22 = vcombine.high %v1442_v2, %v1442_v2  ;;  %v714_v4 = vpop.f32.mrf.mxu0 }
 0x1b0   : > { %v2452_v45 = vcombine.high %v9399_v53, %v9399_v53  ;;  %v3077_v31 = vrot.slane %v9399_v53, %v8952_v34  ;;  %v3089_v24 = vrot.slane %v9395_v42, %v8952_v34  ;;  %v1458_v47 = vrot.slane %v1442_v2, %v8947_v63 }
 0x1b1   : > { %v2453_v56 = vcombine.high %v9406_v19, %v9406_v19  ;;  %v9422_v21 = vrot.slane %v2450_v58, %v8952_v34  ;;  %v3093_v62 = vrot.slane %v9406_v19, %v8952_v34  ;;  %v1465_v39 = vrot.slane %v1443_v7, %v8947_v63 }
 0x1b2   : > { %v9428_v13 = vrot.slane %v2451_v32, %v8952_v34  ;;  %v1472_v49 = vrot.slane %v1444_v22, %v8947_v63  ;;  %v1473_v3 = vcombine.high %v1451_v48, %v1451_v48  ;;  %v1474_v25 = vcombine.high %v1458_v47, %v1458_v47 }
 0x1b3   : > { %v9432_v10 = vrot.slane %v2452_v45, %v8952_v34  ;;  %v1475_v9 = vcombine.high %v1465_v39, %v1465_v39  ;;  %v3535_v61 = vsel %vm3486_vm10, %v1451_v48, %v3041_v6  ;;  %v3536_v17 = vsel %vm3486_vm10, %v1465_v39, %v3045_v26  ;;  %v8157_v48 = vpop.f32.mrf.mxu1 }
 0x1b4   : > { %v1476_v52 = vcombine.high %v1472_v49, %v1472_v49  ;;  %v3537_v57 = vsel %vm3486_vm10, %v1473_v3, %v9332_v15  ;;  %v3539_v18 = vsel %vm3486_vm10, %v1458_v47, %v3057_v0  ;;  %v3540_v1 = vsel %vm3486_vm10, %v1472_v49, %v3061_v44 }
 0x1b5   : > { %v3538_v6 = vsel %vm3486_vm10, %v1475_v9, %v9345_v51  ;;  %v3541_v20 = vsel %vm3486_vm10, %v1474_v25, %v9338_v27  ;;  %v7092_v26 = vcombine.low %v3535_v61, %v3536_v17  ;;  %v7109_v11 = vcombine.low %v3539_v18, %v3540_v1 }
 0x1b6   : > { %v3542_v15 = vsel %vm3486_vm10, %v1476_v52, %v9352_v59  ;;  %v7093_v40 = vcombine.low %v3537_v57, %v3538_v6  ;;  %v1107_v28 = vmax.f32 %v1059_v14, 0.0  ;;  %v712_v0 = vadd.f32 %v8944_v33, %v711_v12 }
 0x1b7   : > { %v9460_v23 = vrot.slane %v2453_v56, %v8952_v34  ;;  %v7100_v44 = vrot.slane %v7092_v26, %v8960_v55  ;;  %v7110_v2 = vcombine.low %v3541_v20, %v3542_v15  ;;  %v723_v51 = vadd.f32 %v8136_v43, %v8944_v33 }
 0x1b8   : > { %v7107_v27 = vrot.slane %v7093_v40, %v8960_v55  ;;  %v2307_v7 = vcombine.high %v1107_v28, %v1107_v28  ;;  %v2314_v58 = vrot.slane %v1107_v28, %v8947_v63  ;;  %v762_v59 = vmax.f32 %v712_v0, 0.0 }
 0x1b9   : > { %v7117_v14 = vrot.slane %v7109_v11, %v8960_v55  ;;  %v7124_v12 = vrot.slane %v7110_v2, %v8960_v55  ;;  %v765_v32 = vmax.f32 %v723_v51, 0.0  ;;  %v715_v22 = vadd.f32 %v8944_v33, %v714_v4 }
 0x1ba   : > { %v7108_v45 = vcombine.low %v7100_v44, %v7107_v27  ;;  %v2321_v47 = vrot.slane %v2307_v7, %v8947_v63  ;;  %v2322_v56 = vcombine.high %v2314_v58, %v2314_v58  ;;  %v9471_v39 = vrot.slane %v2314_v58, %v8947_v63 }
 0x1bb   : > { %v7125_v49 = vcombine.low %v7117_v14, %v7124_v12  ;;  %v1330_v3 = vcombine.high %v762_v59, %v762_v59  ;;  %v1337_v25 = vrot.slane %v762_v59, %v8947_v63  ;;  %v9475_v43 = vadd.f32 %v8157_v48, %v8944_v33 }
 0x1bc   : > { %7860 = vst.msk [vmem:[%s9188_s24 + $0xc0] sm:$0xff] %vm596_vm7, %v7108_v45  ;;  %v2323_v9 = vcombine.high %v2321_v47, %v2321_v47  ;;  %v9480_v61 = vrot.slane %v2321_v47, %v8947_v63  ;;  %v9483_v17 = vrot.slane %v2322_v56, %v8947_v63  ;;  %v2352_v52 = vcombine.high %v9471_v39, %v9471_v39 }
 0x1bd   : > { %7861 = vst.msk [vmem:[%s9188_s24 + $0xc8] sm:$0xff] %vm596_vm7, %v7125_v49  ;;  %v1344_v57 = vrot.slane %v1330_v3, %v8947_v63  ;;  %v1345_v18 = vcombine.high %v1337_v25, %v1337_v25  ;;  %v1353_v1 = vrot.slane %v1337_v25, %v8947_v63  ;;  %v1477_v6 = vcombine.high %v765_v32, %v765_v32 }
 0x1be   : > { %v9492_v20 = vrot.slane %v2323_v9, %v8947_v63  ;;  %v2353_v26 = vcombine.high %v9480_v61, %v9480_v61  ;;  %v2354_v11 = vcombine.high %v9483_v17, %v9483_v17  ;;  %v3009_v15 = vrot.slane %v9471_v39, %v8952_v34 }
 0x1bf   : > { %v3013_v40 = vrot.slane %v9483_v17, %v8952_v34  ;;  %v9503_v28 = vrot.slane %v2352_v52, %v8952_v34  ;;  %v1346_v0 = vcombine.high %v1344_v57, %v1344_v57  ;;  %v1360_v4 = vrot.slane %v1344_v57, %v8947_v63 }
 0x1c0   : > { %v2355_v44 = vcombine.high %v9492_v20, %v9492_v20  ;;  %v9509_v2 = vrot.slane %v2354_v11, %v8952_v34  ;;  %v3025_v51 = vrot.slane %v9480_v61, %v8952_v34  ;;  %v3029_v27 = vrot.slane %v9492_v20, %v8952_v34 }
 0x1c1   : > { %v1367_v7 = vrot.slane %v1345_v18, %v8947_v63  ;;  %v1374_v58 = vrot.slane %v1346_v0, %v8947_v63  ;;  %v1375_v59 = vcombine.high %v1353_v1, %v1353_v1  ;;  %v1376_v48 = vcombine.high %v1360_v4, %v1360_v4 }
 0x1c2   : > { %v9518_v14 = vrot.slane %v2353_v26, %v8952_v34  ;;  %v3519_v12 = vsel %vm3486_vm10, %v1353_v1, %v2977_v29  ;;  %v3523_v45 = vsel %vm3486_vm10, %v1360_v4, %v2993_v8  ;;  %v1484_v47 = vrot.slane %v765_v32, %v8947_v63 }
 0x1c3   : > { %v1377_v56 = vcombine.high %v1367_v7, %v1367_v7  ;;  %v1378_v49 = vcombine.high %v1374_v58, %v1374_v58  ;;  %v3520_v3 = vsel %vm3486_vm10, %v1367_v7, %v2981_v50  ;;  %v3521_v25 = vsel %vm3486_vm10, %v1375_v59, %v9375_v46 }
 0x1c4   : > { %v3524_v16 = vsel %vm3486_vm10, %v1374_v58, %v2997_v35  ;;  %v3525_v5 = vsel %vm3486_vm10, %v1376_v48, %v9381_v41  ;;  %v6956_v29 = vcombine.low %v3519_v12, %v3520_v3  ;;  %v1491_v8 = vrot.slane %v1477_v6, %v8947_v63 }
 0x1c5   : > { %v3522_v32 = vsel %vm3486_vm10, %v1377_v56, %v9386_v30  ;;  %v3526_v36 = vsel %vm3486_vm10, %v1378_v49, %v9389_v54  ;;  %v6973_v50 = vcombine.low %v3523_v45, %v3524_v16  ;;  %v1492_v9 = vcombine.high %v1484_v47, %v1484_v47 }
 0x1c6   : > { %v6957_v46 = vcombine.low %v3521_v25, %v3522_v32  ;;  %v6964_v52 = vrot.slane %v6956_v29, %v8960_v55  ;;  %v6974_v38 = vcombine.low %v3525_v5, %v3526_v36  ;;  %v1493_v57 = vcombine.high %v1491_v8, %v1491_v8  ;;  %v8139_v32 = vpop.f32.mrf.mxu0 }
 0x1c7   : > { %v6981_v35 = vrot.slane %v6973_v50, %v8960_v55  ;;  %v1500_v41 = vrot.slane %v1484_v47, %v8947_v63  ;;  %v1507_v18 = vrot.slane %v1491_v8, %v8947_v63  ;;  %v1514_v1 = vrot.slane %v1492_v9, %v8947_v63 }
 0x1c8   : > { %v6971_v30 = vrot.slane %v6957_v46, %v8960_v55  ;;  %v6988_v54 = vrot.slane %v6974_v38, %v8960_v55  ;;  %v1521_v6 = vrot.slane %v1493_v57, %v8947_v63  ;;  %v763_v26 = vmax.f32 %v715_v22, 0.0  ;;  %v1071_v46 = vpop.f32.mrf.mxu1 }
 0x1c9   : > { %v1522_v11 = vcombine.high %v1500_v41, %v1500_v41  ;;  %v1523_v0 = vcombine.high %v1507_v18, %v1507_v18  ;;  %v1524_v4 = vcombine.high %v1514_v1, %v1514_v1  ;;  %v3543_v7 = vsel %vm3486_vm10, %v1500_v41, %v3073_v37 }
 0x1ca   : > { %v6972_v58 = vcombine.low %v6964_v52, %v6971_v30  ;;  %v6989_v59 = vcombine.low %v6981_v35, %v6988_v54  ;;  %v1525_v48 = vcombine.high %v1521_v6, %v1521_v6  ;;  %v3544_v12 = vsel %vm3486_vm10, %v1514_v1, %v3077_v31 }
 0x1cb   : > { %v3545_v45 = vsel %vm3486_vm10, %v1522_v11, %v9422_v21  ;;  %v3546_v22 = vsel %vm3486_vm10, %v1524_v4, %v9432_v10  ;;  %v3547_v60 = vsel %vm3486_vm10, %v1507_v18, %v3089_v24  ;;  %v3548_v37 = vsel %vm3486_vm10, %v1521_v6, %v3093_v62 }
 0x1cc   : > { %7852 = vst.msk [vmem:[%s9188_s24 + $0x80] sm:$0xff] %vm596_vm7, %v6972_v58  ;;  %7853 = vst.msk [vmem:[%s9188_s24 + $0x88] sm:$0xff] %vm596_vm7, %v6989_v59  ;;  %v3549_v53 = vsel %vm3486_vm10, %v1523_v0, %v9428_v13  ;;  %v3550_v31 = vsel %vm3486_vm10, %v1525_v48, %v9460_v23  ;;  %v7126_v21 = vcombine.low %v3543_v7, %v3544_v12  ;;  %v1112_v3 = vmax.f32 %v9475_v43, 0.0  ;;  %v8158_v58 = vpop.f32.mrf.mxu1 }
 0x1cd   : > { %v7127_v10 = vcombine.low %v3545_v45, %v3546_v22  ;;  %v7143_v42 = vcombine.low %v3547_v60, %v3548_v37  ;;  %v7144_v47 = vcombine.low %v3549_v53, %v3550_v31  ;;  %v1379_v24 = vcombine.high %v763_v26, %v763_v26 }
 0x1ce   : > { %v1386_v56 = vrot.slane %v763_v26, %v8947_v63  ;;  %v3037_v19 = vrot.slane %v2355_v44, %v8952_v34  ;;  %v7134_v62 = vrot.slane %v7126_v21, %v8960_v55  ;;  %v2552_v8 = vcombine.high %v1112_v3, %v1112_v3  ;;  %v727_v26 = vpop.f32.mrf.mxu0 }
 0x1cf   : > { %v7141_v49 = vrot.slane %v7127_v10, %v8960_v55  ;;  %v7151_v13 = vrot.slane %v7143_v42, %v8960_v55  ;;  %v7158_v23 = vrot.slane %v7144_v47, %v8960_v55  ;;  %v1393_v25 = vrot.slane %v1379_v24, %v8947_v63  ;;  %v1074_v42 = vpop.f32.mrf.mxu1 }
 0x1d0   : > { %v1394_v16 = vcombine.high %v1386_v56, %v1386_v56  ;;  %v1402_v29 = vrot.slane %v1386_v56, %v8947_v63  ;;  %v2559_v44 = vrot.slane %v1112_v3, %v8947_v63  ;;  %v2566_v57 = vrot.slane %v2552_v8, %v8947_v63  ;;  %v8140_v12 = vpop.f32.mrf.mxu0 }
 0x1d1   : > { %v7142_v5 = vcombine.low %v7134_v62, %v7141_v49  ;;  %v7159_v36 = vcombine.low %v7151_v13, %v7158_v23  ;;  %v1395_v50 = vcombine.high %v1393_v25, %v1393_v25  ;;  %v1409_v9 = vrot.slane %v1393_v25, %v8947_v63  ;;  %v9670_v13 = vld [vmem:[%s11700_s2] ss:$0 sm:$0xff] }
 0x1d2   : > { %v1416_v43 = vrot.slane %v1394_v16, %v8947_v63  ;;  %v1424_v52 = vcombine.high %v1402_v29, %v1402_v29  ;;  %v3527_v38 = vsel %vm3486_vm10, %v1402_v29, %v3009_v15  ;;  %v2567_v35 = vcombine.high %v2559_v44, %v2559_v44  ;;  %v730_v25 = vpop.f32.mrf.mxu0 }
 0x1d3   : > { %7862 = vst.msk [vmem:[%s9188_s24 + $0xd0] sm:$0xff] %vm596_vm7, %v7142_v5  ;;  %7863 = vst.msk [vmem:[%s9188_s24 + $0xd8] sm:$0xff] %vm596_vm7, %v7159_v36  ;;  %v1423_v41 = vrot.slane %v1395_v50, %v8947_v63  ;;  %v1425_v18 = vcombine.high %v1409_v9, %v1409_v9  ;;  %v2568_v6 = vcombine.high %v2566_v57, %v2566_v57 }
 0x1d4   : > { %v1426_v1 = vcombine.high %v1416_v43, %v1416_v43  ;;  %v3528_v30 = vsel %vm3486_vm10, %v1416_v43, %v3013_v40  ;;  %v3529_v54 = vsel %vm3486_vm10, %v1424_v52, %v9503_v28  ;;  %v1072_v15 = vadd.f32 %v8944_v33, %v1071_v46 }
 0x1d5   : > { %v6990_v39 = vcombine.low %v3527_v38, %v3528_v30  ;;  %v1427_v11 = vcombine.high %v1423_v41, %v1423_v41  ;;  %v3531_v4 = vsel %vm3486_vm10, %v1409_v9, %v3025_v51  ;;  %v3532_v17 = vsel %vm3486_vm10, %v1423_v41, %v3029_v27 }
 0x1d6   : > { %v3530_v0 = vsel %vm3486_vm10, %v1426_v1, %v9509_v2  ;;  %v3533_v40 = vsel %vm3486_vm10, %v1425_v18, %v9518_v14  ;;  %v7007_v33 = vcombine.low %v3531_v4, %v3532_v17  ;;  %v9624_v7 = vrot.slane %v2559_v44, %v8947_v63 }
 0x1d7   : > { %v6991_v28 = vcombine.low %v3529_v54, %v3530_v0  ;;  %v3534_v2 = vsel %vm3486_vm10, %v1427_v11, %v3037_v19  ;;  %v9628_v61 = vrot.slane %v2566_v57, %v8947_v63  ;;  %v9631_v51 = vrot.slane %v2567_v35, %v8947_v63 }
 0x1d8   : > { %v9634_v20 = vrot.slane %v2568_v6, %v8947_v63  ;;  %v6998_v27 = vrot.slane %v6990_v39, %v8960_v55  ;;  %v7008_v59 = vcombine.low %v3533_v40, %v3534_v2  ;;  %v2597_v48 = vcombine.high %v9624_v7, %v9624_v7 }
 0x1d9   : > { %v7005_v14 = vrot.slane %v6991_v28, %v8960_v55  ;;  %v7015_v45 = vrot.slane %v7007_v33, %v8960_v55  ;;  %v2598_v22 = vcombine.high %v9628_v61, %v9628_v61  ;;  %v2599_v60 = vcombine.high %v9631_v51, %v9631_v51 }
 0x1da   : > { %v2600_v37 = vcombine.high %v9634_v20, %v9634_v20  ;;  %v7022_v31 = vrot.slane %v7008_v59, %v8960_v55  ;;  %v3169_v21 = vrot.slane %v9624_v7, %v8952_v34  ;;  %v3173_v10 = vrot.slane %v9631_v51, %v8952_v34 }
 0x1db   : > { %v7006_v53 = vcombine.low %v6998_v27, %v7005_v14  ;;  %v9653_v47 = vrot.slane %v2597_v48, %v8952_v34  ;;  %v9656_v24 = vrot.slane %v2599_v60, %v8952_v34  ;;  %v3185_v56 = vrot.slane %v9628_v61, %v8952_v34 }
 0x1dc   : > { %v3189_v19 = vrot.slane %v9634_v20, %v8952_v34  ;;  %v7023_v62 = vcombine.low %v7015_v45, %v7022_v31  ;;  %v9665_v49 = vrot.slane %v2598_v22, %v8952_v34  ;;  %v1110_v3 = vmax.f32 %v1072_v15, 0.0 }
 0x1dd   : > { %7854 = vst.msk [vmem:[%s9188_s24 + $0x90] sm:$0xff] %vm596_vm7, %v7006_v53  ;;  %v1083_v23 = vadd.f32 %v9670_v13, %v8158_v58  ;;  %v736_v16 = vadd.f32 %v9670_v13, %v8139_v32  ;;  %v1075_v5 = vadd.f32 %v9670_v13, %v1074_v42  ;;  %v728_v29 = vadd.f32 %v9670_v13, %v727_v26 }
 0x1de   : > { %v739_v8 = vadd.f32 %v9670_v13, %v8140_v12  ;;  %7855 = vst.msk [vmem:[%s9188_s24 + $0x98] sm:$0xff] %vm596_vm7, %v7023_v62  ;;  %v9680_v44 = vrot.slane %v2600_v37, %v8952_v34  ;;  %v2454_v36 = vcombine.high %v1110_v3, %v1110_v3  ;;  %v2461_v50 = vrot.slane %v1110_v3, %v8947_v63 }
 0x1df   : > { %v1113_v9 = vmax.f32 %v1083_v23, 0.0  ;;  %v768_v43 = vmax.f32 %v736_v16, 0.0  ;;  %v1111_v46 = vmax.f32 %v1075_v5, 0.0  ;;  %v9683_v52 = vmax.f32 %v728_v29, 0.0 }
 0x1e0   : > { %v9686_v32 = vadd.f32 %v9670_v13, %v730_v25  ;;  %v2468_v38 = vrot.slane %v2454_v36, %v8947_v63  ;;  %v2469_v57 = vcombine.high %v2461_v50, %v2461_v50  ;;  %v9690_v35 = vrot.slane %v2461_v50, %v8947_v63 }
 0x1e1   : > { %v2601_v41 = vcombine.high %v1113_v9, %v1113_v9  ;;  %v2608_v18 = vrot.slane %v1113_v9, %v8947_v63  ;;  %v1624_v1 = vcombine.high %v768_v43, %v768_v43  ;;  %v1631_v30 = vrot.slane %v768_v43, %v8947_v63 }
 0x1e2   : > { %v9694_v54 = vmax.f32 %v739_v8, 0.0  ;;  %v2470_v39 = vcombine.high %v2468_v38, %v2468_v38  ;;  %v9697_v6 = vrot.slane %v2468_v38, %v8947_v63  ;;  %v9700_v15 = vrot.slane %v2469_v57, %v8947_v63 }
 0x1e3   : > { %v2499_v26 = vcombine.high %v9690_v35, %v9690_v35  ;;  %v2615_v11 = vrot.slane %v2601_v41, %v8947_v63  ;;  %v2616_v0 = vcombine.high %v2608_v18, %v2608_v18  ;;  %v9706_v4 = vrot.slane %v2608_v18, %v8947_v63 }
 0x1e4   : > { %v2503_v17 = vcombine.high %v1111_v46, %v1111_v46  ;;  %v9709_v40 = vrot.slane %v2470_v39, %v8947_v63  ;;  %v2500_v28 = vcombine.high %v9697_v6, %v9697_v6  ;;  %v2501_v33 = vcombine.high %v9700_v15, %v9700_v15 }
 0x1e5   : > { %v3105_v58 = vrot.slane %v9690_v35, %v8952_v34  ;;  %v3109_v2 = vrot.slane %v9700_v15, %v8952_v34  ;;  %v9720_v27 = vrot.slane %v2499_v26, %v8952_v34  ;;  %v2617_v14 = vcombine.high %v2615_v11, %v2615_v11 }
 0x1e6   : > { %v9723_v59 = vrot.slane %v2615_v11, %v8947_v63  ;;  %v2502_v48 = vcombine.high %v9709_v40, %v9709_v40  ;;  %v9728_v12 = vrot.slane %v2501_v33, %v8952_v34  ;;  %v3121_v45 = vrot.slane %v9697_v6, %v8952_v34 }
 0x1e7   : > { %v3125_v22 = vrot.slane %v9709_v40, %v8952_v34  ;;  %v9735_v60 = vrot.slane %v2616_v0, %v8947_v63  ;;  %v9738_v37 = vrot.slane %v2617_v14, %v8947_v63  ;;  %v2646_v53 = vcombine.high %v9706_v4, %v9706_v4 }
 0x1e8   : > { %v2647_v31 = vcombine.high %v9723_v59, %v9723_v59  ;;  %v9745_v42 = vrot.slane %v2500_v28, %v8952_v34  ;;  %v9748_v62 = vrot.slane %v2502_v48, %v8952_v34  ;;  %v3201_v3 = vrot.slane %v9706_v4, %v8952_v34 }
 0x1e9   : > { %v1638_v23 = vrot.slane %v1624_v1, %v8947_v63  ;;  %v2648_v25 = vcombine.high %v9735_v60, %v9735_v60  ;;  %v2649_v16 = vcombine.high %v9738_v37, %v9738_v37  ;;  %v3205_v5 = vrot.slane %v9735_v60, %v8952_v34 }
 0x1ea   : > { %v3217_v29 = vrot.slane %v9723_v59, %v8952_v34  ;;  %v9762_v8 = vrot.slane %v2646_v53, %v8952_v34  ;;  %v3221_v36 = vrot.slane %v9738_v37, %v8952_v34  ;;  %v1639_v50 = vcombine.high %v1631_v30, %v1631_v30 }
 0x1eb   : > { %v1640_v9 = vcombine.high %v1638_v23, %v1638_v23  ;;  %v9767_v43 = vrot.slane %v2648_v25, %v8952_v34  ;;  %v9770_v38 = vrot.slane %v2647_v31, %v8952_v34  ;;  %v1647_v57 = vrot.slane %v1631_v30, %v8947_v63 }
 0x1ec   : > { %v1654_v41 = vrot.slane %v1638_v23, %v8947_v63  ;;  %v1661_v18 = vrot.slane %v1639_v50, %v8947_v63  ;;  %v2510_v39 = vrot.slane %v1111_v46, %v8947_v63  ;;  %v2517_v26 = vrot.slane %v2503_v17, %v8947_v63 }
 0x1ed   : > { %v1668_v1 = vrot.slane %v1640_v9, %v8947_v63  ;;  %v1669_v11 = vcombine.high %v1647_v57, %v1647_v57  ;;  %v3567_v28 = vsel %vm3486_vm10, %v1647_v57, %v3169_v21  ;;  %v1526_v9 = vcombine.high %v9683_v52, %v9683_v52 }
 0x1ee   : > { %v1670_v0 = vcombine.high %v1654_v41, %v1654_v41  ;;  %v3571_v30 = vsel %vm3486_vm10, %v1654_v41, %v3185_v56  ;;  %v1671_v33 = vcombine.high %v1661_v18, %v1661_v18  ;;  %v3568_v46 = vsel %vm3486_vm10, %v1661_v18, %v3173_v10 }
 0x1ef   : > { %v1672_v14 = vcombine.high %v1668_v1, %v1668_v1  ;;  %v3572_v17 = vsel %vm3486_vm10, %v1668_v1, %v3189_v19  ;;  %v3569_v7 = vsel %vm3486_vm10, %v1669_v11, %v9653_v47  ;;  %v7364_v21 = vcombine.low %v3567_v28, %v3568_v46 }
 0x1f0   : > { %v3573_v61 = vsel %vm3486_vm10, %v1670_v0, %v9665_v49  ;;  %v7381_v56 = vcombine.low %v3571_v30, %v3572_v17  ;;  %v3570_v48 = vsel %vm3486_vm10, %v1671_v33, %v9656_v24  ;;  %v2518_v10 = vcombine.high %v2510_v39, %v2510_v39 }
 0x1f1   : > { %v3574_v51 = vsel %vm3486_vm10, %v1672_v14, %v9680_v44  ;;  %v2519_v53 = vcombine.high %v2517_v26, %v2517_v26  ;;  %v7365_v31 = vcombine.low %v3569_v7, %v3570_v48  ;;  %v7372_v20 = vrot.slane %v7364_v21, %v8960_v55  ;;  %v8161_v14 = vpop.f32.mrf.mxu1 }
 0x1f2   : > { %v7382_v19 = vcombine.low %v3573_v61, %v3574_v51  ;;  %v7389_v23 = vrot.slane %v7381_v56, %v8960_v55  ;;  %v9805_v47 = vrot.slane %v2510_v39, %v8947_v63  ;;  %v9808_v49 = vrot.slane %v2517_v26, %v8947_v63 }
 0x1f3   : > { %v9811_v25 = vrot.slane %v2518_v10, %v8947_v63  ;;  %v9814_v24 = vrot.slane %v2519_v53, %v8947_v63  ;;  %v7379_v44 = vrot.slane %v7365_v31, %v8960_v55  ;;  %v1533_v57 = vrot.slane %v9683_v52, %v8947_v63 }
 0x1f4   : > { %v7396_v50 = vrot.slane %v7382_v19, %v8960_v55  ;;  %v9823_v41 = vrot.slane %v2649_v16, %v8952_v34  ;;  %v2548_v18 = vcombine.high %v9805_v47, %v9805_v47  ;;  %v2549_v1 = vcombine.high %v9808_v49, %v9808_v49 }
 0x1f5   : > { %v2550_v39 = vcombine.high %v9811_v25, %v9811_v25  ;;  %v7380_v26 = vcombine.low %v7372_v20, %v7379_v44  ;;  %v2551_v0 = vcombine.high %v9814_v24, %v9814_v24  ;;  %v3137_v52 = vrot.slane %v9805_v47, %v8952_v34 }
 0x1f6   : > { %v7397_v11 = vcombine.low %v7389_v23, %v7396_v50  ;;  %v3141_v16 = vrot.slane %v9811_v25, %v8952_v34  ;;  %v9838_v28 = vrot.slane %v2548_v18, %v8952_v34  ;;  %v3153_v33 = vrot.slane %v9808_v49, %v8952_v34 }
 0x1f7   : > { %v9841_v30 = vrot.slane %v2550_v39, %v8952_v34  ;;  %7876 = vst.msk [vmem:[%s9188_s24 + $0x140] sm:$0xff] %vm596_vm7, %v7380_v26  ;;  %v3157_v46 = vrot.slane %v9814_v24, %v8952_v34  ;;  %v9852_v17 = vrot.slane %v2549_v1, %v8952_v34  ;;  %v1540_v7 = vrot.slane %v1526_v9, %v8947_v63 }
 0x1f8   : > { %7877 = vst.msk [vmem:[%s9188_s24 + $0x148] sm:$0xff] %vm596_vm7, %v7397_v11  ;;  %v1541_v61 = vcombine.high %v1533_v57, %v1533_v57  ;;  %v1549_v21 = vrot.slane %v1533_v57, %v8947_v63  ;;  %v1673_v56 = vcombine.high %v9694_v54, %v9694_v54  ;;  %v1680_v48 = vrot.slane %v9694_v54, %v8947_v63 }
 0x1f9   : > { %v9861_v51 = vmax.f32 %v9686_v32, 0.0  ;;  %v1542_v10 = vcombine.high %v1540_v7, %v1540_v7  ;;  %v1556_v53 = vrot.slane %v1540_v7, %v8947_v63  ;;  %v1096_v20 = vadd.f32 %v9670_v13, %v8161_v14 }
 0x1fa   : > { %v1563_v31 = vrot.slane %v1541_v61, %v8947_v63  ;;  %v1571_v19 = vcombine.high %v1549_v21, %v1549_v21  ;;  %v3551_v23 = vsel %vm3486_vm10, %v1549_v21, %v3105_v58  ;;  %v1687_v44 = vrot.slane %v1673_v56, %v8947_v63 }
 0x1fb   : > { %v1688_v50 = vcombine.high %v1680_v48, %v1680_v48  ;;  %v1570_v54 = vrot.slane %v1542_v10, %v8947_v63  ;;  %v1572_v32 = vcombine.high %v1556_v53, %v1556_v53  ;;  %v3555_v35 = vsel %vm3486_vm10, %v1556_v53, %v3121_v45 }
 0x1fc   : > { %v1573_v9 = vcombine.high %v1563_v31, %v1563_v31  ;;  %v3552_v57 = vsel %vm3486_vm10, %v1563_v31, %v3109_v2  ;;  %v3553_v18 = vsel %vm3486_vm10, %v1571_v19, %v9720_v27  ;;  %v1689_v1 = vcombine.high %v1687_v44, %v1687_v44 }
 0x1fd   : > { %v7228_v58 = vcombine.low %v3551_v23, %v3552_v57  ;;  %v1574_v39 = vcombine.high %v1570_v54, %v1570_v54  ;;  %v3556_v15 = vsel %vm3486_vm10, %v1570_v54, %v3125_v22  ;;  %v3557_v2 = vsel %vm3486_vm10, %v1572_v32, %v9745_v42 }
 0x1fe   : > { %v3554_v26 = vsel %vm3486_vm10, %v1573_v9, %v9728_v12  ;;  %v7245_v6 = vcombine.low %v3555_v35, %v3556_v15  ;;  %v1696_v45 = vrot.slane %v1680_v48, %v8947_v63  ;;  %v1703_v7 = vrot.slane %v1687_v44, %v8947_v63  ;;  %v1087_v9 = vpop.f32.mrf.mxu1 }
 0x1ff   : > { %v7229_v27 = vcombine.low %v3553_v18, %v3554_v26  ;;  %v7236_v11 = vrot.slane %v7228_v58, %v8960_v55  ;;  %v3558_v14 = vsel %vm3486_vm10, %v1574_v39, %v9748_v62  ;;  %v1710_v12 = vrot.slane %v1688_v50, %v8947_v63 }
 0x200   : > { %v1717_v40 = vrot.slane %v1689_v1, %v8947_v63  ;;  %v7246_v61 = vcombine.low %v3557_v2, %v3558_v14  ;;  %v7253_v42 = vrot.slane %v7245_v6, %v8960_v55  ;;  %v1718_v21 = vcombine.high %v1696_v45, %v1696_v45  ;;  %v8162_v14 = vpop.f32.mrf.mxu1 }
 0x201   : > { %v7243_v22 = vrot.slane %v7229_v27, %v8960_v55  ;;  %v1719_v56 = vcombine.high %v1703_v7, %v1703_v7  ;;  %v1720_v10 = vcombine.high %v1710_v12, %v1710_v12  ;;  %v3575_v62 = vsel %vm3486_vm10, %v1696_v45, %v3201_v3 }
 0x202   : > { %v1721_v53 = vcombine.high %v1717_v40, %v1717_v40  ;;  %v7260_v31 = vrot.slane %v7246_v61, %v8960_v55  ;;  %v3576_v19 = vsel %vm3486_vm10, %v1710_v12, %v3205_v5  ;;  %v3577_v23 = vsel %vm3486_vm10, %v1718_v21, %v9762_v8  ;;  %v8143_v21 = vpop.f32.mrf.mxu0 }
 0x203   : > { %v7244_v48 = vcombine.low %v7236_v11, %v7243_v22  ;;  %v3578_v44 = vsel %vm3486_vm10, %v1720_v10, %v9767_v43  ;;  %v3579_v4 = vsel %vm3486_vm10, %v1703_v7, %v3217_v29  ;;  %v3580_v3 = vsel %vm3486_vm10, %v1717_v40, %v3221_v36 }
 0x204   : > { %v3581_v60 = vsel %vm3486_vm10, %v1719_v56, %v9770_v38  ;;  %v7261_v5 = vcombine.low %v7253_v42, %v7260_v31  ;;  %v3582_v8 = vsel %vm3486_vm10, %v1721_v53, %v9823_v41  ;;  %v7398_v43 = vcombine.low %v3575_v62, %v3576_v19  ;;  %v1090_v31 = vpop.f32.mrf.mxu1 }
 0x205   : > { %7868 = vst.msk [vmem:[%s9188_s24 + $0x100] sm:$0xff] %vm596_vm7, %v7244_v48  ;;  %v7399_v50 = vcombine.low %v3577_v23, %v3578_v44  ;;  %v7415_v54 = vcombine.low %v3579_v4, %v3580_v3  ;;  %v7416_v59 = vcombine.low %v3581_v60, %v3582_v8  ;;  %v1575_v29 = vcombine.high %v9861_v51, %v9861_v51  ;;  %v743_v44 = vpop.f32.mrf.mxu0 }
 0x206   : > { %v1582_v37 = vrot.slane %v9861_v51, %v8947_v63  ;;  %v3165_v36 = vrot.slane %v2551_v0, %v8952_v34  ;;  %7869 = vst.msk [vmem:[%s9188_s24 + $0x108] sm:$0xff] %vm596_vm7, %v7261_v5  ;;  %v7406_v38 = vrot.slane %v7398_v43, %v8960_v55  ;;  %v1116_v32 = vmax.f32 %v1096_v20, 0.0 }
 0x207   : > { %v7413_v41 = vrot.slane %v7399_v50, %v8960_v55  ;;  %v7423_v57 = vrot.slane %v7415_v54, %v8960_v55  ;;  %v7430_v18 = vrot.slane %v7416_v59, %v8960_v55  ;;  %v1589_v51 = vrot.slane %v1575_v29, %v8947_v63  ;;  %v8185_v59 = vpop.f32.mrf.mxu1 }
 0x208   : > { %v1590_v35 = vcombine.high %v1582_v37, %v1582_v37  ;;  %v1598_v0 = vrot.slane %v1582_v37, %v8947_v63  ;;  %v2748_v1 = vcombine.high %v1116_v32, %v1116_v32  ;;  %v2755_v39 = vrot.slane %v1116_v32, %v8947_v63 }
 0x209   : > { %v7414_v58 = vcombine.low %v7406_v38, %v7413_v41  ;;  %v7431_v26 = vcombine.low %v7423_v57, %v7430_v18  ;;  %v1591_v15 = vcombine.high %v1589_v51, %v1589_v51  ;;  %v1605_v2 = vrot.slane %v1589_v51, %v8947_v63  ;;  %v8144_v18 = vpop.f32.mrf.mxu0 }
 0x20a   : > { %v1612_v20 = vrot.slane %v1590_v35, %v8947_v63  ;;  %v1620_v27 = vcombine.high %v1598_v0, %v1598_v0  ;;  %v3559_v11 = vsel %vm3486_vm10, %v1598_v0, %v3137_v52  ;;  %v2762_v6 = vrot.slane %v2748_v1, %v8947_v63 }
 0x20b   : > { %7878 = vst.msk [vmem:[%s9188_s24 + $0x150] sm:$0xff] %vm596_vm7, %v7414_v58  ;;  %v2763_v45 = vcombine.high %v2755_v39, %v2755_v39  ;;  %7879 = vst.msk [vmem:[%s9188_s24 + $0x158] sm:$0xff] %vm596_vm7, %v7431_v26  ;;  %v1619_v7 = vrot.slane %v1591_v15, %v8947_v63  ;;  %v1621_v12 = vcombine.high %v1605_v2, %v1605_v2 }
 0x20c   : > { %v1622_v40 = vcombine.high %v1612_v20, %v1612_v20  ;;  %v3560_v22 = vsel %vm3486_vm10, %v1612_v20, %v3141_v16  ;;  %v3561_v47 = vsel %vm3486_vm10, %v1620_v27, %v9838_v28  ;;  %v2764_v52 = vcombine.high %v2762_v6, %v2762_v6 }
 0x20d   : > { %v7262_v61 = vcombine.low %v3559_v11, %v3560_v22  ;;  %v1088_v42 = vadd.f32 %v9670_v13, %v1087_v9  ;;  %v1623_v56 = vcombine.high %v1619_v7, %v1619_v7  ;;  %v3563_v53 = vsel %vm3486_vm10, %v1605_v2, %v3153_v33 }
 0x20e   : > { %v3562_v10 = vsel %vm3486_vm10, %v1622_v40, %v9841_v30  ;;  %v3564_v25 = vsel %vm3486_vm10, %v1619_v7, %v3157_v46  ;;  %v3565_v16 = vsel %vm3486_vm10, %v1621_v12, %v9852_v17  ;;  %v9975_v48 = vrot.slane %v2755_v39, %v8947_v63 }
 0x20f   : > { %v7263_v28 = vcombine.low %v3561_v47, %v3562_v10  ;;  %v7279_v62 = vcombine.low %v3563_v53, %v3564_v25  ;;  %v3566_v30 = vsel %vm3486_vm10, %v1623_v56, %v3165_v36  ;;  %v9979_v49 = vrot.slane %v2762_v6, %v8947_v63 }
 0x210   : > { %v9982_v33 = vrot.slane %v2763_v45, %v8947_v63  ;;  %v9985_v24 = vrot.slane %v2764_v52, %v8947_v63  ;;  %v7270_v46 = vrot.slane %v7262_v61, %v8960_v55  ;;  %v7280_v19 = vcombine.low %v3565_v16, %v3566_v30 }
 0x211   : > { %v7277_v17 = vrot.slane %v7263_v28, %v8960_v55  ;;  %v2793_v23 = vcombine.high %v9975_v48, %v9975_v48  ;;  %v7287_v4 = vrot.slane %v7279_v62, %v8960_v55  ;;  %v2794_v3 = vcombine.high %v9979_v49, %v9979_v49 }
 0x212   : > { %v2795_v60 = vcombine.high %v9982_v33, %v9982_v33  ;;  %v2796_v5 = vcombine.high %v9985_v24, %v9985_v24  ;;  %v7294_v43 = vrot.slane %v7280_v19, %v8960_v55  ;;  %v3297_v50 = vrot.slane %v9975_v48, %v8952_v34 }
 0x213   : > { %v7278_v8 = vcombine.low %v7270_v46, %v7277_v17  ;;  %v3301_v54 = vrot.slane %v9982_v33, %v8952_v34  ;;  %v10004_v29 = vrot.slane %v2793_v23, %v8952_v34  ;;  %v3313_v36 = vrot.slane %v9979_v49, %v8952_v34 }
 0x214   : > { %v10007_v37 = vrot.slane %v2795_v60, %v8952_v34  ;;  %v3317_v38 = vrot.slane %v9985_v24, %v8952_v34  ;;  %v7295_v41 = vcombine.low %v7287_v4, %v7294_v43  ;;  %v10016_v32 = vrot.slane %v2794_v3, %v8952_v34 }
 0x215   : > { %7870 = vst.msk [vmem:[%s9188_s24 + $0x110] sm:$0xff] %vm596_vm7, %v7278_v8  ;;  %v1114_v9 = vmax.f32 %v1088_v42, 0.0  ;;  %v1099_v57 = vadd.f32 %v9670_v13, %v8162_v14  ;;  %v752_v51 = vadd.f32 %v9670_v13, %v8143_v21  ;;  %v1091_v35 = vadd.f32 %v9670_v13, %v1090_v31 }
 0x216   : > { %v744_v58 = vadd.f32 %v9670_v13, %v743_v44  ;;  %v3862_v0 = vadd.f32 %v9670_v13, %v8185_v59  ;;  %7871 = vst.msk [vmem:[%s9188_s24 + $0x118] sm:$0xff] %vm596_vm7, %v7295_v41  ;;  %v10026_v1 = vrot.slane %v2796_v5, %v8952_v34  ;;  %v10032_v11 = vadd.f32 %v9670_v13, %v8144_v18 }
 0x217   : > { %v2650_v39 = vcombine.high %v1114_v9, %v1114_v9  ;;  %v2657_v26 = vrot.slane %v1114_v9, %v8947_v63  ;;  %v1117_v15 = vmax.f32 %v1099_v57, 0.0  ;;  %v772_v2 = vmax.f32 %v752_v51, 0.0 }
 0x218   : > { %v1115_v20 = vmax.f32 %v1091_v35, 0.0  ;;  %v10029_v27 = vmax.f32 %v744_v58, 0.0  ;;  %v10040_v47 = vmax.f32 %v3862_v0, 0.0 }
 0x219   : > { %v2664_v6 = vrot.slane %v2650_v39, %v8947_v63  ;;  %v2665_v45 = vcombine.high %v2657_v26, %v2657_v26  ;;  %v10036_v14 = vrot.slane %v2657_v26, %v8947_v63  ;;  %v2797_v7 = vcombine.high %v1117_v15, %v1117_v15 }
 0x21a   : > { %v2804_v12 = vrot.slane %v1117_v15, %v8947_v63  ;;  %v1820_v40 = vcombine.high %v772_v2, %v772_v2  ;;  %v1827_v22 = vrot.slane %v772_v2, %v8947_v63  ;;  %v2699_v25 = vcombine.high %v1115_v20, %v1115_v20 }
 0x21b   : > { %v2666_v61 = vcombine.high %v2664_v6, %v2664_v6  ;;  %v10043_v52 = vrot.slane %v2664_v6, %v8947_v63  ;;  %v10046_v42 = vrot.slane %v2665_v45, %v8947_v63  ;;  %v2695_v21 = vcombine.high %v10036_v14, %v10036_v14 }
 0x21c   : > { %v2811_v56 = vrot.slane %v2797_v7, %v8947_v63  ;;  %v2812_v10 = vcombine.high %v2804_v12, %v2804_v12  ;;  %v10052_v53 = vrot.slane %v2804_v12, %v8947_v63  ;;  %v3233_v31 = vrot.slane %v10036_v14, %v8952_v34 }
 0x21d   : > { %v10055_v16 = vrot.slane %v2666_v61, %v8947_v63  ;;  %v2696_v28 = vcombine.high %v10043_v52, %v10043_v52  ;;  %v2697_v62 = vcombine.high %v10046_v42, %v10046_v42  ;;  %v3237_v30 = vrot.slane %v10046_v42, %v8952_v34 }
 0x21e   : > { %v10066_v46 = vrot.slane %v2695_v21, %v8952_v34  ;;  %v2813_v17 = vcombine.high %v2811_v56, %v2811_v56  ;;  %v10069_v19 = vrot.slane %v2811_v56, %v8947_v63  ;;  %v3249_v4 = vrot.slane %v10043_v52, %v8952_v34 }
 0x21f   : > { %v2698_v23 = vcombine.high %v10055_v16, %v10055_v16  ;;  %v10074_v44 = vrot.slane %v2697_v62, %v8952_v34  ;;  %v3253_v3 = vrot.slane %v10055_v16, %v8952_v34  ;;  %v10081_v60 = vrot.slane %v2812_v10, %v8947_v63 }
 0x220   : > { %v10084_v5 = vrot.slane %v2813_v17, %v8947_v63  ;;  %v2842_v8 = vcombine.high %v10052_v53, %v10052_v53  ;;  %v2843_v43 = vcombine.high %v10069_v19, %v10069_v19  ;;  %v10091_v59 = vrot.slane %v2696_v28, %v8952_v34 }
 0x221   : > { %v10094_v41 = vrot.slane %v2698_v23, %v8952_v34  ;;  %v3329_v9 = vrot.slane %v10052_v53, %v8952_v34  ;;  %v1834_v57 = vrot.slane %v1820_v40, %v8947_v63  ;;  %v2844_v18 = vcombine.high %v10081_v60, %v10081_v60 }
 0x222   : > { %v2845_v51 = vcombine.high %v10084_v5, %v10084_v5  ;;  %v3333_v35 = vrot.slane %v10081_v60, %v8952_v34  ;;  %v3345_v58 = vrot.slane %v10069_v19, %v8952_v34  ;;  %v10108_v0 = vrot.slane %v2842_v8, %v8952_v34 }
 0x223   : > { %v3349_v39 = vrot.slane %v10084_v5, %v8952_v34  ;;  %v1835_v26 = vcombine.high %v1827_v22, %v1827_v22  ;;  %v1836_v15 = vcombine.high %v1834_v57, %v1834_v57  ;;  %v10113_v2 = vrot.slane %v2844_v18, %v8952_v34 }
 0x224   : > { %v10116_v6 = vrot.slane %v2843_v43, %v8952_v34  ;;  %v1843_v45 = vrot.slane %v1827_v22, %v8947_v63  ;;  %v1850_v7 = vrot.slane %v1834_v57, %v8947_v63  ;;  %v2706_v61 = vrot.slane %v1115_v20, %v8947_v63 }
 0x225   : > { %v1857_v12 = vrot.slane %v1835_v26, %v8947_v63  ;;  %v1864_v40 = vrot.slane %v1836_v15, %v8947_v63  ;;  %v2713_v21 = vrot.slane %v2699_v25, %v8947_v63  ;;  %v1722_v15 = vcombine.high %v10029_v27, %v10029_v27 }
 0x226   : > { %v1865_v56 = vcombine.high %v1843_v45, %v1843_v45  ;;  %v1866_v10 = vcombine.high %v1850_v7, %v1850_v7  ;;  %v3599_v28 = vsel %vm3486_vm10, %v1843_v45, %v3297_v50  ;;  %v3603_v22 = vsel %vm3486_vm10, %v1850_v7, %v3313_v36 }
 0x227   : > { %v1867_v62 = vcombine.high %v1857_v12, %v1857_v12  ;;  %v1868_v17 = vcombine.high %v1864_v40, %v1864_v40  ;;  %v3600_v20 = vsel %vm3486_vm10, %v1857_v12, %v3301_v54  ;;  %v3604_v25 = vsel %vm3486_vm10, %v1864_v40, %v3317_v38 }
 0x228   : > { %v3601_v48 = vsel %vm3486_vm10, %v1865_v56, %v10004_v29  ;;  %v3605_v49 = vsel %vm3486_vm10, %v1866_v10, %v10016_v32  ;;  %v7636_v50 = vcombine.low %v3599_v28, %v3600_v20  ;;  %v7653_v36 = vcombine.low %v3603_v22, %v3604_v25 }
 0x229   : > { %v3602_v23 = vsel %vm3486_vm10, %v1867_v62, %v10007_v37  ;;  %v3606_v33 = vsel %vm3486_vm10, %v1868_v17, %v10026_v1  ;;  %v2714_v54 = vcombine.high %v2706_v61, %v2706_v61  ;;  %v2715_v8 = vcombine.high %v2713_v21, %v2713_v21 }
 0x22a   : > { %v7637_v43 = vcombine.low %v3601_v48, %v3602_v23  ;;  %v7644_v24 = vrot.slane %v7636_v50, %v8960_v55  ;;  %v7654_v38 = vcombine.low %v3605_v49, %v3606_v33  ;;  %v7661_v57 = vrot.slane %v7653_v36, %v8960_v55 }
 0x22b   : > { %v10151_v29 = vrot.slane %v2706_v61, %v8947_v63  ;;  %v10154_v32 = vrot.slane %v2713_v21, %v8947_v63  ;;  %v10157_v18 = vrot.slane %v2714_v54, %v8947_v63  ;;  %v10160_v37 = vrot.slane %v2715_v8, %v8947_v63 }
 0x22c   : > { %v7651_v1 = vrot.slane %v7637_v43, %v8960_v55  ;;  %v7668_v26 = vrot.slane %v7654_v38, %v8960_v55  ;;  %v1729_v45 = vrot.slane %v10029_v27, %v8947_v63  ;;  %v10177_v21 = vrot.slane %v2845_v51, %v8952_v34 }
 0x22d   : > { %v2744_v7 = vcombine.high %v10151_v29, %v10151_v29  ;;  %v2745_v12 = vcombine.high %v10154_v32, %v10154_v32  ;;  %v2746_v40 = vcombine.high %v10157_v18, %v10157_v18  ;;  %v2747_v61 = vcombine.high %v10160_v37, %v10160_v37 }
 0x22e   : > { %v7652_v56 = vcombine.low %v7644_v24, %v7651_v1  ;;  %v7669_v10 = vcombine.low %v7661_v57, %v7668_v26  ;;  %v3265_v27 = vrot.slane %v10151_v29, %v8952_v34  ;;  %v3269_v28 = vrot.slane %v10157_v18, %v8952_v34  ;;  %v3853_v24 = vpop.f32.mrf.mxu1 }
 0x22f   : > { %v10184_v22 = vrot.slane %v2744_v7, %v8952_v34  ;;  %v10187_v62 = vrot.slane %v2746_v40, %v8952_v34  ;;  %v3281_v17 = vrot.slane %v10154_v32, %v8952_v34  ;;  %v3285_v51 = vrot.slane %v10160_v37, %v8952_v34 }
 0x230   : > { %7892 = vst.msk [vmem:[%s9188_s24 + $0x1c0] sm:$0xff] %vm596_vm7, %v7652_v56  ;;  %7893 = vst.msk [vmem:[%s9188_s24 + $0x1c8] sm:$0xff] %vm596_vm7, %v7669_v10  ;;  %v10198_v20 = vrot.slane %v2745_v12, %v8952_v34  ;;  %v1736_v25 = vrot.slane %v1722_v15, %v8947_v63  ;;  %v1737_v48 = vcombine.high %v1729_v45, %v1729_v45  ;;  %v773_v43 = vmax.f32 %v10032_v11, 0.0 }
 0x231   : > { %v10202_v49 = vrot.slane %v2747_v61, %v8952_v34  ;;  %v1745_v50 = vrot.slane %v1729_v45, %v8947_v63  ;;  %v4974_v36 = vcombine.high %v10040_v47, %v10040_v47  ;;  %v4981_v23 = vrot.slane %v10040_v47, %v8947_v63 }
 0x232   : > { %v1738_v33 = vcombine.high %v1736_v25, %v1736_v25  ;;  %v1752_v54 = vrot.slane %v1736_v25, %v8947_v63  ;;  %v1759_v8 = vrot.slane %v1737_v48, %v8947_v63  ;;  %v3854_v14 = vadd.f32 %v9670_v13, %v3853_v24 }
 0x233   : > { %v1767_v38 = vcombine.high %v1745_v50, %v1745_v50  ;;  %v3583_v57 = vsel %vm3486_vm10, %v1745_v50, %v3233_v31  ;;  %v4988_v1 = vrot.slane %v4974_v36, %v8947_v63  ;;  %v4989_v26 = vcombine.high %v4981_v23, %v4981_v23 }
 0x234   : > { %v1766_v15 = vrot.slane %v1738_v33, %v8947_v63  ;;  %v1768_v47 = vcombine.high %v1752_v54, %v1752_v54  ;;  %v1769_v45 = vcombine.high %v1759_v8, %v1759_v8  ;;  %v3584_v7 = vsel %vm3486_vm10, %v1759_v8, %v3237_v30 }
 0x235   : > { %v3585_v11 = vsel %vm3486_vm10, %v1767_v38, %v10066_v46  ;;  %v7500_v12 = vcombine.low %v3583_v57, %v3584_v7  ;;  %v4990_v40 = vcombine.high %v4988_v1, %v4988_v1  ;;  %v3587_v56 = vsel %vm3486_vm10, %v1752_v54, %v3249_v4 }
 0x236   : > { %v1770_v31 = vcombine.high %v1766_v15, %v1766_v15  ;;  %v3586_v61 = vsel %vm3486_vm10, %v1769_v45, %v10074_v44  ;;  %v3588_v42 = vsel %vm3486_vm10, %v1766_v15, %v3253_v3  ;;  %v3589_v30 = vsel %vm3486_vm10, %v1768_v47, %v10091_v59  ;;  %v746_v3 = vpop.f32.mrf.mxu0 }
 0x237   : > { %v7501_v46 = vcombine.low %v3585_v11, %v3586_v61  ;;  %v7517_v10 = vcombine.low %v3587_v56, %v3588_v42  ;;  %v10238_v25 = vrot.slane %v4981_v23, %v8947_v63  ;;  %v10243_v52 = vrot.slane %v4988_v1, %v8947_v63 }
 0x238   : > { %v3590_v44 = vsel %vm3486_vm10, %v1770_v31, %v10094_v41  ;;  %v10246_v4 = vrot.slane %v4989_v26, %v8947_v63  ;;  %v10249_v16 = vrot.slane %v4990_v40, %v8947_v63  ;;  %v7508_v59 = vrot.slane %v7500_v12, %v8960_v55  ;;  %v8186_v41 = vpop.f32.mrf.mxu1  ;;  %v8167_v7 = vpop.f32.mrf.mxu0 }
 0x239   : > { %v7515_v48 = vrot.slane %v7501_v46, %v8960_v55  ;;  %v7518_v50 = vcombine.low %v3589_v30, %v3590_v44  ;;  %v5019_v36 = vcombine.high %v10238_v25, %v10238_v25  ;;  %v7525_v23 = vrot.slane %v7517_v10, %v8960_v55 }
 0x23a   : > { %v5020_v33 = vcombine.high %v10243_v52, %v10243_v52  ;;  %v5021_v54 = vcombine.high %v10246_v4, %v10246_v4  ;;  %v5022_v8 = vcombine.high %v10249_v16, %v10249_v16  ;;  %v5727_v57 = vrot.slane %v10238_v25, %v8952_v34  ;;  %v3856_v61 = vpop.f32.mrf.mxu1 }
 0x23b   : > { %v7516_v24 = vcombine.low %v7508_v59, %v7515_v48  ;;  %v7532_v38 = vrot.slane %v7518_v50, %v8960_v55  ;;  %v5731_v1 = vrot.slane %v10246_v4, %v8952_v34  ;;  %v10268_v26 = vrot.slane %v5019_v36, %v8952_v34 }
 0x23c   : > { %v10271_v15 = vrot.slane %v5021_v54, %v8952_v34  ;;  %v5743_v47 = vrot.slane %v10243_v52, %v8952_v34  ;;  %v5747_v45 = vrot.slane %v10249_v16, %v8952_v34  ;;  %v10280_v12 = vrot.slane %v5020_v33, %v8952_v34 }
 0x23d   : > { %v7533_v11 = vcombine.low %v7525_v23, %v7532_v38  ;;  %7884 = vst.msk [vmem:[%s9188_s24 + $0x180] sm:$0xff] %vm596_vm7, %v7516_v24  ;;  %v1869_v40 = vcombine.high %v773_v43, %v773_v43  ;;  %v1876_v31 = vrot.slane %v773_v43, %v8947_v63  ;;  %v10284_v56 = vrot.slane %v5022_v8, %v8952_v34 }
 0x23e   : > { %v3916_v42 = vmax.f32 %v3854_v14, 0.0  ;;  %v747_v30 = vadd.f32 %v9670_v13, %v746_v3  ;;  %v3865_v46 = vadd.f32 %v9670_v13, %v8186_v41  ;;  %v3714_v48 = vadd.f32 %v9670_v13, %v8167_v7 }
 0x23f   : > { %7885 = vst.msk [vmem:[%s9188_s24 + $0x188] sm:$0xff] %vm596_vm7, %v7533_v11  ;;  %v1883_v10 = vrot.slane %v1869_v40, %v8947_v63  ;;  %v1884_v44 = vcombine.high %v1876_v31, %v1876_v31  ;;  %v1892_v59 = vrot.slane %v1876_v31, %v8947_v63  ;;  %v3857_v23 = vadd.f32 %v9670_v13, %v3856_v61 }
 0x240   : > { %v4876_v50 = vcombine.high %v3916_v42, %v3916_v42  ;;  %v4883_v43 = vrot.slane %v3916_v42, %v8947_v63  ;;  %v771_v36 = vmax.f32 %v747_v30, 0.0  ;;  %v3919_v42 = vmax.f32 %v3865_v46, 0.0 }
 0x241   : > { %v1885_v14 = vcombine.high %v1883_v10, %v1883_v10  ;;  %v1899_v3 = vrot.slane %v1883_v10, %v8947_v63  ;;  %v1906_v41 = vrot.slane %v1884_v44, %v8947_v63  ;;  %v1914_v33 = vcombine.high %v1892_v59, %v1892_v59 }
 0x242   : > { %v3607_v54 = vsel %vm3486_vm10, %v1892_v59, %v3329_v9  ;;  %v4890_v8 = vrot.slane %v4876_v50, %v8947_v63  ;;  %v4891_v24 = vcombine.high %v4883_v43, %v4883_v43  ;;  %v10303_v38 = vrot.slane %v4883_v43, %v8947_v63 }
 0x243   : > { %v1913_v7 = vrot.slane %v1885_v14, %v8947_v63  ;;  %v1915_v11 = vcombine.high %v1899_v3, %v1899_v3  ;;  %v1916_v40 = vcombine.high %v1906_v41, %v1906_v41  ;;  %v3608_v31 = vsel %vm3486_vm10, %v1906_v41, %v3333_v35 }
 0x244   : > { %v3609_v53 = vsel %vm3486_vm10, %v1914_v33, %v10108_v0  ;;  %v7670_v61 = vcombine.low %v3607_v54, %v3608_v31  ;;  %v4892_v9 = vcombine.high %v4890_v8, %v4890_v8  ;;  %v3611_v44 = vsel %vm3486_vm10, %v1899_v3, %v3345_v58 }
 0x245   : > { %v1917_v30 = vcombine.high %v1913_v7, %v1913_v7  ;;  %v3610_v10 = vsel %vm3486_vm10, %v1916_v40, %v10113_v2  ;;  %v3612_v60 = vsel %vm3486_vm10, %v1913_v7, %v3349_v39  ;;  %v3613_v35 = vsel %vm3486_vm10, %v1915_v11, %v10116_v6 }
 0x246   : > { %v7671_v0 = vcombine.low %v3609_v53, %v3610_v10  ;;  %v7687_v59 = vcombine.low %v3611_v44, %v3612_v60  ;;  %v10325_v46 = vrot.slane %v4890_v8, %v8947_v63  ;;  %v10330_v19 = vrot.slane %v4891_v24, %v8947_v63  ;;  %v3705_v10 = vpop.f32.mrf.mxu0 }
 0x247   : > { %v3614_v2 = vsel %vm3486_vm10, %v1917_v30, %v10177_v21  ;;  %v10333_v58 = vrot.slane %v4892_v9, %v8947_v63  ;;  %v4921_v5 = vcombine.high %v10303_v38, %v10303_v38  ;;  %v7678_v39 = vrot.slane %v7670_v61, %v8960_v55 }
 0x248   : > { %v7685_v6 = vrot.slane %v7671_v0, %v8960_v55  ;;  %v7688_v50 = vcombine.low %v3613_v35, %v3614_v2  ;;  %v4922_v43 = vcombine.high %v10325_v46, %v10325_v46  ;;  %v7695_v21 = vrot.slane %v7687_v59, %v8960_v55 }
 0x249   : > { %v4923_v14 = vcombine.high %v10330_v19, %v10330_v19  ;;  %v4924_v3 = vcombine.high %v10333_v58, %v10333_v58  ;;  %v5663_v41 = vrot.slane %v10303_v38, %v8952_v34  ;;  %v5667_v8 = vrot.slane %v10330_v19, %v8952_v34 }
 0x24a   : > { %v7686_v33 = vcombine.low %v7678_v39, %v7685_v6  ;;  %v7702_v54 = vrot.slane %v7688_v50, %v8960_v55  ;;  %v10352_v24 = vrot.slane %v4921_v5, %v8952_v34  ;;  %v5679_v11 = vrot.slane %v10325_v46, %v8952_v34 }
 0x24b   : > { %v10355_v7 = vrot.slane %v4923_v14, %v8952_v34  ;;  %v5683_v40 = vrot.slane %v10333_v58, %v8952_v34  ;;  %v10362_v31 = vrot.slane %v4922_v43, %v8952_v34  ;;  %v1771_v61 = vcombine.high %v771_v36, %v771_v36 }
 0x24c   : > { %v7703_v53 = vcombine.low %v7695_v21, %v7702_v54  ;;  %7894 = vst.msk [vmem:[%s9188_s24 + $0x1d0] sm:$0xff] %vm596_vm7, %v7686_v33  ;;  %v1778_v9 = vrot.slane %v771_v36, %v8947_v63  ;;  %v5023_v30 = vcombine.high %v3919_v42, %v3919_v42  ;;  %v10368_v44 = vrot.slane %v4924_v3, %v8952_v34 }
 0x24d   : > { %v5030_v60 = vrot.slane %v3919_v42, %v8947_v63  ;;  %v3770_v35 = vmax.f32 %v3714_v48, 0.0  ;;  %v10371_v0 = vmax.f32 %v3857_v23, 0.0  ;;  %v1785_v59 = vrot.slane %v1771_v61, %v8947_v63 }
 0x24e   : > { %7895 = vst.msk [vmem:[%s9188_s24 + $0x1d8] sm:$0xff] %vm596_vm7, %v7703_v53  ;;  %v1786_v2 = vcombine.high %v1778_v9, %v1778_v9  ;;  %v1794_v5 = vrot.slane %v1778_v9, %v8947_v63  ;;  %v5037_v39 = vrot.slane %v5023_v30, %v8947_v63  ;;  %v10382_v43 = vadd.f32 %v9670_v13, %v3705_v10 }
 0x24f   : > { %v5038_v36 = vcombine.high %v5030_v60, %v5030_v60  ;;  %v10379_v6 = vrot.slane %v5030_v60, %v8947_v63  ;;  %v4046_v50 = vcombine.high %v3770_v35, %v3770_v35  ;;  %v1787_v48 = vcombine.high %v1785_v59, %v1785_v59 }
 0x250   : > { %v1801_v23 = vrot.slane %v1785_v59, %v8947_v63  ;;  %v1808_v42 = vrot.slane %v1786_v2, %v8947_v63  ;;  %v1816_v21 = vcombine.high %v1794_v5, %v1794_v5  ;;  %v3591_v14 = vsel %vm3486_vm10, %v1794_v5, %v3265_v27 }
 0x251   : > { %v5039_v3 = vcombine.high %v5037_v39, %v5037_v39  ;;  %v10391_v33 = vrot.slane %v5037_v39, %v8947_v63  ;;  %v10394_v54 = vrot.slane %v5038_v36, %v8947_v63  ;;  %v1815_v13 = vrot.slane %v1787_v48, %v8947_v63 }
 0x252   : > { %v1817_v53 = vcombine.high %v1801_v23, %v1801_v23  ;;  %v1818_v61 = vcombine.high %v1808_v42, %v1808_v42  ;;  %v3592_v9 = vsel %vm3486_vm10, %v1808_v42, %v3269_v28  ;;  %v3593_v29 = vsel %vm3486_vm10, %v1816_v21, %v10184_v22 }
 0x253   : > { %v7534_v27 = vcombine.low %v3591_v14, %v3592_v9  ;;  %v10404_v30 = vrot.slane %v5039_v3, %v8947_v63  ;;  %v4053_v10 = vrot.slane %v3770_v35, %v8947_v63  ;;  %v1819_v60 = vcombine.high %v1815_v13, %v1815_v13 }
 0x254   : > { %v3594_v59 = vsel %vm3486_vm10, %v1818_v61, %v10187_v62  ;;  %v3595_v18 = vsel %vm3486_vm10, %v1801_v23, %v3281_v17  ;;  %v3596_v28 = vsel %vm3486_vm10, %v1815_v13, %v3285_v51  ;;  %v3597_v22 = vsel %vm3486_vm10, %v1817_v53, %v10198_v20 }
 0x255   : > { %v7535_v2 = vcombine.low %v3593_v29, %v3594_v59  ;;  %v7551_v5 = vcombine.low %v3595_v18, %v3596_v28  ;;  %v5068_v35 = vcombine.high %v10379_v6, %v10379_v6  ;;  %v3598_v62 = vsel %vm3486_vm10, %v1819_v60, %v10202_v49 }
 0x256   : > { %v7542_v32 = vrot.slane %v7534_v27, %v8960_v55  ;;  %v5069_v17 = vcombine.high %v10391_v33, %v10391_v33  ;;  %v5070_v37 = vcombine.high %v10394_v54, %v10394_v54  ;;  %v7552_v39 = vcombine.low %v3597_v22, %v3598_v62 }
 0x257   : > { %v7549_v51 = vrot.slane %v7535_v2, %v8960_v55  ;;  %v7559_v20 = vrot.slane %v7551_v5, %v8960_v55  ;;  %v5071_v36 = vcombine.high %v10404_v30, %v10404_v30  ;;  %v5759_v49 = vrot.slane %v10379_v6, %v8952_v34 }
 0x258   : > { %v5763_v48 = vrot.slane %v10394_v54, %v8952_v34  ;;  %v10437_v23 = vrot.slane %v5068_v35, %v8952_v34  ;;  %v10440_v42 = vrot.slane %v5070_v37, %v8952_v34  ;;  %v7566_v14 = vrot.slane %v7552_v39, %v8960_v55 }
 0x259   : > { %v7550_v21 = vcombine.low %v7542_v32, %v7549_v51  ;;  %v5775_v3 = vrot.slane %v10391_v33, %v8952_v34  ;;  %v5779_v13 = vrot.slane %v10404_v30, %v8952_v34  ;;  %v10448_v53 = vrot.slane %v5069_v17, %v8952_v34 }
 0x25a   : > { %v4060_v61 = vrot.slane %v4046_v50, %v8947_v63  ;;  %v4061_v9 = vcombine.high %v4053_v10, %v4053_v10  ;;  %v4069_v29 = vrot.slane %v4053_v10, %v8947_v63  ;;  %v7567_v27 = vcombine.low %v7559_v20, %v7566_v14 }
 0x25b   : > { %7886 = vst.msk [vmem:[%s9188_s24 + $0x190] sm:$0xff] %vm596_vm7, %v7550_v21  ;;  %v10455_v60 = vrot.slane %v5071_v36, %v8952_v34  ;;  %v4925_v59 = vcombine.high %v10371_v0, %v10371_v0  ;;  %v4932_v18 = vrot.slane %v10371_v0, %v8947_v63  ;;  %v8189_v0 = vpop.f32.mrf.mxu1  ;;  %v3768_v20 = vmax.f32 %v10382_v43, 0.0 }
 0x25c   : > { %v4062_v28 = vcombine.high %v4060_v61, %v4060_v61  ;;  %v4076_v22 = vrot.slane %v4060_v61, %v8947_v63  ;;  %v4083_v50 = vrot.slane %v4061_v9, %v8947_v63  ;;  %v4091_v2 = vcombine.high %v4069_v29, %v4069_v29  ;;  %7887 = vst.msk [vmem:[%s9188_s24 + $0x198] sm:$0xff] %vm596_vm7, %v7567_v27  ;;  %v8168_v9 = vpop.f32.mrf.mxu0 }
 0x25d   : > { %v6316_v10 = vsel %vm3486_vm10, %v4069_v29, %v5727_v57  ;;  %v4939_v5 = vrot.slane %v4925_v59, %v8947_v63  ;;  %v4940_v35 = vcombine.high %v4932_v18, %v4932_v18  ;;  %v10471_v62 = vrot.slane %v4932_v18, %v8947_v63 }
 0x25e   : > { %v4090_v32 = vrot.slane %v4062_v28, %v8947_v63  ;;  %v4092_v17 = vcombine.high %v4076_v22, %v4076_v22  ;;  %v4093_v37 = vcombine.high %v4083_v50, %v4083_v50  ;;  %v6317_v51 = vsel %vm3486_vm10, %v4083_v50, %v5731_v1 }
 0x25f   : > { %v6318_v25 = vsel %vm3486_vm10, %v4091_v2, %v10268_v26  ;;  %v6888_v57 = vcombine.low %v6316_v10, %v6317_v51  ;;  %v4941_v39 = vcombine.high %v4939_v5, %v4939_v5  ;;  %v6320_v14 = vsel %vm3486_vm10, %v4076_v22, %v5743_v47 }
 0x260   : > { %v4094_v36 = vcombine.high %v4090_v32, %v4090_v32  ;;  %v6319_v21 = vsel %vm3486_vm10, %v4093_v37, %v10271_v15  ;;  %v6321_v4 = vsel %vm3486_vm10, %v4090_v32, %v5747_v45  ;;  %v6322_v1 = vsel %vm3486_vm10, %v4092_v17, %v10280_v12  ;;  %v3869_v15 = vpop.f32.mrf.mxu1 }
 0x261   : > { %v6889_v26 = vcombine.low %v6318_v25, %v6319_v21  ;;  %v6905_v61 = vcombine.low %v6320_v14, %v6321_v4  ;;  %v10494_v43 = vrot.slane %v4939_v5, %v8947_v63  ;;  %v10499_v47 = vrot.slane %v4940_v35, %v8947_v63  ;;  %v3708_v35 = vpop.f32.mrf.mxu0  ;;  %v10539_v21 = vld [vmem:[%s11700_s2] ss:$0 sm:$0xff] }
 0x262   : > { %v6323_v52 = vsel %vm3486_vm10, %v4094_v36, %v10284_v56  ;;  %v10502_v16 = vrot.slane %v4941_v39, %v8947_v63  ;;  %v4970_v45 = vcombine.high %v10471_v62, %v10471_v62  ;;  %v6896_v12 = vrot.slane %v6888_v57, %v8960_v55  ;;  %v8190_v32 = vpop.f32.mrf.mxu1 }
 0x263   : > { %v6903_v29 = vrot.slane %v6889_v26, %v8960_v55  ;;  %v6906_v27 = vcombine.low %v6322_v1, %v6323_v52  ;;  %v4971_v59 = vcombine.high %v10494_v43, %v10494_v43  ;;  %v6913_v56 = vrot.slane %v6905_v61, %v8960_v55 }
 0x264   : > { %v4972_v18 = vcombine.high %v10499_v47, %v10499_v47  ;;  %v4973_v28 = vcombine.high %v10502_v16, %v10502_v16  ;;  %v5695_v22 = vrot.slane %v10471_v62, %v8952_v34  ;;  %v5699_v10 = vrot.slane %v10499_v47, %v8952_v34 }
 0x265   : > { %v6904_v50 = vcombine.low %v6896_v12, %v6903_v29  ;;  %v6920_v2 = vrot.slane %v6906_v27, %v8960_v55  ;;  %v10521_v5 = vrot.slane %v4970_v45, %v8952_v34  ;;  %v5711_v37 = vrot.slane %v10494_v43, %v8952_v34 }
 0x266   : > { %v10524_v17 = vrot.slane %v4972_v18, %v8952_v34  ;;  %v5715_v51 = vrot.slane %v10502_v16, %v8952_v34  ;;  %v10531_v25 = vrot.slane %v4971_v59, %v8952_v34  ;;  %v3948_v39 = vcombine.high %v3768_v20, %v3768_v20 }
 0x267   : > { %v6921_v57 = vcombine.low %v6913_v56, %v6920_v2  ;;  %7848 = vst.msk [vmem:[%s9188_s24 + $0x60] sm:$0xff] %vm596_vm7, %v6904_v50  ;;  %v3955_v36 = vrot.slane %v3768_v20, %v8947_v63  ;;  %v3878_v14 = vadd.f32 %v10539_v21, %v8189_v0  ;;  %v3717_v4 = vadd.f32 %v10539_v21, %v8168_v9 }
 0x268   : > { %v3870_v1 = vadd.f32 %v10539_v21, %v3869_v15  ;;  %v3709_v26 = vadd.f32 %v10539_v21, %v3708_v35  ;;  %v3881_v61 = vadd.f32 %v10539_v21, %v8190_v32  ;;  %v3962_v52 = vrot.slane %v3948_v39, %v8947_v63 }
 0x269   : > { %7849 = vst.msk [vmem:[%s9188_s24 + $0x68] sm:$0xff] %vm596_vm7, %v6921_v57  ;;  %v3963_v20 = vcombine.high %v3955_v36, %v3955_v36  ;;  %v3971_v45 = vrot.slane %v3955_v36, %v8947_v63  ;;  %v3922_v12 = vmax.f32 %v3878_v14, 0.0  ;;  %v10551_v29 = vrot.slane %v4973_v28, %v8952_v34 }
 0x26a   : > { %v3771_v0 = vmax.f32 %v3717_v4, 0.0  ;;  %v10553_v27 = vmax.f32 %v3870_v1, 0.0  ;;  %v10555_v9 = vmax.f32 %v3709_v26, 0.0  ;;  %v3964_v15 = vcombine.high %v3962_v52, %v3962_v52 }
 0x26b   : > { %v3978_v59 = vrot.slane %v3962_v52, %v8947_v63  ;;  %v3985_v56 = vrot.slane %v3963_v20, %v8947_v63  ;;  %v3993_v18 = vcombine.high %v3971_v45, %v3971_v45  ;;  %v6300_v50 = vsel %vm3486_vm10, %v3971_v45, %v5663_v41 }
 0x26c   : > { %v5170_v2 = vcombine.high %v3922_v12, %v3922_v12  ;;  %v5177_v28 = vrot.slane %v3922_v12, %v8947_v63  ;;  %v10564_v35 = vmax.f32 %v3881_v61, 0.0  ;;  %v3992_v32 = vrot.slane %v3964_v15, %v8947_v63 }
 0x26d   : > { %v3994_v57 = vcombine.high %v3978_v59, %v3978_v59  ;;  %v3995_v39 = vcombine.high %v3985_v56, %v3985_v56  ;;  %v6301_v36 = vsel %vm3486_vm10, %v3985_v56, %v5667_v8  ;;  %v6302_v14 = vsel %vm3486_vm10, %v3993_v18, %v10352_v24 }
 0x26e   : > { %v6752_v38 = vcombine.low %v6300_v50, %v6301_v36  ;;  %v5184_v41 = vrot.slane %v5170_v2, %v8947_v63  ;;  %v4095_v4 = vcombine.high %v3771_v0, %v3771_v0  ;;  %v3996_v1 = vcombine.high %v3992_v32, %v3992_v32 }
 0x26f   : > { %v6303_v26 = vsel %vm3486_vm10, %v3995_v39, %v10355_v7  ;;  %v6304_v61 = vsel %vm3486_vm10, %v3978_v59, %v5679_v11  ;;  %v6305_v19 = vsel %vm3486_vm10, %v3992_v32, %v5683_v40  ;;  %v6306_v8 = vsel %vm3486_vm10, %v3994_v57, %v10362_v31 }
 0x270   : > { %v6753_v24 = vcombine.low %v6302_v14, %v6303_v26  ;;  %v6769_v52 = vcombine.low %v6304_v61, %v6305_v19  ;;  %v5185_v20 = vcombine.high %v5177_v28, %v5177_v28  ;;  %v6307_v45 = vsel %vm3486_vm10, %v3996_v1, %v10368_v44 }
 0x271   : > { %v5186_v7 = vcombine.high %v5184_v41, %v5184_v41  ;;  %v10589_v12 = vrot.slane %v5177_v28, %v8947_v63  ;;  %v10592_v46 = vrot.slane %v5184_v41, %v8947_v63  ;;  %v6760_v58 = vrot.slane %v6752_v38, %v8960_v55 }
 0x272   : > { %v6767_v11 = vrot.slane %v6753_v24, %v8960_v55  ;;  %v6770_v40 = vcombine.low %v6306_v8, %v6307_v45  ;;  %v10597_v31 = vrot.slane %v5185_v20, %v8947_v63  ;;  %v6777_v15 = vrot.slane %v6769_v52, %v8960_v55 }
 0x273   : > { %v10601_v44 = vrot.slane %v5186_v7, %v8947_v63  ;;  %v5215_v59 = vcombine.high %v10589_v12, %v10589_v12  ;;  %v5216_v56 = vcombine.high %v10592_v46, %v10592_v46  ;;  %v5855_v28 = vrot.slane %v10589_v12, %v8952_v34 }
 0x274   : > { %v6768_v18 = vcombine.low %v6760_v58, %v6767_v11  ;;  %v6784_v50 = vrot.slane %v6770_v40, %v8960_v55  ;;  %v5217_v2 = vcombine.high %v10597_v31, %v10597_v31  ;;  %v5859_v57 = vrot.slane %v10597_v31, %v8952_v34 }
 0x275   : > { %v5218_v32 = vcombine.high %v10601_v44, %v10601_v44  ;;  %v10617_v39 = vrot.slane %v5215_v59, %v8952_v34  ;;  %v5871_v36 = vrot.slane %v10592_v46, %v8952_v34  ;;  %v5875_v41 = vrot.slane %v10601_v44, %v8952_v34 }
 0x276   : > { %v6785_v14 = vcombine.low %v6777_v15, %v6784_v50  ;;  %7840 = vst.msk [vmem:[%s9188_s24 + $0x20] sm:$0xff] %vm596_vm7, %v6768_v18  ;;  %v10624_v38 = vrot.slane %v5217_v2, %v8952_v34  ;;  %v4102_v1 = vrot.slane %v3771_v0, %v8947_v63  ;;  %v10630_v26 = vrot.slane %v5216_v56, %v8952_v34 }
 0x277   : > { %v4109_v61 = vrot.slane %v4095_v4, %v8947_v63  ;;  %v5072_v19 = vcombine.high %v10553_v27, %v10553_v27  ;;  %v5079_v8 = vrot.slane %v10553_v27, %v8947_v63  ;;  %v10640_v24 = vrot.slane %v5218_v32, %v8952_v34 }
 0x278   : > { %7841 = vst.msk [vmem:[%s9188_s24 + $0x28] sm:$0xff] %vm596_vm7, %v6785_v14  ;;  %v4110_v52 = vcombine.high %v4102_v1, %v4102_v1  ;;  %v4118_v20 = vrot.slane %v4102_v1, %v8947_v63  ;;  %v3997_v0 = vcombine.high %v10555_v9, %v10555_v9  ;;  %v4004_v58 = vrot.slane %v10555_v9, %v8947_v63 }
 0x279   : > { %v4111_v45 = vcombine.high %v4109_v61, %v4109_v61  ;;  %v4125_v4 = vrot.slane %v4109_v61, %v8947_v63  ;;  %v5086_v7 = vrot.slane %v5072_v19, %v8947_v63  ;;  %v5087_v15 = vcombine.high %v5079_v8, %v5079_v8 }
 0x27a   : > { %v4132_v27 = vrot.slane %v4110_v52, %v8947_v63  ;;  %v4140_v11 = vcombine.high %v4118_v20, %v4118_v20  ;;  %v6324_v40 = vsel %vm3486_vm10, %v4118_v20, %v5759_v49  ;;  %v10656_v50 = vrot.slane %v5079_v8, %v8947_v63 }
 0x27b   : > { %v4139_v59 = vrot.slane %v4111_v45, %v8947_v63  ;;  %v4141_v56 = vcombine.high %v4125_v4, %v4125_v4  ;;  %v5088_v18 = vcombine.high %v5086_v7, %v5086_v7  ;;  %v6328_v6 = vsel %vm3486_vm10, %v4125_v4, %v5775_v3 }
 0x27c   : > { %v4142_v2 = vcombine.high %v4132_v27, %v4132_v27  ;;  %v6325_v9 = vsel %vm3486_vm10, %v4132_v27, %v5763_v48  ;;  %v10667_v49 = vrot.slane %v5086_v7, %v8947_v63  ;;  %v6326_v14 = vsel %vm3486_vm10, %v4140_v11, %v10437_v23 }
 0x27d   : > { %v4143_v32 = vcombine.high %v4139_v59, %v4139_v59  ;;  %v6329_v1 = vsel %vm3486_vm10, %v4139_v59, %v5779_v13  ;;  %v6922_v54 = vcombine.low %v6324_v40, %v6325_v9  ;;  %v10678_v33 = vrot.slane %v5087_v15, %v8947_v63  ;;  %v8171_v15 = vpop.f32.mrf.mxu0 }
 0x27e   : > { %v6327_v48 = vsel %vm3486_vm10, %v4142_v2, %v10440_v42  ;;  %v6939_v61 = vcombine.low %v6328_v6, %v6329_v1  ;;  %v10681_v3 = vrot.slane %v5088_v18, %v8947_v63  ;;  %v6330_v19 = vsel %vm3486_vm10, %v4141_v56, %v10448_v53 }
 0x27f   : > { %v6331_v23 = vsel %vm3486_vm10, %v4143_v32, %v10455_v60  ;;  %v6923_v30 = vcombine.low %v6326_v14, %v6327_v48  ;;  %v5117_v13 = vcombine.high %v10656_v50, %v10656_v50  ;;  %v6930_v8 = vrot.slane %v6922_v54, %v8960_v55 }
 0x280   : > { %v6940_v42 = vcombine.low %v6330_v19, %v6331_v23  ;;  %v5118_v52 = vcombine.high %v10667_v49, %v10667_v49  ;;  %v5119_v20 = vcombine.high %v10678_v33, %v10678_v33  ;;  %v6947_v53 = vrot.slane %v6939_v61, %v8960_v55 }
 0x281   : > { %v6937_v45 = vrot.slane %v6923_v30, %v8960_v55  ;;  %v5120_v60 = vcombine.high %v10681_v3, %v10681_v3  ;;  %v5791_v4 = vrot.slane %v10656_v50, %v8952_v34  ;;  %v5795_v27 = vrot.slane %v10678_v33, %v8952_v34  ;;  %v3872_v30 = vpop.f32.mrf.mxu1 }
 0x282   : > { %v6954_v7 = vrot.slane %v6940_v42, %v8960_v55  ;;  %v10704_v11 = vrot.slane %v5117_v13, %v8952_v34  ;;  %v10707_v40 = vrot.slane %v5119_v20, %v8952_v34  ;;  %v5807_v56 = vrot.slane %v10667_v49, %v8952_v34 }
 0x283   : > { %v6938_v59 = vcombine.low %v6930_v8, %v6937_v45  ;;  %v5811_v18 = vrot.slane %v10681_v3, %v8952_v34  ;;  %v10714_v2 = vrot.slane %v5118_v52, %v8952_v34  ;;  %v4011_v6 = vrot.slane %v3997_v0, %v8947_v63 }
 0x284   : > { %v6955_v9 = vcombine.low %v6947_v53, %v6954_v7  ;;  %v4012_v32 = vcombine.high %v4004_v58, %v4004_v58  ;;  %v4020_v14 = vrot.slane %v4004_v58, %v8947_v63  ;;  %v10721_v1 = vrot.slane %v5120_v60, %v8952_v34 }
 0x285   : > { %7850 = vst.msk [vmem:[%s9188_s24 + $0x70] sm:$0xff] %vm596_vm7, %v6938_v59  ;;  %v5219_v54 = vcombine.high %v10564_v35, %v10564_v35  ;;  %v5226_v48 = vrot.slane %v10564_v35, %v8947_v63  ;;  %v3730_v61 = vadd.f32 %v10539_v21, %v8171_v15  ;;  %v4013_v19 = vcombine.high %v4011_v6, %v4011_v6  ;;  %v3721_v15 = vpop.f32.mrf.mxu0 }
 0x286   : > { %7851 = vst.msk [vmem:[%s9188_s24 + $0x78] sm:$0xff] %vm596_vm7, %v6955_v9  ;;  %v4027_v0 = vrot.slane %v4011_v6, %v8947_v63  ;;  %v4034_v58 = vrot.slane %v4012_v32, %v8947_v63  ;;  %v4042_v23 = vcombine.high %v4020_v14, %v4020_v14  ;;  %v6308_v13 = vsel %vm3486_vm10, %v4020_v14, %v5695_v22 }
 0x287   : > { %v5233_v8 = vrot.slane %v5219_v54, %v8947_v63  ;;  %v5234_v42 = vcombine.high %v5226_v48, %v5226_v48  ;;  %v10738_v35 = vrot.slane %v5226_v48, %v8947_v63  ;;  %v4041_v52 = vrot.slane %v4013_v19, %v8947_v63  ;;  %v8193_v54 = vpop.f32.mrf.mxu1 }
 0x288   : > { %v4043_v20 = vcombine.high %v4027_v0, %v4027_v0  ;;  %v4044_v45 = vcombine.high %v4034_v58, %v4034_v58  ;;  %v6309_v53 = vsel %vm3486_vm10, %v4034_v58, %v5699_v10  ;;  %v6310_v62 = vsel %vm3486_vm10, %v4042_v23, %v10521_v5 }
 0x289   : > { %v6786_v60 = vcombine.low %v6308_v13, %v6309_v53  ;;  %v5235_v22 = vcombine.high %v5233_v8, %v5233_v8  ;;  %v3873_v7 = vadd.f32 %v10539_v21, %v3872_v30  ;;  %v4045_v59 = vcombine.high %v4041_v52, %v4041_v52 }
 0x28a   : > { %v6311_v9 = vsel %vm3486_vm10, %v4044_v45, %v10524_v17  ;;  %v6312_v6 = vsel %vm3486_vm10, %v4027_v0, %v5711_v37  ;;  %v6313_v47 = vsel %vm3486_vm10, %v4041_v52, %v5715_v51  ;;  %v6314_v10 = vsel %vm3486_vm10, %v4043_v20, %v10531_v25  ;;  %v8172_v0 = vpop.f32.mrf.mxu0  ;;  %v3885_v20 = vpop.f32.mrf.mxu1 }
 0x28b   : > { %v6787_v5 = vcombine.low %v6310_v62, %v6311_v9  ;;  %v6803_v32 = vcombine.low %v6312_v6, %v6313_v47  ;;  %v10761_v14 = vrot.slane %v5233_v8, %v8947_v63  ;;  %v6315_v17 = vsel %vm3486_vm10, %v4045_v59, %v10551_v29 }
 0x28c   : > { %v10766_v43 = vrot.slane %v5234_v42, %v8947_v63  ;;  %v10769_v37 = vrot.slane %v5235_v22, %v8947_v63  ;;  %v5264_v16 = vcombine.high %v10738_v35, %v10738_v35  ;;  %v6794_v51 = vrot.slane %v6786_v60, %v8960_v55  ;;  %v3724_v47 = vpop.f32.mrf.mxu0 }
 0x28d   : > { %v6801_v25 = vrot.slane %v6787_v5, %v8960_v55  ;;  %v6804_v48 = vcombine.low %v6314_v10, %v6315_v17  ;;  %v5265_v19 = vcombine.high %v10761_v14, %v10761_v14  ;;  %v6811_v29 = vrot.slane %v6803_v32, %v8960_v55 }
 0x28e   : > { %v5266_v58 = vcombine.high %v10766_v43, %v10766_v43  ;;  %v5267_v23 = vcombine.high %v10769_v37, %v10769_v37  ;;  %v5887_v30 = vrot.slane %v10738_v35, %v8952_v34  ;;  %v5891_v42 = vrot.slane %v10766_v43, %v8952_v34 }
 0x28f   : > { %v6802_v13 = vcombine.low %v6794_v51, %v6801_v25  ;;  %v6818_v8 = vrot.slane %v6804_v48, %v8960_v55  ;;  %v10788_v52 = vrot.slane %v5264_v16, %v8952_v34  ;;  %v5903_v53 = vrot.slane %v10761_v14, %v8952_v34 }
 0x290   : > { %v10791_v45 = vrot.slane %v5266_v58, %v8952_v34  ;;  %v5907_v62 = vrot.slane %v10769_v37, %v8952_v34  ;;  %v10798_v60 = vrot.slane %v5265_v19, %v8952_v34  ;;  %v3774_v59 = vmax.f32 %v3730_v61, 0.0 }
 0x291   : > { %v6819_v22 = vcombine.low %v6811_v29, %v6818_v8  ;;  %7842 = vst.msk [vmem:[%s9188_s24 + $0x30] sm:$0xff] %vm596_vm7, %v6802_v13  ;;  %v3921_v9 = vmax.f32 %v3873_v7, 0.0  ;;  %v3722_v6 = vadd.f32 %v10539_v21, %v3721_v15  ;;  %v10804_v10 = vrot.slane %v5267_v23, %v8952_v34 }
 0x292   : > { %v3894_v5 = vadd.f32 %v10539_v21, %v8193_v54  ;;  %v3733_v32 = vadd.f32 %v10539_v21, %v8172_v0  ;;  %v3886_v17 = vadd.f32 %v10539_v21, %v3885_v20  ;;  %v4242_v16 = vcombine.high %v3774_v59, %v3774_v59 }
 0x293   : > { %7843 = vst.msk [vmem:[%s9188_s24 + $0x38] sm:$0xff] %vm596_vm7, %v6819_v22  ;;  %v4249_v51 = vrot.slane %v3774_v59, %v8947_v63  ;;  %v5121_v25 = vcombine.high %v3921_v9, %v3921_v9  ;;  %v5128_v61 = vrot.slane %v3921_v9, %v8947_v63  ;;  %v3772_v7 = vmax.f32 %v3722_v6, 0.0 }
 0x294   : > { %v10813_v15 = vmax.f32 %v3894_v5, 0.0  ;;  %v10815_v48 = vmax.f32 %v3733_v32, 0.0  ;;  %v10818_v19 = vadd.f32 %v10539_v21, %v3724_v47  ;;  %v4256_v54 = vrot.slane %v4242_v16, %v8947_v63 }
 0x295   : > { %v4257_v0 = vcombine.high %v4249_v51, %v4249_v51  ;;  %v4265_v29 = vrot.slane %v4249_v51, %v8947_v63  ;;  %v5135_v58 = vrot.slane %v5121_v25, %v8947_v63  ;;  %v5136_v23 = vcombine.high %v5128_v61, %v5128_v61 }
 0x296   : > { %v10824_v13 = vrot.slane %v5128_v61, %v8947_v63  ;;  %v4144_v8 = vcombine.high %v3772_v7, %v3772_v7  ;;  %v10826_v20 = vmax.f32 %v3886_v17, 0.0  ;;  %v4258_v22 = vcombine.high %v4256_v54, %v4256_v54 }
 0x297   : > { %v4272_v59 = vrot.slane %v4256_v54, %v8947_v63  ;;  %v4279_v9 = vrot.slane %v4257_v0, %v8947_v63  ;;  %v4287_v6 = vcombine.high %v4265_v29, %v4265_v29  ;;  %v6348_v47 = vsel %vm3486_vm10, %v4265_v29, %v5855_v28 }
 0x298   : > { %v5137_v5 = vcombine.high %v5135_v58, %v5135_v58  ;;  %v10835_v32 = vrot.slane %v5135_v58, %v8947_v63  ;;  %v10838_v16 = vrot.slane %v5136_v23, %v8947_v63  ;;  %v4286_v17 = vrot.slane %v4258_v22, %v8947_v63 }
 0x299   : > { %v4288_v51 = vcombine.high %v4272_v59, %v4272_v59  ;;  %v4289_v25 = vcombine.high %v4279_v9, %v4279_v9  ;;  %v6349_v61 = vsel %vm3486_vm10, %v4279_v9, %v5859_v57  ;;  %v6350_v12 = vsel %vm3486_vm10, %v4287_v6, %v10617_v39 }
 0x29a   : > { %v7160_v28 = vcombine.low %v6348_v47, %v6349_v61  ;;  %v10848_v54 = vrot.slane %v5137_v5, %v8947_v63  ;;  %v4151_v0 = vrot.slane %v3772_v7, %v8947_v63  ;;  %v4290_v29 = vcombine.high %v4286_v17, %v4286_v17 }
 0x29b   : > { %v6351_v58 = vsel %vm3486_vm10, %v4289_v25, %v10624_v38  ;;  %v6352_v31 = vsel %vm3486_vm10, %v4272_v59, %v5871_v36  ;;  %v6353_v57 = vsel %vm3486_vm10, %v4286_v17, %v5875_v41  ;;  %v6354_v39 = vsel %vm3486_vm10, %v4288_v51, %v10630_v26 }
 0x29c   : > { %v7161_v23 = vcombine.low %v6350_v12, %v6351_v58  ;;  %v7177_v22 = vcombine.low %v6352_v31, %v6353_v57  ;;  %v5166_v7 = vcombine.high %v10824_v13, %v10824_v13  ;;  %v6355_v38 = vsel %vm3486_vm10, %v4290_v29, %v10640_v24 }
 0x29d   : > { %v7168_v46 = vrot.slane %v7160_v28, %v8960_v55  ;;  %v5167_v36 = vcombine.high %v10835_v32, %v10835_v32  ;;  %v5168_v44 = vcombine.high %v10838_v16, %v10838_v16  ;;  %v7178_v59 = vcombine.low %v6354_v39, %v6355_v38 }
 0x29e   : > { %v7175_v41 = vrot.slane %v7161_v23, %v8960_v55  ;;  %v7185_v26 = vrot.slane %v7177_v22, %v8960_v55  ;;  %v5169_v9 = vcombine.high %v10848_v54, %v10848_v54  ;;  %v5823_v24 = vrot.slane %v10824_v13, %v8952_v34 }
 0x29f   : > { %v5827_v6 = vrot.slane %v10838_v16, %v8952_v34  ;;  %v10881_v47 = vrot.slane %v5166_v7, %v8952_v34  ;;  %v10884_v5 = vrot.slane %v5168_v44, %v8952_v34  ;;  %v7192_v51 = vrot.slane %v7178_v59, %v8960_v55 }
 0x2a0   : > { %v7176_v17 = vcombine.low %v7168_v46, %v7175_v41  ;;  %v5839_v25 = vrot.slane %v10835_v32, %v8952_v34  ;;  %v5843_v61 = vrot.slane %v10848_v54, %v8952_v34  ;;  %v10892_v12 = vrot.slane %v5167_v36, %v8952_v34 }
 0x2a1   : > { %v4158_v28 = vrot.slane %v4144_v8, %v8947_v63  ;;  %v4159_v29 = vcombine.high %v4151_v0, %v4151_v0  ;;  %v4167_v58 = vrot.slane %v4151_v0, %v8947_v63  ;;  %v7193_v31 = vcombine.low %v7185_v26, %v7192_v51 }
 0x2a2   : > { %7864 = vst.msk [vmem:[%s9188_s24 + $0xe0] sm:$0xff] %vm596_vm7, %v7176_v17  ;;  %v10899_v57 = vrot.slane %v5169_v9, %v8952_v34  ;;  %v5366_v39 = vcombine.high %v10813_v15, %v10813_v15  ;;  %v5373_v23 = vrot.slane %v10813_v15, %v8947_v63  ;;  %v4291_v17 = vcombine.high %v10815_v48, %v10815_v48 }
 0x2a3   : > { %v4160_v22 = vcombine.high %v4158_v28, %v4158_v28  ;;  %v4174_v7 = vrot.slane %v4158_v28, %v8947_v63  ;;  %v4181_v8 = vrot.slane %v4159_v29, %v8947_v63  ;;  %v4189_v38 = vcombine.high %v4167_v58, %v4167_v58  ;;  %7865 = vst.msk [vmem:[%s9188_s24 + $0xe8] sm:$0xff] %vm596_vm7, %v7193_v31 }
 0x2a4   : > { %v6332_v0 = vsel %vm3486_vm10, %v4167_v58, %v5791_v4  ;;  %v5380_v46 = vrot.slane %v5366_v39, %v8947_v63  ;;  %v5381_v36 = vcombine.high %v5373_v23, %v5373_v23  ;;  %v10915_v44 = vrot.slane %v5373_v23, %v8947_v63 }
 0x2a5   : > { %v4188_v15 = vrot.slane %v4160_v22, %v8947_v63  ;;  %v4190_v41 = vcombine.high %v4174_v7, %v4174_v7  ;;  %v4191_v59 = vcombine.high %v4181_v8, %v4181_v8  ;;  %v6333_v26 = vsel %vm3486_vm10, %v4181_v8, %v5795_v27 }
 0x2a6   : > { %v6334_v50 = vsel %vm3486_vm10, %v4189_v38, %v10704_v11  ;;  %v7024_v9 = vcombine.low %v6332_v0, %v6333_v26  ;;  %v5382_v4 = vcombine.high %v5380_v46, %v5380_v46  ;;  %v6336_v29 = vsel %vm3486_vm10, %v4174_v7, %v5807_v56 }
 0x2a7   : > { %v4192_v51 = vcombine.high %v4188_v15, %v4188_v15  ;;  %v6335_v28 = vsel %vm3486_vm10, %v4191_v59, %v10707_v40  ;;  %v6337_v33 = vsel %vm3486_vm10, %v4188_v15, %v5811_v18  ;;  %v6338_v27 = vsel %vm3486_vm10, %v4190_v41, %v10714_v2  ;;  %v8194_v15 = vpop.f32.mrf.mxu1 }
 0x2a8   : > { %v7025_v11 = vcombine.low %v6334_v50, %v6335_v28  ;;  %v7041_v58 = vcombine.low %v6336_v29, %v6337_v33  ;;  %v10939_v31 = vrot.slane %v5380_v46, %v8947_v63  ;;  %v10944_v49 = vrot.slane %v5381_v36, %v8947_v63  ;;  %v8175_v29 = vpop.f32.mrf.mxu0 }
 0x2a9   : > { %v6339_v40 = vsel %vm3486_vm10, %v4192_v51, %v10721_v1  ;;  %v10947_v56 = vrot.slane %v5382_v4, %v8947_v63  ;;  %v5411_v3 = vcombine.high %v10915_v44, %v10915_v44  ;;  %v7032_v18 = vrot.slane %v7024_v9, %v8960_v55  ;;  %v3888_v37 = vpop.f32.mrf.mxu1 }
 0x2aa   : > { %v7039_v2 = vrot.slane %v7025_v11, %v8960_v55  ;;  %v7042_v39 = vcombine.low %v6338_v27, %v6339_v40  ;;  %v5412_v23 = vcombine.high %v10939_v31, %v10939_v31  ;;  %v7049_v1 = vrot.slane %v7041_v58, %v8960_v55 }
 0x2ab   : > { %v5413_v22 = vcombine.high %v10944_v49, %v10944_v49  ;;  %v5414_v7 = vcombine.high %v10947_v56, %v10947_v56  ;;  %v5983_v8 = vrot.slane %v10915_v44, %v8952_v34  ;;  %v5987_v46 = vrot.slane %v10944_v49, %v8952_v34 }
 0x2ac   : > { %v7040_v38 = vcombine.low %v7032_v18, %v7039_v2  ;;  %v7056_v0 = vrot.slane %v7042_v39, %v8960_v55  ;;  %v10966_v36 = vrot.slane %v5411_v3, %v8952_v34  ;;  %v5999_v59 = vrot.slane %v10939_v31, %v8952_v34 }
 0x2ad   : > { %v10969_v41 = vrot.slane %v5413_v22, %v8952_v34  ;;  %v6003_v26 = vrot.slane %v10947_v56, %v8952_v34  ;;  %v10976_v50 = vrot.slane %v5412_v23, %v8952_v34  ;;  %v4298_v4 = vrot.slane %v10815_v48, %v8947_v63 }
 0x2ae   : > { %v7057_v9 = vcombine.low %v7049_v1, %v7056_v0  ;;  %7856 = vst.msk [vmem:[%s9188_s24 + $0xa0] sm:$0xff] %vm596_vm7, %v7040_v38  ;;  %v4305_v51 = vrot.slane %v4291_v17, %v8947_v63  ;;  %v5268_v28 = vcombine.high %v10826_v20, %v10826_v20  ;;  %v10986_v33 = vrot.slane %v5414_v7, %v8952_v34 }
 0x2af   : > { %v5275_v27 = vrot.slane %v10826_v20, %v8947_v63  ;;  %v3773_v11 = vmax.f32 %v10818_v19, 0.0  ;;  %v3897_v58 = vadd.f32 %v10539_v21, %v8194_v15  ;;  %v4306_v40 = vcombine.high %v4298_v4, %v4298_v4 }
 0x2b0   : > { %7857 = vst.msk [vmem:[%s9188_s24 + $0xa8] sm:$0xff] %vm596_vm7, %v7057_v9  ;;  %v4307_v48 = vcombine.high %v4305_v51, %v4305_v51  ;;  %v4314_v17 = vrot.slane %v4298_v4, %v8947_v63  ;;  %v4321_v3 = vrot.slane %v4305_v51, %v8947_v63  ;;  %v5282_v18 = vrot.slane %v5268_v28, %v8947_v63 }
 0x2b1   : > { %v5283_v2 = vcombine.high %v5275_v27, %v5275_v27  ;;  %v10998_v39 = vrot.slane %v5275_v27, %v8947_v63  ;;  %v3746_v20 = vadd.f32 %v10539_v21, %v8175_v29  ;;  %v4328_v19 = vrot.slane %v4306_v40, %v8947_v63 }
 0x2b2   : > { %v4335_v23 = vrot.slane %v4307_v48, %v8947_v63  ;;  %v4336_v1 = vcombine.high %v4314_v17, %v4314_v17  ;;  %v4337_v22 = vcombine.high %v4321_v3, %v4321_v3  ;;  %v6356_v7 = vsel %vm3486_vm10, %v4314_v17, %v5887_v30 }
 0x2b3   : > { %v6360_v38 = vsel %vm3486_vm10, %v4321_v3, %v5903_v53  ;;  %v5284_v0 = vcombine.high %v5282_v18, %v5282_v18  ;;  %v11012_v15 = vrot.slane %v5282_v18, %v8947_v63  ;;  %v4338_v9 = vcombine.high %v4328_v19, %v4328_v19  ;;  %v3737_v3 = vpop.f32.mrf.mxu0 }
 0x2b4   : > { %v4339_v4 = vcombine.high %v4335_v23, %v4335_v23  ;;  %v6357_v51 = vsel %vm3486_vm10, %v4328_v19, %v5891_v42  ;;  %v6358_v35 = vsel %vm3486_vm10, %v4336_v1, %v10788_v52  ;;  %v6361_v14 = vsel %vm3486_vm10, %v4335_v23, %v5907_v62 }
 0x2b5   : > { %v6362_v30 = vsel %vm3486_vm10, %v4337_v22, %v10798_v60  ;;  %v7194_v53 = vcombine.low %v6356_v7, %v6357_v51  ;;  %v11027_v28 = vrot.slane %v5283_v2, %v8947_v63  ;;  %v6359_v43 = vsel %vm3486_vm10, %v4338_v9, %v10791_v45 }
 0x2b6   : > { %v6363_v42 = vsel %vm3486_vm10, %v4339_v4, %v10804_v10  ;;  %v7211_v29 = vcombine.low %v6360_v38, %v6361_v14  ;;  %v11034_v52 = vrot.slane %v5284_v0, %v8947_v63  ;;  %v7195_v27 = vcombine.low %v6358_v35, %v6359_v43  ;;  %v8197_v0 = vpop.f32.mrf.mxu1 }
 0x2b7   : > { %v7212_v62 = vcombine.low %v6362_v30, %v6363_v42  ;;  %v5313_v60 = vcombine.high %v10998_v39, %v10998_v39  ;;  %v4193_v40 = vcombine.high %v3773_v11, %v3773_v11  ;;  %v7202_v48 = vrot.slane %v7194_v53, %v8960_v55  ;;  %v8176_v42 = vpop.f32.mrf.mxu0 }
 0x2b8   : > { %v7219_v17 = vrot.slane %v7211_v29, %v8960_v55  ;;  %v5314_v45 = vcombine.high %v11012_v15, %v11012_v15  ;;  %v5315_v10 = vcombine.high %v11027_v28, %v11027_v28  ;;  %v7209_v18 = vrot.slane %v7195_v27, %v8960_v55 }
 0x2b9   : > { %v7226_v2 = vrot.slane %v7212_v62, %v8960_v55  ;;  %v5316_v19 = vcombine.high %v11034_v52, %v11034_v52  ;;  %v5919_v23 = vrot.slane %v10998_v39, %v8952_v34  ;;  %v5923_v1 = vrot.slane %v11027_v28, %v8952_v34 }
 0x2ba   : > { %v11053_v22 = vrot.slane %v5313_v60, %v8952_v34  ;;  %v11056_v7 = vrot.slane %v5315_v10, %v8952_v34  ;;  %v5935_v38 = vrot.slane %v11012_v15, %v8952_v34  ;;  %v7210_v9 = vcombine.low %v7202_v48, %v7209_v18 }
 0x2bb   : > { %v7227_v4 = vcombine.low %v7219_v17, %v7226_v2  ;;  %v5939_v51 = vrot.slane %v11034_v52, %v8952_v34  ;;  %v11063_v35 = vrot.slane %v5314_v45, %v8952_v34  ;;  %v4200_v14 = vrot.slane %v3773_v11, %v8947_v63 }
 0x2bc   : > { %v4207_v30 = vrot.slane %v4193_v40, %v8947_v63  ;;  %v3927_v53 = vmax.f32 %v3897_v58, 0.0  ;;  %v3778_v43 = vmax.f32 %v3746_v20, 0.0  ;;  %7866 = vst.msk [vmem:[%s9188_s24 + $0xf0] sm:$0xff] %vm596_vm7, %v7210_v9  ;;  %v11072_v29 = vrot.slane %v5316_v19, %v8952_v34 }
 0x2bd   : > { %7867 = vst.msk [vmem:[%s9188_s24 + $0xf8] sm:$0xff] %vm596_vm7, %v7227_v4  ;;  %v3889_v27 = vadd.f32 %v10539_v21, %v3888_v37  ;;  %v3738_v62 = vadd.f32 %v10539_v21, %v3737_v3  ;;  %v3910_v60 = vadd.f32 %v10539_v21, %v8197_v0  ;;  %v4208_v48 = vcombine.high %v4200_v14, %v4200_v14 }
 0x2be   : > { %v4209_v11 = vcombine.high %v4207_v30, %v4207_v30  ;;  %v4216_v40 = vrot.slane %v4200_v14, %v8947_v63  ;;  %v4223_v58 = vrot.slane %v4207_v30, %v8947_v63  ;;  %v5415_v20 = vcombine.high %v3927_v53, %v3927_v53 }
 0x2bf   : > { %v5422_v17 = vrot.slane %v3927_v53, %v8947_v63  ;;  %v4438_v45 = vcombine.high %v3778_v43, %v3778_v43  ;;  %v3749_v10 = vadd.f32 %v10539_v21, %v8176_v42  ;;  %v4230_v18 = vrot.slane %v4208_v48, %v8947_v63 }
 0x2c0   : > { %v4237_v37 = vrot.slane %v4209_v11, %v8947_v63  ;;  %v4238_v2 = vcombine.high %v4216_v40, %v4216_v40  ;;  %v4239_v3 = vcombine.high %v4223_v58, %v4223_v58  ;;  %v6340_v19 = vsel %vm3486_vm10, %v4216_v40, %v5823_v24 }
 0x2c1   : > { %v6344_v0 = vsel %vm3486_vm10, %v4223_v58, %v5839_v25  ;;  %v5429_v9 = vrot.slane %v5415_v20, %v8947_v63  ;;  %v5430_v4 = vcombine.high %v5422_v17, %v5422_v17  ;;  %v4240_v14 = vcombine.high %v4230_v18, %v4230_v18 }
 0x2c2   : > { %v4241_v30 = vcombine.high %v4237_v37, %v4237_v37  ;;  %v6341_v53 = vsel %vm3486_vm10, %v4230_v18, %v5827_v6  ;;  %v6342_v13 = vsel %vm3486_vm10, %v4238_v2, %v10881_v47  ;;  %v6345_v32 = vsel %vm3486_vm10, %v4237_v37, %v5843_v61 }
 0x2c3   : > { %v6346_v24 = vsel %vm3486_vm10, %v4239_v3, %v10892_v12  ;;  %v7058_v25 = vcombine.low %v6340_v19, %v6341_v53  ;;  %v5431_v42 = vcombine.high %v5429_v9, %v5429_v9  ;;  %v6343_v48 = vsel %vm3486_vm10, %v4240_v14, %v10884_v5 }
 0x2c4   : > { %v6347_v16 = vsel %vm3486_vm10, %v4241_v30, %v10899_v57  ;;  %v7075_v6 = vcombine.low %v6344_v0, %v6345_v32  ;;  %v11109_v11 = vrot.slane %v5422_v17, %v8947_v63  ;;  %v7059_v47 = vcombine.low %v6342_v13, %v6343_v48 }
 0x2c5   : > { %v7076_v40 = vcombine.low %v6346_v24, %v6347_v16  ;;  %v11112_v54 = vrot.slane %v5429_v9, %v8947_v63  ;;  %v4445_v61 = vrot.slane %v3778_v43, %v8947_v63  ;;  %v7066_v12 = vrot.slane %v7058_v25, %v8960_v55 }
 0x2c6   : > { %v11117_v58 = vrot.slane %v5430_v4, %v8947_v63  ;;  %v11120_v5 = vrot.slane %v5431_v42, %v8947_v63  ;;  %v5460_v57 = vcombine.high %v11109_v11, %v11109_v11  ;;  %v7073_v20 = vrot.slane %v7059_v47, %v8960_v55 }
 0x2c7   : > { %v7083_v17 = vrot.slane %v7075_v6, %v8960_v55  ;;  %v7090_v18 = vrot.slane %v7076_v40, %v8960_v55  ;;  %v5461_v43 = vcombine.high %v11112_v54, %v11112_v54  ;;  %v6015_v3 = vrot.slane %v11109_v11, %v8952_v34 }
 0x2c8   : > { %v5462_v37 = vcombine.high %v11117_v58, %v11117_v58  ;;  %v5463_v2 = vcombine.high %v11120_v5, %v11120_v5  ;;  %v6019_v19 = vrot.slane %v11117_v58, %v8952_v34  ;;  %v7074_v0 = vcombine.low %v7066_v12, %v7073_v20 }
 0x2c9   : > { %v7091_v9 = vcombine.low %v7083_v17, %v7090_v18  ;;  %v11138_v4 = vrot.slane %v5460_v57, %v8952_v34  ;;  %v6031_v14 = vrot.slane %v11112_v54, %v8952_v34  ;;  %v6035_v53 = vrot.slane %v11120_v5, %v8952_v34 }
 0x2ca   : > { %v11143_v30 = vrot.slane %v5462_v37, %v8952_v34  ;;  %v11148_v13 = vrot.slane %v5461_v43, %v8952_v34  ;;  %v4452_v32 = vrot.slane %v4438_v45, %v8947_v63  ;;  %7858 = vst.msk [vmem:[%s9188_s24 + $0xb0] sm:$0xff] %vm596_vm7, %v7074_v0  ;;  %v11156_v24 = vrot.slane %v5463_v2, %v8952_v34 }
 0x2cb   : > { %7859 = vst.msk [vmem:[%s9188_s24 + $0xb8] sm:$0xff] %vm596_vm7, %v7091_v9  ;;  %v4453_v25 = vcombine.high %v4445_v61, %v4445_v61  ;;  %v4461_v42 = vrot.slane %v4445_v61, %v8947_v63  ;;  %v3925_v48 = vmax.f32 %v3889_v27, 0.0  ;;  %v3776_v47 = vmax.f32 %v3738_v62, 0.0 }
 0x2cc   : > { %v4454_v16 = vcombine.high %v4452_v32, %v4452_v32  ;;  %v4468_v6 = vrot.slane %v4452_v32, %v8947_v63  ;;  %v3930_v40 = vmax.f32 %v3910_v60, 0.0  ;;  %v3779_v20 = vmax.f32 %v3749_v10, 0.0 }
 0x2cd   : > { %v4475_v12 = vrot.slane %v4453_v25, %v8947_v63  ;;  %v4483_v57 = vcombine.high %v4461_v42, %v4461_v42  ;;  %v5317_v45 = vcombine.high %v3925_v48, %v3925_v48  ;;  %v6380_v43 = vsel %vm3486_vm10, %v4461_v42, %v5983_v8 }
 0x2ce   : > { %v4482_v17 = vrot.slane %v4454_v16, %v8947_v63  ;;  %v4484_v18 = vcombine.high %v4468_v6, %v4468_v6  ;;  %v5324_v27 = vrot.slane %v3925_v48, %v8947_v63  ;;  %v6384_v60 = vsel %vm3486_vm10, %v4468_v6, %v5999_v59 }
 0x2cf   : > { %v4485_v61 = vcombine.high %v4475_v12, %v4475_v12  ;;  %v6381_v62 = vsel %vm3486_vm10, %v4475_v12, %v5987_v46  ;;  %v5331_v10 = vrot.slane %v5317_v45, %v8947_v63  ;;  %v6382_v44 = vsel %vm3486_vm10, %v4483_v57, %v10966_v36 }
 0x2d0   : > { %v4486_v37 = vcombine.high %v4482_v17, %v4482_v17  ;;  %v6385_v8 = vsel %vm3486_vm10, %v4482_v17, %v6003_v26  ;;  %v7432_v2 = vcombine.low %v6380_v43, %v6381_v62  ;;  %v5332_v0 = vcombine.high %v5324_v27, %v5324_v27 }
 0x2d1   : > { %v6383_v49 = vsel %vm3486_vm10, %v4485_v61, %v10969_v41  ;;  %v7449_v46 = vcombine.low %v6384_v60, %v6385_v8  ;;  %v5333_v31 = vcombine.high %v5331_v10, %v5331_v10  ;;  %v6386_v59 = vsel %vm3486_vm10, %v4484_v18, %v10976_v50 }
 0x2d2   : > { %v6387_v9 = vsel %vm3486_vm10, %v4486_v37, %v10986_v33  ;;  %v7433_v32 = vcombine.low %v6382_v44, %v6383_v49  ;;  %v11189_v36 = vrot.slane %v5324_v27, %v8947_v63  ;;  %v7440_v56 = vrot.slane %v7432_v2, %v8960_v55  ;;  %v3901_v2 = vpop.f32.mrf.mxu1 }
 0x2d3   : > { %v7450_v26 = vcombine.low %v6386_v59, %v6387_v9  ;;  %v11193_v25 = vrot.slane %v5331_v10, %v8947_v63  ;;  %v11196_v41 = vrot.slane %v5332_v0, %v8947_v63  ;;  %v7457_v50 = vrot.slane %v7449_v46, %v8960_v55 }
 0x2d4   : > { %v7447_v42 = vrot.slane %v7433_v32, %v8960_v55  ;;  %v11201_v33 = vrot.slane %v5333_v31, %v8947_v63  ;;  %v5362_v48 = vcombine.high %v11189_v36, %v11189_v36  ;;  %v5951_v57 = vrot.slane %v11189_v36, %v8952_v34 }
 0x2d5   : > { %v7464_v16 = vrot.slane %v7450_v26, %v8960_v55  ;;  %v5363_v6 = vcombine.high %v11193_v25, %v11193_v25  ;;  %v5364_v12 = vcombine.high %v11196_v41, %v11196_v41  ;;  %v5955_v18 = vrot.slane %v11196_v41, %v8952_v34 }
 0x2d6   : > { %v7448_v45 = vcombine.low %v7440_v56, %v7447_v42  ;;  %v5365_v17 = vcombine.high %v11201_v33, %v11201_v33  ;;  %v11217_v43 = vrot.slane %v5362_v48, %v8952_v34  ;;  %v5967_v62 = vrot.slane %v11193_v25, %v8952_v34 }
 0x2d7   : > { %v7465_v27 = vcombine.low %v7457_v50, %v7464_v16  ;;  %v11220_v61 = vrot.slane %v5364_v12, %v8952_v34  ;;  %v5971_v60 = vrot.slane %v11201_v33, %v8952_v34  ;;  %v11229_v10 = vrot.slane %v5363_v6, %v8952_v34 }
 0x2d8   : > { %7880 = vst.msk [vmem:[%s9188_s24 + $0x160] sm:$0xff] %vm596_vm7, %v7448_v45  ;;  %v4340_v37 = vcombine.high %v3776_v47, %v3776_v47  ;;  %v4347_v44 = vrot.slane %v3776_v47, %v8947_v63  ;;  %v5562_v8 = vcombine.high %v3930_v40, %v3930_v40  ;;  %v11235_v49 = vrot.slane %v5365_v17, %v8952_v34 }
 0x2d9   : > { %7881 = vst.msk [vmem:[%s9188_s24 + $0x168] sm:$0xff] %vm596_vm7, %v7465_v27  ;;  %v5569_v46 = vrot.slane %v3930_v40, %v8947_v63  ;;  %v4487_v0 = vcombine.high %v3779_v20, %v3779_v20  ;;  %v4494_v31 = vrot.slane %v3779_v20, %v8947_v63  ;;  %v3902_v50 = vadd.f32 %v10539_v21, %v3901_v2 }
 0x2da   : > { %v4354_v59 = vrot.slane %v4340_v37, %v8947_v63  ;;  %v4355_v9 = vcombine.high %v4347_v44, %v4347_v44  ;;  %v4363_v32 = vrot.slane %v4347_v44, %v8947_v63  ;;  %v5576_v56 = vrot.slane %v5562_v8, %v8947_v63 }
 0x2db   : > { %v5577_v47 = vcombine.high %v5569_v46, %v5569_v46  ;;  %v11243_v26 = vrot.slane %v5569_v46, %v8947_v63  ;;  %v4501_v42 = vrot.slane %v4487_v0, %v8947_v63  ;;  %v4502_v2 = vcombine.high %v4494_v31, %v4494_v31 }
 0x2dc   : > { %v4356_v48 = vcombine.high %v4354_v59, %v4354_v59  ;;  %v4370_v40 = vrot.slane %v4354_v59, %v8947_v63  ;;  %v4377_v20 = vrot.slane %v4355_v9, %v8947_v63  ;;  %v4385_v16 = vcombine.high %v4363_v32, %v4363_v32 }
 0x2dd   : > { %v6364_v6 = vsel %vm3486_vm10, %v4363_v32, %v5919_v23  ;;  %v5578_v12 = vcombine.high %v5576_v56, %v5576_v56  ;;  %v11254_v45 = vrot.slane %v5576_v56, %v8947_v63  ;;  %v11257_v17 = vrot.slane %v5577_v47, %v8947_v63 }
 0x2de   : > { %v4384_v21 = vrot.slane %v4356_v48, %v8947_v63  ;;  %v4386_v27 = vcombine.high %v4370_v40, %v4370_v40  ;;  %v4387_v37 = vcombine.high %v4377_v20, %v4377_v20  ;;  %v6365_v44 = vsel %vm3486_vm10, %v4377_v20, %v5923_v1 }
 0x2df   : > { %v6366_v39 = vsel %vm3486_vm10, %v4385_v16, %v11053_v22  ;;  %v7296_v23 = vcombine.low %v6364_v6, %v6365_v44  ;;  %v11267_v8 = vrot.slane %v5578_v12, %v8947_v63  ;;  %v6368_v59 = vsel %vm3486_vm10, %v4370_v40, %v5935_v38  ;;  %v3740_v16 = vpop.f32.mrf.mxu0 }
 0x2e0   : > { %v4388_v46 = vcombine.high %v4384_v21, %v4384_v21  ;;  %v6367_v0 = vsel %vm3486_vm10, %v4387_v37, %v11056_v7  ;;  %v6369_v28 = vsel %vm3486_vm10, %v4384_v21, %v5939_v51  ;;  %v6370_v1 = vsel %vm3486_vm10, %v4386_v27, %v11063_v35 }
 0x2e1   : > { %v7297_v22 = vcombine.low %v6366_v39, %v6367_v0  ;;  %v7313_v9 = vcombine.low %v6368_v59, %v6369_v28  ;;  %v5607_v32 = vcombine.high %v11243_v26, %v11243_v26  ;;  %v7304_v15 = vrot.slane %v7296_v23, %v8960_v55  ;;  %v11320_v28 = vld [vmem:[%s11700_s2] ss:$0 sm:$0xff] }
 0x2e2   : > { %v6371_v7 = vsel %vm3486_vm10, %v4388_v46, %v11072_v29  ;;  %v5608_v38 = vcombine.high %v11254_v45, %v11254_v45  ;;  %v5609_v52 = vcombine.high %v11257_v17, %v11257_v17  ;;  %v5610_v47 = vcombine.high %v11267_v8, %v11267_v8 }
 0x2e3   : > { %v7311_v51 = vrot.slane %v7297_v22, %v8960_v55  ;;  %v7314_v56 = vcombine.low %v6370_v1, %v6371_v7  ;;  %v7321_v35 = vrot.slane %v7313_v9, %v8960_v55  ;;  %v6111_v29 = vrot.slane %v11243_v26, %v8952_v34 }
 0x2e4   : > { %v6115_v48 = vrot.slane %v11257_v17, %v8952_v34  ;;  %v11299_v40 = vrot.slane %v5607_v32, %v8952_v34  ;;  %v11302_v20 = vrot.slane %v5609_v52, %v8952_v34  ;;  %v6127_v21 = vrot.slane %v11254_v45, %v8952_v34 }
 0x2e5   : > { %v7312_v6 = vcombine.low %v7304_v15, %v7311_v51  ;;  %v7328_v12 = vrot.slane %v7314_v56, %v8960_v55  ;;  %v6131_v27 = vrot.slane %v11267_v8, %v8952_v34  ;;  %v11310_v37 = vrot.slane %v5608_v38, %v8952_v34 }
 0x2e6   : > { %v4503_v44 = vcombine.high %v4501_v42, %v4501_v42  ;;  %v4510_v39 = vrot.slane %v4494_v31, %v8947_v63  ;;  %v4517_v23 = vrot.slane %v4501_v42, %v8947_v63  ;;  %v4524_v0 = vrot.slane %v4502_v2, %v8947_v63 }
 0x2e7   : > { %v7329_v46 = vcombine.low %v7321_v35, %v7328_v12  ;;  %7872 = vst.msk [vmem:[%s9188_s24 + $0x120] sm:$0xff] %vm596_vm7, %v7312_v6  ;;  %v3928_v59 = vmax.f32 %v3902_v50, 0.0  ;;  %v3741_v1 = vadd.f32 %v11320_v28, %v3740_v16 }
 0x2e8   : > { %v4531_v22 = vrot.slane %v4503_v44, %v8947_v63  ;;  %v4532_v9 = vcombine.high %v4510_v39, %v4510_v39  ;;  %v4533_v32 = vcombine.high %v4517_v23, %v4517_v23  ;;  %v6388_v31 = vsel %vm3486_vm10, %v4510_v39, %v6015_v3 }
 0x2e9   : > { %7873 = vst.msk [vmem:[%s9188_s24 + $0x128] sm:$0xff] %vm596_vm7, %v7329_v46  ;;  %v4534_v42 = vcombine.high %v4524_v0, %v4524_v0  ;;  %v6389_v50 = vsel %vm3486_vm10, %v4524_v0, %v6019_v19  ;;  %v6392_v2 = vsel %vm3486_vm10, %v4517_v23, %v6031_v14  ;;  %v5464_v7 = vcombine.high %v3928_v59, %v3928_v59 }
 0x2ea   : > { %v4535_v15 = vcombine.high %v4531_v22, %v4531_v22  ;;  %v6390_v11 = vsel %vm3486_vm10, %v4532_v9, %v11138_v4  ;;  %v6393_v3 = vsel %vm3486_vm10, %v4531_v22, %v6035_v53  ;;  %v6394_v58 = vsel %vm3486_vm10, %v4533_v32, %v11148_v13 }
 0x2eb   : > { %v6391_v19 = vsel %vm3486_vm10, %v4534_v42, %v11143_v30  ;;  %v7466_v38 = vcombine.low %v6388_v31, %v6389_v50  ;;  %v7483_v54 = vcombine.low %v6392_v2, %v6393_v3  ;;  %v5471_v14 = vrot.slane %v3928_v59, %v8947_v63  ;;  %v8198_v42 = vpop.f32.mrf.mxu1  ;;  %v8179_v50 = vpop.f32.mrf.mxu0 }
 0x2ec   : > { %v6395_v52 = vsel %vm3486_vm10, %v4535_v15, %v11156_v24  ;;  %v7467_v51 = vcombine.low %v6390_v11, %v6391_v19  ;;  %v5478_v4 = vrot.slane %v5464_v7, %v8947_v63  ;;  %v3777_v56 = vmax.f32 %v3741_v1, 0.0 }
 0x2ed   : > { %v7474_v5 = vrot.slane %v7466_v38, %v8960_v55  ;;  %v7484_v53 = vcombine.low %v6394_v58, %v6395_v52  ;;  %v7491_v35 = vrot.slane %v7483_v54, %v8960_v55  ;;  %v5479_v13 = vcombine.high %v5471_v14, %v5471_v14 }
 0x2ee   : > { %v7481_v16 = vrot.slane %v7467_v51, %v8960_v55  ;;  %v5480_v30 = vcombine.high %v5478_v4, %v5478_v4  ;;  %v11356_v6 = vrot.slane %v5471_v14, %v8947_v63  ;;  %v11359_v12 = vrot.slane %v5478_v4, %v8947_v63 }
 0x2ef   : > { %v7498_v24 = vrot.slane %v7484_v53, %v8960_v55  ;;  %v11363_v44 = vrot.slane %v5479_v13, %v8947_v63  ;;  %v4389_v39 = vcombine.high %v3777_v56, %v3777_v56  ;;  %v4396_v23 = vrot.slane %v3777_v56, %v8947_v63  ;;  %v3904_v53 = vpop.f32.mrf.mxu1 }
 0x2f0   : > { %v7482_v46 = vcombine.low %v7474_v5, %v7481_v16  ;;  %v11367_v0 = vrot.slane %v5480_v30, %v8947_v63  ;;  %v5509_v59 = vcombine.high %v11356_v6, %v11356_v6  ;;  %v5510_v1 = vcombine.high %v11359_v12, %v11359_v12 }
 0x2f1   : > { %v11374_v22 = vrot.slane %v5610_v47, %v8952_v34  ;;  %v7499_v9 = vcombine.low %v7491_v35, %v7498_v24  ;;  %v5511_v32 = vcombine.high %v11363_v44, %v11363_v44  ;;  %v6047_v31 = vrot.slane %v11356_v6, %v8952_v34 }
 0x2f2   : > { %7882 = vst.msk [vmem:[%s9188_s24 + $0x170] sm:$0xff] %vm596_vm7, %v7482_v46  ;;  %v5512_v2 = vcombine.high %v11367_v0, %v11367_v0  ;;  %v6051_v7 = vrot.slane %v11363_v44, %v8952_v34  ;;  %v11387_v47 = vrot.slane %v5509_v59, %v8952_v34  ;;  %v6063_v15 = vrot.slane %v11359_v12, %v8952_v34 }
 0x2f3   : > { %7883 = vst.msk [vmem:[%s9188_s24 + $0x178] sm:$0xff] %vm596_vm7, %v7499_v9  ;;  %v11394_v11 = vrot.slane %v5511_v32, %v8952_v34  ;;  %v6067_v3 = vrot.slane %v11367_v0, %v8952_v34  ;;  %v4403_v58 = vrot.slane %v4389_v39, %v8947_v63  ;;  %v4404_v19 = vcombine.high %v4396_v23, %v4396_v23 }
 0x2f4   : > { %v11400_v38 = vrot.slane %v5510_v1, %v8952_v34  ;;  %v4412_v54 = vrot.slane %v4396_v23, %v8947_v63  ;;  %v3913_v14 = vadd.f32 %v11320_v28, %v8198_v42  ;;  %v3762_v52 = vadd.f32 %v11320_v28, %v8179_v50 }
 0x2f5   : > { %v11406_v51 = vrot.slane %v5512_v2, %v8952_v34  ;;  %v4405_v4 = vcombine.high %v4403_v58, %v4403_v58  ;;  %v4419_v56 = vrot.slane %v4403_v58, %v8947_v63  ;;  %v4426_v5 = vrot.slane %v4404_v19, %v8947_v63 }
 0x2f6   : > { %v4434_v35 = vcombine.high %v4412_v54, %v4412_v54  ;;  %v6372_v13 = vsel %vm3486_vm10, %v4412_v54, %v5951_v57  ;;  %v3931_v16 = vmax.f32 %v3913_v14, 0.0  ;;  %v3782_v30 = vmax.f32 %v3762_v52, 0.0 }
 0x2f7   : > { %v4433_v24 = vrot.slane %v4405_v4, %v8947_v63  ;;  %v4435_v39 = vcombine.high %v4419_v56, %v4419_v56  ;;  %v4436_v23 = vcombine.high %v4426_v5, %v4426_v5  ;;  %v6373_v46 = vsel %vm3486_vm10, %v4426_v5, %v5955_v18 }
 0x2f8   : > { %v6374_v59 = vsel %vm3486_vm10, %v4434_v35, %v11217_v43  ;;  %v7330_v1 = vcombine.low %v6372_v13, %v6373_v46  ;;  %v5611_v9 = vcombine.high %v3931_v16, %v3931_v16  ;;  %v3905_v36 = vadd.f32 %v11320_v28, %v3904_v53 }
 0x2f9   : > { %v4437_v32 = vcombine.high %v4433_v24, %v4433_v24  ;;  %v6375_v57 = vsel %vm3486_vm10, %v4436_v23, %v11220_v61  ;;  %v6376_v42 = vsel %vm3486_vm10, %v4419_v56, %v5967_v62  ;;  %v6377_v41 = vsel %vm3486_vm10, %v4433_v24, %v5971_v60 }
 0x2fa   : > { %v6378_v18 = vsel %vm3486_vm10, %v4435_v39, %v11229_v10  ;;  %v7331_v43 = vcombine.low %v6374_v59, %v6375_v57  ;;  %v7347_v50 = vcombine.low %v6376_v42, %v6377_v41  ;;  %v5618_v2 = vrot.slane %v3931_v16, %v8947_v63  ;;  %v3753_v59 = vpop.f32.mrf.mxu0 }
 0x2fb   : > { %v6379_v61 = vsel %vm3486_vm10, %v4437_v32, %v11235_v49  ;;  %v5625_v58 = vrot.slane %v5611_v9, %v8947_v63  ;;  %v4634_v25 = vcombine.high %v3782_v30, %v3782_v30  ;;  %v4641_v62 = vrot.slane %v3782_v30, %v8947_v63 }
 0x2fc   : > { %v7338_v19 = vrot.slane %v7330_v1, %v8960_v55  ;;  %v7345_v33 = vrot.slane %v7331_v43, %v8960_v55  ;;  %v7348_v60 = vcombine.low %v6378_v18, %v6379_v61  ;;  %v5626_v54 = vcombine.high %v5618_v2, %v5618_v2 }
 0x2fd   : > { %v7355_v10 = vrot.slane %v7347_v50, %v8960_v55  ;;  %v5627_v14 = vcombine.high %v5625_v58, %v5625_v58  ;;  %v11443_v52 = vrot.slane %v5618_v2, %v8947_v63  ;;  %v11446_v49 = vrot.slane %v5625_v58, %v8947_v63 }
 0x2fe   : > { %v7346_v4 = vcombine.low %v7338_v19, %v7345_v33  ;;  %v7362_v56 = vrot.slane %v7348_v60, %v8960_v55  ;;  %v11450_v5 = vrot.slane %v5626_v54, %v8947_v63  ;;  %v4648_v53 = vrot.slane %v4634_v25, %v8947_v63 }
 0x2ff   : > { %v11454_v35 = vrot.slane %v5627_v14, %v8947_v63  ;;  %v5656_v13 = vcombine.high %v11443_v52, %v11443_v52  ;;  %v5657_v16 = vcombine.high %v11446_v49, %v11446_v49  ;;  %v4649_v30 = vcombine.high %v4641_v62, %v4641_v62 }
 0x300   : > { %v7363_v24 = vcombine.low %v7355_v10, %v7362_v56  ;;  %7874 = vst.msk [vmem:[%s9188_s24 + $0x130] sm:$0xff] %vm596_vm7, %v7346_v4  ;;  %v5658_v39 = vcombine.high %v11450_v5, %v11450_v5  ;;  %v6143_v23 = vrot.slane %v11443_v52, %v8952_v34  ;;  %v6147_v46 = vrot.slane %v11450_v5, %v8952_v34 }
 0x301   : > { %v5659_v1 = vcombine.high %v11454_v35, %v11454_v35  ;;  %v11471_v9 = vrot.slane %v5656_v13, %v8952_v34  ;;  %v6159_v32 = vrot.slane %v11446_v49, %v8952_v34  ;;  %v6163_v57 = vrot.slane %v11454_v35, %v8952_v34 }
 0x302   : > { %7875 = vst.msk [vmem:[%s9188_s24 + $0x138] sm:$0xff] %vm596_vm7, %v7363_v24  ;;  %v11480_v42 = vrot.slane %v5657_v16, %v8952_v34  ;;  %v4650_v41 = vcombine.high %v4648_v53, %v4648_v53  ;;  %v4657_v18 = vrot.slane %v4641_v62, %v8947_v63  ;;  %v4664_v43 = vrot.slane %v4648_v53, %v8947_v63 }
 0x303   : > { %v11485_v50 = vrot.slane %v5658_v39, %v8952_v34  ;;  %v4671_v2 = vrot.slane %v4649_v30, %v8947_v63  ;;  %v3929_v61 = vmax.f32 %v3905_v36, 0.0  ;;  %v3754_v58 = vadd.f32 %v11320_v28, %v3753_v59  ;;  %v8180_v30 = vpop.f32.mrf.mxu0 }
 0x304   : > { %v4678_v25 = vrot.slane %v4650_v41, %v8947_v63  ;;  %v4679_v19 = vcombine.high %v4657_v18, %v4657_v18  ;;  %v4680_v33 = vcombine.high %v4664_v43, %v4664_v43  ;;  %v6412_v60 = vsel %vm3486_vm10, %v4657_v18, %v6111_v29 }
 0x305   : > { %v4681_v62 = vcombine.high %v4671_v2, %v4671_v2  ;;  %v6413_v54 = vsel %vm3486_vm10, %v4671_v2, %v6115_v48  ;;  %v6416_v36 = vsel %vm3486_vm10, %v4664_v43, %v6127_v21  ;;  %v5513_v10 = vcombine.high %v3929_v61, %v3929_v61 }
 0x306   : > { %v4682_v14 = vcombine.high %v4678_v25, %v4678_v25  ;;  %v6414_v4 = vsel %vm3486_vm10, %v4679_v19, %v11299_v40  ;;  %v6417_v26 = vsel %vm3486_vm10, %v4678_v25, %v6131_v27  ;;  %v6418_v17 = vsel %vm3486_vm10, %v4680_v33, %v11310_v37 }
 0x307   : > { %v6415_v29 = vsel %vm3486_vm10, %v4681_v62, %v11302_v20  ;;  %v7704_v48 = vcombine.low %v6412_v60, %v6413_v54  ;;  %v7721_v45 = vcombine.low %v6416_v36, %v6417_v26  ;;  %v5520_v21 = vrot.slane %v3929_v61, %v8947_v63  ;;  %v3756_v54 = vpop.f32.mrf.mxu0 }
 0x308   : > { %v6419_v56 = vsel %vm3486_vm10, %v4682_v14, %v11374_v22  ;;  %v7705_v53 = vcombine.low %v6414_v4, %v6415_v29  ;;  %v5527_v40 = vrot.slane %v5513_v10, %v8947_v63  ;;  %v3780_v13 = vmax.f32 %v3754_v58, 0.0 }
 0x309   : > { %v7712_v8 = vrot.slane %v7704_v48, %v8960_v55  ;;  %v7722_v27 = vcombine.low %v6418_v17, %v6419_v56  ;;  %v7729_v16 = vrot.slane %v7721_v45, %v8960_v55  ;;  %v5528_v37 = vcombine.high %v5520_v21, %v5520_v21 }
 0x30a   : > { %v7719_v20 = vrot.slane %v7705_v53, %v8960_v55  ;;  %v5529_v24 = vcombine.high %v5527_v40, %v5527_v40  ;;  %v11520_v39 = vrot.slane %v5520_v21, %v8947_v63  ;;  %v11523_v22 = vrot.slane %v5527_v40, %v8947_v63 }
 0x30b   : > { %v7736_v59 = vrot.slane %v7722_v27, %v8960_v55  ;;  %v11527_v41 = vrot.slane %v5528_v37, %v8947_v63  ;;  %v4536_v18 = vcombine.high %v3780_v13, %v3780_v13  ;;  %v4543_v43 = vrot.slane %v3780_v13, %v8947_v63 }
 0x30c   : > { %v7720_v2 = vcombine.low %v7712_v8, %v7719_v20  ;;  %v11531_v61 = vrot.slane %v5529_v24, %v8947_v63  ;;  %v5558_v58 = vcombine.high %v11520_v39, %v11520_v39  ;;  %v5559_v25 = vcombine.high %v11523_v22, %v11523_v22 }
 0x30d   : > { %v11538_v19 = vrot.slane %v5659_v1, %v8952_v34  ;;  %v7737_v33 = vcombine.low %v7729_v16, %v7736_v59  ;;  %v5560_v60 = vcombine.high %v11527_v41, %v11527_v41  ;;  %v6079_v62 = vrot.slane %v11520_v39, %v8952_v34 }
 0x30e   : > { %7896 = vst.msk [vmem:[%s9188_s24 + $0x1e0] sm:$0xff] %vm596_vm7, %v7720_v2  ;;  %v5561_v36 = vcombine.high %v11531_v61, %v11531_v61  ;;  %v6083_v10 = vrot.slane %v11527_v41, %v8952_v34  ;;  %v11551_v14 = vrot.slane %v5558_v58, %v8952_v34  ;;  %v6095_v1 = vrot.slane %v11523_v22, %v8952_v34 }
 0x30f   : > { %7897 = vst.msk [vmem:[%s9188_s24 + $0x1e8] sm:$0xff] %vm596_vm7, %v7737_v33  ;;  %v11558_v4 = vrot.slane %v5560_v60, %v8952_v34  ;;  %v6099_v26 = vrot.slane %v11531_v61, %v8952_v34  ;;  %v4550_v17 = vrot.slane %v4536_v18, %v8947_v63  ;;  %v4551_v29 = vcombine.high %v4543_v43, %v4543_v43 }
 0x310   : > { %v11564_v48 = vrot.slane %v5559_v25, %v8952_v34  ;;  %v4559_v45 = vrot.slane %v4543_v43, %v8947_v63  ;;  %v3765_v21 = vadd.f32 %v11320_v28, %v8180_v30  ;;  %v3757_v56 = vadd.f32 %v11320_v28, %v3756_v54 }
 0x311   : > { %v11570_v53 = vrot.slane %v5561_v36, %v8952_v34  ;;  %v4552_v40 = vcombine.high %v4550_v17, %v4550_v17  ;;  %v4566_v13 = vrot.slane %v4550_v17, %v8947_v63  ;;  %v4573_v8 = vrot.slane %v4551_v29, %v8947_v63 }
 0x312   : > { %v4581_v27 = vcombine.high %v4559_v45, %v4559_v45  ;;  %v6396_v16 = vsel %vm3486_vm10, %v4559_v45, %v6047_v31  ;;  %v3783_v37 = vmax.f32 %v3765_v21, 0.0  ;;  %v3781_v20 = vmax.f32 %v3757_v56, 0.0 }
 0x313   : > { %v4580_v30 = vrot.slane %v4552_v40, %v8947_v63  ;;  %v4582_v24 = vcombine.high %v4566_v13, %v4566_v13  ;;  %v4583_v28 = vcombine.high %v4573_v8, %v4573_v8  ;;  %v6397_v59 = vsel %vm3486_vm10, %v4573_v8, %v6051_v7 }
 0x314   : > { %v6398_v18 = vsel %vm3486_vm10, %v4581_v27, %v11387_v47  ;;  %v6400_v6 = vsel %vm3486_vm10, %v4566_v13, %v6063_v15  ;;  %v7568_v31 = vcombine.low %v6396_v16, %v6397_v59  ;;  %v4683_v43 = vcombine.high %v3783_v37, %v3783_v37 }
 0x315   : > { %v4584_v2 = vcombine.high %v4580_v30, %v4580_v30  ;;  %v6399_v58 = vsel %vm3486_vm10, %v4583_v28, %v11394_v11  ;;  %v6401_v44 = vsel %vm3486_vm10, %v4580_v30, %v6067_v3  ;;  %v6402_v7 = vsel %vm3486_vm10, %v4582_v24, %v11400_v38 }
 0x316   : > { %v7569_v47 = vcombine.low %v6398_v18, %v6399_v58  ;;  %v7576_v25 = vrot.slane %v7568_v31, %v8960_v55  ;;  %v7585_v12 = vcombine.low %v6400_v6, %v6401_v44  ;;  %v4690_v15 = vrot.slane %v3783_v37, %v8947_v63 }
 0x317   : > { %v6403_v33 = vsel %vm3486_vm10, %v4584_v2, %v11406_v51  ;;  %v4697_v60 = vrot.slane %v4683_v43, %v8947_v63  ;;  %v4585_v11 = vcombine.high %v3781_v20, %v3781_v20  ;;  %v4592_v54 = vrot.slane %v3781_v20, %v8947_v63 }
 0x318   : > { %v7583_v0 = vrot.slane %v7569_v47, %v8960_v55  ;;  %v7586_v3 = vcombine.low %v6402_v7, %v6403_v33  ;;  %v7593_v38 = vrot.slane %v7585_v12, %v8960_v55  ;;  %v4698_v36 = vcombine.high %v4690_v15, %v4690_v15 }
 0x319   : > { %v4699_v17 = vcombine.high %v4697_v60, %v4697_v60  ;;  %v4706_v29 = vrot.slane %v4690_v15, %v8947_v63  ;;  %v4713_v45 = vrot.slane %v4697_v60, %v8947_v63  ;;  %v4599_v21 = vrot.slane %v4585_v11, %v8947_v63 }
 0x31a   : > { %v7584_v51 = vcombine.low %v7576_v25, %v7583_v0  ;;  %v7600_v56 = vrot.slane %v7586_v3, %v8960_v55  ;;  %v4720_v40 = vrot.slane %v4698_v36, %v8947_v63  ;;  %v4600_v13 = vcombine.high %v4592_v54, %v4592_v54 }
 0x31b   : > { %v4727_v8 = vrot.slane %v4699_v17, %v8947_v63  ;;  %v4728_v27 = vcombine.high %v4706_v29, %v4706_v29  ;;  %v4729_v16 = vcombine.high %v4713_v45, %v4713_v45  ;;  %v6420_v37 = vsel %vm3486_vm10, %v4706_v29, %v6143_v23 }
 0x31c   : > { %v7601_v20 = vcombine.low %v7593_v38, %v7600_v56  ;;  %7888 = vst.msk [vmem:[%s9188_s24 + $0x1a0] sm:$0xff] %vm596_vm7, %v7584_v51  ;;  %v4730_v30 = vcombine.high %v4720_v40, %v4720_v40  ;;  %v6421_v24 = vsel %vm3486_vm10, %v4720_v40, %v6147_v46  ;;  %v6424_v28 = vsel %vm3486_vm10, %v4713_v45, %v6159_v32 }
 0x31d   : > { %v4731_v59 = vcombine.high %v4727_v8, %v4727_v8  ;;  %v6422_v52 = vsel %vm3486_vm10, %v4728_v27, %v11471_v9  ;;  %v6425_v23 = vsel %vm3486_vm10, %v4727_v8, %v6163_v57  ;;  %v6426_v18 = vsel %vm3486_vm10, %v4729_v16, %v11480_v42 }
 0x31e   : > { %7889 = vst.msk [vmem:[%s9188_s24 + $0x1a8] sm:$0xff] %vm596_vm7, %v7601_v20  ;;  %v6423_v5 = vsel %vm3486_vm10, %v4730_v30, %v11485_v50  ;;  %v7738_v49 = vcombine.low %v6420_v37, %v6421_v24  ;;  %v7755_v46 = vcombine.low %v6424_v28, %v6425_v23  ;;  %v4601_v32 = vcombine.high %v4599_v21, %v4599_v21 }
 0x31f   : > { %v6427_v6 = vsel %vm3486_vm10, %v4731_v59, %v11538_v19  ;;  %v7739_v9 = vcombine.low %v6422_v52, %v6423_v5  ;;  %v4608_v31 = vrot.slane %v4592_v54, %v8947_v63  ;;  %v4615_v35 = vrot.slane %v4599_v21, %v8947_v63 }
 0x320   : > { %v7746_v57 = vrot.slane %v7738_v49, %v8960_v55  ;;  %v7756_v43 = vcombine.low %v6426_v18, %v6427_v6  ;;  %v7763_v42 = vrot.slane %v7755_v46, %v8960_v55  ;;  %v4622_v2 = vrot.slane %v4600_v13, %v8947_v63 }
 0x321   : > { %v7753_v50 = vrot.slane %v7739_v9, %v8960_v55  ;;  %v4629_v58 = vrot.slane %v4601_v32, %v8947_v63  ;;  %v4630_v44 = vcombine.high %v4608_v31, %v4608_v31  ;;  %v4631_v7 = vcombine.high %v4615_v35, %v4615_v35 }
 0x322   : > { %v7770_v19 = vrot.slane %v7756_v43, %v8960_v55  ;;  %v4632_v47 = vcombine.high %v4622_v2, %v4622_v2  ;;  %v6404_v25 = vsel %vm3486_vm10, %v4608_v31, %v6079_v62  ;;  %v6405_v12 = vsel %vm3486_vm10, %v4622_v2, %v6083_v10 }
 0x323   : > { %v7754_v15 = vcombine.low %v7746_v57, %v7753_v50  ;;  %v4633_v33 = vcombine.high %v4629_v58, %v4629_v58  ;;  %v6406_v63 = vsel %vm3486_vm10, %v4630_v44, %v11551_v14  ;;  %v6408_v60 = vsel %vm3486_vm10, %v4615_v35, %v6095_v1 }
 0x324   : > { %v7771_v11 = vcombine.low %v7763_v42, %v7770_v19  ;;  %v6407_v39 = vsel %vm3486_vm10, %v4632_v47, %v11558_v4  ;;  %v6409_v41 = vsel %vm3486_vm10, %v4629_v58, %v6099_v26  ;;  %v6410_v62 = vsel %vm3486_vm10, %v4631_v7, %v11564_v48 }
 0x325   : > { %7898 = vst.msk [vmem:[%s9188_s24 + $0x1f0] sm:$0xff] %vm596_vm7, %v7754_v15  ;;  %v6411_v22 = vsel %vm3486_vm10, %v4633_v33, %v11570_v53  ;;  %v7602_v10 = vcombine.low %v6404_v25, %v6405_v12  ;;  %v7603_v14 = vcombine.low %v6406_v63, %v6407_v39  ;;  %v7619_v1 = vcombine.low %v6408_v60, %v6409_v41 }
 0x326   : > { %7899 = vst.msk [vmem:[%s9188_s24 + $0x1f8] sm:$0xff] %vm596_vm7, %v7771_v11  ;;  %v7620_v4 = vcombine.low %v6410_v62, %v6411_v22 }
 0x327   : > { %v7610_v34 = vrot.slane %v7602_v10, %v8960_v55  ;;  %v7617_v61 = vrot.slane %v7603_v14, %v8960_v55  ;;  %v7627_v26 = vrot.slane %v7619_v1, %v8960_v55 }
 0x328   : > { %v7634_v54 = vrot.slane %v7620_v4, %v8960_v55 }
 0x329   : > { %v7618_v48 = vcombine.low %v7610_v34, %v7617_v61 }
 0x32a   : > { %v7635_v0 = vcombine.low %v7627_v26, %v7634_v54 }
 0x32b   : > { %7890 = vst.msk [vmem:[%s9188_s24 + $0x1b0] sm:$0xff] %vm596_vm7, %v7618_v48 }
 0x32c   : > { %7891 = vst.msk [vmem:[%s9188_s24 + $0x1b8] sm:$0xff] %vm596_vm7, %v7635_v0 }
 0x32d PF: > { %s13_s16 = sadd.s32 1, %s8300_s16   ;;  %s11711_s12 = smov %s8292_s14 }
 0x32e   : > { %p10_p7 = scmp.ge.s32.totalorder %s13_s16, 6   ;;  %s11712_s13 = smov %s8296_s15 }
 0x32f   : > { %s11713_s14 = smov %s11716_s17  ;;  %s11714_s15 = smov %s11720_s18 }
 0x330   :  { %12 = sbr.rel (!%p10_p7) target bundleno = 3 (0x3), region = 66 }

</bundles_post_ra>
